<compile_context>
chip_gen: v7x
topology: tpu7x:2x2x1
jax: 0.10.0
libtpu: 0.0.40
codegen_flags: <defaults>
</compile_context>

<pallas_src>
import jax
import jax.numpy as jnp
from jax.experimental import pallas as pl
from jax.experimental.pallas import tpu as pltpu

NUM_ATOM_TYPE = 120
NUM_CHIRALITY_TAG = 3
NUM_BOND_TYPE = 6
NUM_BOND_DIRECTION = 3
BN_EPS = 1e-5
EDGE_BLOCK = 128   # bond-type/direction count lanes appended to the adjacency


# ------------------------------- Pallas kernel --------------------------------

def fused_gnn_graphpred_kernel(adj_ref, h0_ref, maskrow_ref, pool_ref, inv_ref,
                               wp_ref, bp_ref,
                               eedge_ref, w1_ref, b1_ref, w2_ref, b2_ref,
                               gamma_ref, beta_ref,
                               out_ref, hx_ref):
    l = pl.program_id(0)
    num_layer = pl.num_programs(0)
    n_pad = h0_ref.shape[0]                        # static Np

    # First layer: seed the persistent node-state scratch with the atom embeddings.
    @pl.when(l == 0)
    def _():
        hx_ref[pl.ds(0, n_pad), :] = h0_ref[...]

    # Stack this layer's bond-embedding tables under h so that the edge
    # contribution is contracted by the SAME matmul as the adjacency.
    hx_ref[pl.ds(n_pad, EDGE_BLOCK), :] = eedge_ref[0]

    # --- GIN neighbor aggregation + edge embeddings, one bf16 MXU matmul ------
    #     aggr = [A | C] @ [h ; emb]   (f32 accumulation)
    aggr = jnp.dot(adj_ref[...], hx_ref[...], preferred_element_type=jnp.float32)

    # --- GIN MLP: Linear(D -> 2D) -> ReLU -> Linear(2D -> D) ------------------
    h1 = jnp.dot(aggr.astype(jnp.bfloat16), w1_ref[0],
                 preferred_element_type=jnp.float32) + b1_ref[0]
    h1 = jnp.maximum(h1, 0.0)
    h2 = jnp.dot(h1.astype(jnp.bfloat16), w2_ref[0],
                 preferred_element_type=jnp.float32) + b2_ref[0]

    # --- BatchNorm1d (training-mode batch stats, biased var) ------------------
    # Stats over real node rows only, computed as MXU row-vector matmuls
    # (mask row 0 holds 1/N on real node columns, 0 elsewhere).
    mrow = maskrow_ref[...]                                    # [8, Np] f32
    mean = jnp.dot(mrow, h2, preferred_element_type=jnp.float32)[0:1, :]
    ex2 = jnp.dot(mrow, h2 * h2, preferred_element_type=jnp.float32)[0:1, :]
    var = ex2 - mean * mean
    hbn = (h2 - mean) * jax.lax.rsqrt(var + BN_EPS) * gamma_ref[0] + beta_ref[0]

    @pl.when(l != num_layer - 1)
    def _():
        # ReLU on all but the last GNN layer (dropout with ratio 0 is identity);
        # keep the carried node state resident in bf16.
        hx_ref[pl.ds(0, n_pad), :] = jnp.maximum(hbn, 0.0).astype(jnp.bfloat16)

    @pl.when(l == num_layer - 1)
    def _():
        # Mean graph pooling: 0/1 incidence matmul (bf16) + exact f32 1/count
        # scale, then graph_pred_linear — all on the MXU, lane-dense output.
        h_last = hbn.astype(jnp.bfloat16)
        g = jnp.dot(pool_ref[...], h_last,
                    preferred_element_type=jnp.float32) * inv_ref[...]
        out_ref[...] = jnp.dot(g.astype(jnp.bfloat16), wp_ref[...],
                               preferred_element_type=jnp.float32) + bp_ref[...]


# ------------------------------- helpers ---------------------------------------

def _round_up(x, m):
    return ((x + m - 1) // m) * m


def _pad2(a, rows, cols):
    return jnp.pad(a, ((0, rows - a.shape[0]), (0, cols - a.shape[1])))


def _mxu_align():
    # v6e/v7x MXUs are 256 deep; <=v5 are 128. Pad M/K/N dims accordingly.
    try:
        kind = jax.devices()[0].device_kind.lower()
    except Exception:
        return 128
    if any(t in kind for t in ("v2", "v3", "v4", "v5")):
        return 128
    return 256


def _vmem_limit_bytes(Np, Dp, Hp, Gp, Tp):
    resident = (Np * (Np + EDGE_BLOCK) * 2        # augmented adjacency (bf16)
                + Np * Dp * 2                     # h0 (bf16)
                + (Np + EDGE_BLOCK) * Dp * 2      # node-state scratch (bf16)
                + 8 * Np * 4                      # BN mask row (f32)
                + Gp * Np * 2 + Gp * 128 * 4      # pool incidence + inv counts
                + Dp * Tp * 2 + Tp * 4            # prediction head
                + Gp * Tp * 4)                    # output block
    per_layer = (EDGE_BLOCK * Dp + Dp * Hp + Hp * Dp) * 2 + (Hp + 3 * Dp) * 4
    temps = Np * (2 * Hp + 4 * Dp) * 4            # f32 aggr/h1/h2/... live values
    est = resident + 2 * per_layer + temps        # x2: double-buffered streaming
    # generous margin, floored for compiler scratch, capped for v7x headroom
    return int(min(max(2 * est, 16 * 2 ** 20), 48 * 2 ** 20))


# ------------------------------- forward wrapper -------------------------------

def gnn_graphpred_forward(params, x, edge_index, edge_attr, batch, num_graphs):
    N = x.shape[0]
    D = params["x_emb1"].shape[1]
    T = params["wp"].shape[1]
    H = 2 * D
    L = len(params["layers"])

    align = _mxu_align()
    Np = _round_up(N, align)
    Dp = _round_up(D, align)
    Hp = _round_up(H, align)
    Gp = _round_up(num_graphs, 16)
    Tp = _round_up(T, 128)

    # ---- plain-JAX glue: embedding gathers, self loops, structural precompute --
    h0 = params["x_emb1"][x[:, 0]] + params["x_emb2"][x[:, 1]]            # [N, D]
    h0 = _pad2(h0, Np, Dp).astype(jnp.bfloat16)

    loops = jnp.arange(N, dtype=edge_index.dtype)
    ei = jnp.concatenate([edge_index, jnp.stack([loops, loops], axis=0)], axis=1)
    self_attr = jnp.zeros((N, 2), edge_attr.dtype).at[:, 0].set(4)        # [4, 0]
    ea = jnp.concatenate([edge_attr, self_attr], axis=0)
    src, tgt = ei[0], ei[1]

    # Augmented adjacency: [A | bond-type counts | bond-dir counts | 0-pad].
    # bf16 is exact while per-entry multiplicities stay <= 256 (molecular graphs).
    adj = jnp.zeros((Np, Np), jnp.float32).at[tgt, src].add(1.0)
    c1 = jnp.zeros((Np, NUM_BOND_TYPE), jnp.float32).at[tgt, ea[:, 0]].add(1.0)
    c2 = jnp.zeros((Np, NUM_BOND_DIRECTION), jnp.float32).at[tgt, ea[:, 1]].add(1.0)
    pad_cols = EDGE_BLOCK - NUM_BOND_TYPE - NUM_BOND_DIRECTION
    adj_aug = jnp.concatenate(
        [adj, c1, c2, jnp.zeros((Np, pad_cols), jnp.float32)],
        axis=1).astype(jnp.bfloat16)                                      # [Np, Np+128]

    # BN mask row (row 0 = 1/N on real node columns) for MXU stat matmuls.
    maskrow = jnp.zeros((8, Np), jnp.float32).at[0, :N].set(1.0 / N)

    # Mean pooling: 0/1 incidence (bf16) + f32 reciprocal counts (applied after
    # the matmul so the mean stays exact).
    # TODO(synk): original forward calls self.pool(node_representation[-1], batch)
    # (shape-inconsistent); we pool the full final node representation.
    inc = (batch[None, :] ==
           jnp.arange(num_graphs, dtype=batch.dtype)[:, None]).astype(jnp.float32)
    counts = jnp.maximum(inc.sum(axis=1, keepdims=True), 1.0)
    pool = _pad2(inc, Gp, Np).astype(jnp.bfloat16)                        # [Gp, Np]
    inv_cnt = _pad2(1.0 / counts, Gp, 1)                                  # [Gp, 1]

    # ---- stack & pad per-layer params (streamed per layer by BlockSpec) --------
    layers = params["layers"]
    eedge = jnp.stack([
        _pad2(jnp.concatenate([lp["edge_emb1"], lp["edge_emb2"]], axis=0),
              EDGE_BLOCK, Dp) for lp in layers]).astype(jnp.bfloat16)     # [L,128,Dp]
    w1 = jnp.stack([_pad2(lp["w1"], Dp, Hp) for lp in layers]).astype(jnp.bfloat16)
    b1 = jnp.stack([_pad2(lp["b1"], 1, Hp) for lp in layers])
    w2 = jnp.stack([_pad2(lp["w2"], Hp, Dp) for lp in layers]).astype(jnp.bfloat16)
    b2 = jnp.stack([_pad2(lp["b2"], 1, Dp) for lp in layers])
    gamma = jnp.stack([_pad2(lp["gamma"], 1, Dp) for lp in layers])
    beta = jnp.stack([_pad2(lp["beta"], 1, Dp) for lp in layers])
    wp = _pad2(params["wp"], Dp, Tp).astype(jnp.bfloat16)
    bp = _pad2(params["bp"], 1, Tp)

    in_specs = [
        pl.BlockSpec((Np, Np + EDGE_BLOCK), lambda l: (0, 0)),   # adjacency (resident)
        pl.BlockSpec((Np, Dp), lambda l: (0, 0)),                # h0
        pl.BlockSpec((8, Np), lambda l: (0, 0)),                 # BN mask row
        pl.BlockSpec((Gp, Np), lambda l: (0, 0)),                # pool incidence
        pl.BlockSpec((Gp, 1), lambda l: (0, 0)),                 # 1/count
        pl.BlockSpec((Dp, Tp), lambda l: (0, 0)),                # wp
        pl.BlockSpec((1, Tp), lambda l: (0, 0)),                 # bp
        pl.BlockSpec((1, EDGE_BLOCK, Dp), lambda l: (l, 0, 0)),  # per-layer streams
        pl.BlockSpec((1, Dp, Hp), lambda l: (l, 0, 0)),
        pl.BlockSpec((1, 1, Hp), lambda l: (l, 0, 0)),
        pl.BlockSpec((1, Hp, Dp), lambda l: (l, 0, 0)),
        pl.BlockSpec((1, 1, Dp), lambda l: (l, 0, 0)),
        pl.BlockSpec((1, 1, Dp), lambda l: (l, 0, 0)),
        pl.BlockSpec((1, 1, Dp), lambda l: (l, 0, 0)),
    ]

    out = pl.pallas_call(
        fused_gnn_graphpred_kernel,
        out_shape=jax.ShapeDtypeStruct((Gp, Tp), jnp.float32),
        grid=(L,),
        in_specs=in_specs,
        out_specs=pl.BlockSpec((Gp, Tp), lambda l: (0, 0)),
        scratch_shapes=[pltpu.VMEM((Np + EDGE_BLOCK, Dp), jnp.bfloat16)],
        compiler_params=pltpu.CompilerParams(
            dimension_semantics=("arbitrary",),
            vmem_limit_bytes=_vmem_limit_bytes(Np, Dp, Hp, Gp, Tp)),
    )(adj_aug, h0, maskrow, pool, inv_cnt, wp, bp,
      eedge, w1, b1, w2, b2, gamma, beta)

    return out[:num_graphs, :T]


# ------------------------------- parameter init -------------------------------

def init_params(key, num_layer, emb_dim, num_tasks):
    ks = jax.random.split(key, 4 + num_layer * 4)
    p = {
        "x_emb1": jax.random.normal(ks[0], (NUM_ATOM_TYPE, emb_dim), jnp.float32) * 0.1,
        "x_emb2": jax.random.normal(ks[1], (NUM_CHIRALITY_TAG, emb_dim), jnp.float32) * 0.1,
        "wp": jax.random.normal(ks[2], (emb_dim, num_tasks), jnp.float32) * 0.05,
        "bp": jax.random.normal(ks[3], (1, num_tasks), jnp.float32) * 0.01,
        "layers": [],
    }
    for l in range(num_layer):
        k1, k2, k3, k4 = ks[4 + 4 * l: 8 + 4 * l]
        p["layers"].append({
            "edge_emb1": jax.random.normal(k1, (NUM_BOND_TYPE, emb_dim), jnp.float32) * 0.1,
            "edge_emb2": jax.random.normal(k2, (NUM_BOND_DIRECTION, emb_dim), jnp.float32) * 0.1,
            # torch.nn.Linear weights are [out, in]; we store the transposed [in, out]
            "w1": jax.random.normal(k3, (emb_dim, 2 * emb_dim), jnp.float32) * 0.05,
            "b1": jnp.zeros((1, 2 * emb_dim), jnp.float32),
            "w2": jax.random.normal(k4, (2 * emb_dim, emb_dim), jnp.float32) * 0.05,
            "b2": jnp.zeros((1, emb_dim), jnp.float32),
            "gamma": jnp.ones((1, emb_dim), jnp.float32),
            "beta": jnp.zeros((1, emb_dim), jnp.float32),
        })
    return p


# ------------------------------------ main ------------------------------------

if __name__ == "__main__":
    num_layer = 2
    emb_dim = 32
    num_tasks = 4
    N = 16          # nodes
    E = 32          # edges (before self loops)
    num_graphs = 2

    key = jax.random.PRNGKey(0)
    kp, kx1, kx2, ke, ka1, ka2 = jax.random.split(key, 6)

    params = init_params(kp, num_layer, emb_dim, num_tasks)

    x = jnp.stack([
        jax.random.randint(kx1, (N,), 0, NUM_ATOM_TYPE, dtype=jnp.int32),
        jax.random.randint(kx2, (N,), 0, NUM_CHIRALITY_TAG, dtype=jnp.int32),
    ], axis=1)                                                          # [N, 2]
    edge_index = jax.random.randint(ke, (2, E), 0, N, dtype=jnp.int32)  # [2, E]
    edge_attr = jnp.stack([
        jax.random.randint(ka1, (E,), 0, NUM_BOND_TYPE, dtype=jnp.int32),
        jax.random.randint(ka2, (E,), 0, NUM_BOND_DIRECTION, dtype=jnp.int32),
    ], axis=1)                                                          # [E, 2]
    batch = jnp.concatenate([jnp.zeros(N // 2, jnp.int32),
                             jnp.ones(N - N // 2, jnp.int32)])          # [N]

    out = gnn_graphpred_forward(params, x, edge_index, edge_attr, batch, num_graphs)
    out = jax.block_until_ready(out)
    assert out.shape == (num_graphs, num_tasks)
    print("KERNEL_OK")
</pallas_src>

<mosaic_0001>
module attributes {stable_mosaic.version = 11 : i64} {
  func.func @fused_gnn_graphpred_kernel(%arg0: i32, %arg1: memref<256x384xbf16, #tpu.memory_space<vmem>>, %arg2: memref<256x256xbf16, #tpu.memory_space<vmem>>, %arg3: memref<8x256xf32, #tpu.memory_space<vmem>>, %arg4: memref<16x256xbf16, #tpu.memory_space<vmem>>, %arg5: memref<16x1xf32, #tpu.memory_space<vmem>>, %arg6: memref<256x128xbf16, #tpu.memory_space<vmem>>, %arg7: memref<1x128xf32, #tpu.memory_space<vmem>>, %arg8: memref<1x128x256xbf16, #tpu.memory_space<vmem>>, %arg9: memref<1x256x256xbf16, #tpu.memory_space<vmem>>, %arg10: memref<1x1x256xf32, #tpu.memory_space<vmem>>, %arg11: memref<1x256x256xbf16, #tpu.memory_space<vmem>>, %arg12: memref<1x1x256xf32, #tpu.memory_space<vmem>>, %arg13: memref<1x1x256xf32, #tpu.memory_space<vmem>>, %arg14: memref<1x1x256xf32, #tpu.memory_space<vmem>>, %arg15: memref<16x128xf32, #tpu.memory_space<vmem>>, %arg16: memref<384x256xbf16, #tpu.memory_space<vmem>>) attributes {dimension_semantics = [#tpu.dimension_semantics<arbitrary>], iteration_bounds = array<i64: 2>, scalar_prefetch = 0 : i64, scratch_operands = 1 : i64, tpu.core_type = #tpu.core_type<tc>, window_params = [{pipeline_mode = #tpu.pipeline_mode<synchronous>, transform_indices = @transform_0, window_bounds = array<i64: 256, 384>}, {pipeline_mode = #tpu.pipeline_mode<synchronous>, transform_indices = @transform_1, window_bounds = array<i64: 256, 256>}, {pipeline_mode = #tpu.pipeline_mode<synchronous>, transform_indices = @transform_2, window_bounds = array<i64: 8, 256>}, {pipeline_mode = #tpu.pipeline_mode<synchronous>, transform_indices = @transform_3, window_bounds = array<i64: 16, 256>}, {pipeline_mode = #tpu.pipeline_mode<synchronous>, transform_indices = @transform_4, window_bounds = array<i64: 16, 1>}, {pipeline_mode = #tpu.pipeline_mode<synchronous>, transform_indices = @transform_5, window_bounds = array<i64: 256, 128>}, {pipeline_mode = #tpu.pipeline_mode<synchronous>, transform_indices = @transform_6, window_bounds = array<i64: 1, 128>}, {transform_indices = @transform_7, window_bounds = array<i64: 1, 128, 256>}, {transform_indices = @transform_8, window_bounds = array<i64: 1, 256, 256>}, {transform_indices = @transform_9, window_bounds = array<i64: 1, 1, 256>}, {transform_indices = @transform_10, window_bounds = array<i64: 1, 256, 256>}, {transform_indices = @transform_11, window_bounds = array<i64: 1, 1, 256>}, {transform_indices = @transform_12, window_bounds = array<i64: 1, 1, 256>}, {transform_indices = @transform_13, window_bounds = array<i64: 1, 1, 256>}, {pipeline_mode = #tpu.pipeline_mode<synchronous>, transform_indices = @transform_14, window_bounds = array<i64: 16, 128>}]} {
    %c0_i32 = arith.constant 0 : i32
    %0 = arith.cmpi eq, %arg0, %c0_i32 : i32
    %1 = arith.extui %0 : i1 to i32
    %c0_i32_0 = arith.constant 0 : i32
    %2 = arith.cmpi ne, %1, %c0_i32_0 : i32
    scf.if %2 {
      %c0_37 = arith.constant 0 : index
      %c0_38 = arith.constant 0 : index
      %56 = vector.load %arg2[%c0_37, %c0_38] : memref<256x256xbf16, #tpu.memory_space<vmem>>, vector<256x256xbf16>
      %c0_39 = arith.constant 0 : index
      %c0_40 = arith.constant 0 : index
      %57 = vector.load %arg16[%c0_39, %c0_40] : memref<384x256xbf16, #tpu.memory_space<vmem>>, vector<256x256xbf16>
      tpu.vector_store %arg16[%c0_39, %c0_40], %56 {strides = array<i32>} : memref<384x256xbf16, #tpu.memory_space<vmem>>, vector<256x256xbf16>,
    } else {
    }
    %c0 = arith.constant 0 : index
    %c0_1 = arith.constant 0 : index
    %c0_2 = arith.constant 0 : index
    %3 = vector.load %arg8[%c0, %c0_1, %c0_2] : memref<1x128x256xbf16, #tpu.memory_space<vmem>>, vector<1x128x256xbf16>
    %4 = vector.shape_cast %3 : vector<1x128x256xbf16> to vector<128x256xbf16>
    %c256 = arith.constant 256 : index
    %c0_3 = arith.constant 0 : index
    %5 = vector.load %arg16[%c256, %c0_3] : memref<384x256xbf16, #tpu.memory_space<vmem>>, vector<128x256xbf16>
    tpu.vector_store %arg16[%c256, %c0_3], %4 {strides = array<i32>} : memref<384x256xbf16, #tpu.memory_space<vmem>>, vector<128x256xbf16>,
    %c0_4 = arith.constant 0 : index
    %c0_5 = arith.constant 0 : index
    %6 = vector.load %arg1[%c0_4, %c0_5] : memref<256x384xbf16, #tpu.memory_space<vmem>>, vector<256x384xbf16>
    %c0_6 = arith.constant 0 : index
    %c0_7 = arith.constant 0 : index
    %7 = vector.load %arg16[%c0_6, %c0_7] : memref<384x256xbf16, #tpu.memory_space<vmem>>, vector<384x256xbf16>
    %cst = arith.constant dense<0.000000e+00> : vector<256x256xf32>
    %8 = tpu.matmul %6, %7, %cst {dimension_numbers = #tpu.dot_dimension_numbers<[1], [0], [0], [1], [0, 0, 1, 1], [], []>} : vector<256x384xbf16>, vector<384x256xbf16>, vector<256x256xf32> -> vector<256x256xf32>
    %9 = arith.truncf %8 : vector<256x256xf32> to vector<256x256xbf16>
    %c0_8 = arith.constant 0 : index
    %c0_9 = arith.constant 0 : index
    %c0_10 = arith.constant 0 : index
    %10 = vector.load %arg9[%c0_8, %c0_9, %c0_10] : memref<1x256x256xbf16, #tpu.memory_space<vmem>>, vector<1x256x256xbf16>
    %11 = vector.shape_cast %10 : vector<1x256x256xbf16> to vector<256x256xbf16>
    %cst_11 = arith.constant dense<0.000000e+00> : vector<256x256xf32>
    %12 = tpu.matmul %9, %11, %cst_11 {dimension_numbers = #tpu.dot_dimension_numbers<[1], [0], [0], [1], [0, 0, 1, 1], [], []>} : vector<256x256xbf16>, vector<256x256xbf16>, vector<256x256xf32> -> vector<256x256xf32>
    %c0_12 = arith.constant 0 : index
    %c0_13 = arith.constant 0 : index
    %c0_14 = arith.constant 0 : index
    %13 = vector.load %arg10[%c0_12, %c0_13, %c0_14] : memref<1x1x256xf32, #tpu.memory_space<vmem>>, vector<1x1x256xf32>
    %14 = vector.shape_cast %13 : vector<1x1x256xf32> to vector<1x256xf32>
    %15 = vector.broadcast %14 : vector<1x256xf32> to vector<256x256xf32>
    %16 = arith.addf %12, %15 : vector<256x256xf32>
    %cst_15 = arith.constant 0.000000e+00 : f32
    %17 = vector.broadcast %cst_15 : f32 to vector<256x256xf32>
    %18 = arith.maximumf %16, %17 : vector<256x256xf32>
    %19 = arith.truncf %18 : vector<256x256xf32> to vector<256x256xbf16>
    %c0_16 = arith.constant 0 : index
    %c0_17 = arith.constant 0 : index
    %c0_18 = arith.constant 0 : index
    %20 = vector.load %arg11[%c0_16, %c0_17, %c0_18] : memref<1x256x256xbf16, #tpu.memory_space<vmem>>, vector<1x256x256xbf16>
    %21 = vector.shape_cast %20 : vector<1x256x256xbf16> to vector<256x256xbf16>
    %cst_19 = arith.constant dense<0.000000e+00> : vector<256x256xf32>
    %22 = tpu.matmul %19, %21, %cst_19 {dimension_numbers = #tpu.dot_dimension_numbers<[1], [0], [0], [1], [0, 0, 1, 1], [], []>} : vector<256x256xbf16>, vector<256x256xbf16>, vector<256x256xf32> -> vector<256x256xf32>
    %c0_20 = arith.constant 0 : index
    %c0_21 = arith.constant 0 : index
    %c0_22 = arith.constant 0 : index
    %23 = vector.load %arg12[%c0_20, %c0_21, %c0_22] : memref<1x1x256xf32, #tpu.memory_space<vmem>>, vector<1x1x256xf32>
    %24 = vector.shape_cast %23 : vector<1x1x256xf32> to vector<1x256xf32>
    %25 = vector.broadcast %24 : vector<1x256xf32> to vector<256x256xf32>
    %26 = arith.addf %22, %25 : vector<256x256xf32>
    %c0_23 = arith.constant 0 : index
    %c0_24 = arith.constant 0 : index
    %27 = vector.load %arg3[%c0_23, %c0_24] : memref<8x256xf32, #tpu.memory_space<vmem>>, vector<8x256xf32>
    %cst_25 = arith.constant dense<0.000000e+00> : vector<8x256xf32>
    %28 = tpu.matmul %27, %26, %cst_25 {dimension_numbers = #tpu.dot_dimension_numbers<[1], [0], [0], [1], [0, 0, 1, 1], [], []>} : vector<8x256xf32>, vector<256x256xf32>, vector<8x256xf32> -> vector<8x256xf32>
    %29 = vector.extract_strided_slice %28 {offsets = [0, 0], sizes = [1, 256], strides = [1, 1]} : vector<8x256xf32> to vector<1x256xf32>
    %30 = arith.mulf %26, %26 : vector<256x256xf32>
    %cst_26 = arith.constant dense<0.000000e+00> : vector<8x256xf32>
    %31 = tpu.matmul %27, %30, %cst_26 {dimension_numbers = #tpu.dot_dimension_numbers<[1], [0], [0], [1], [0, 0, 1, 1], [], []>} : vector<8x256xf32>, vector<256x256xf32>, vector<8x256xf32> -> vector<8x256xf32>
    %32 = vector.extract_strided_slice %31 {offsets = [0, 0], sizes = [1, 256], strides = [1, 1]} : vector<8x256xf32> to vector<1x256xf32>
    %33 = arith.mulf %29, %29 : vector<1x256xf32>
    %34 = arith.subf %32, %33 : vector<1x256xf32>
    %35 = vector.broadcast %29 : vector<1x256xf32> to vector<256x256xf32>
    %36 = arith.subf %26, %35 : vector<256x256xf32>
    %cst_27 = arith.constant 9.99999974E-6 : f32
    %37 = vector.broadcast %cst_27 : f32 to vector<1x256xf32>
    %38 = arith.addf %34, %37 : vector<1x256xf32>
    %39 = math.rsqrt %38 : vector<1x256xf32>
    %40 = vector.broadcast %39 : vector<1x256xf32> to vector<256x256xf32>
    %41 = arith.mulf %36, %40 : vector<256x256xf32>
    %c0_28 = arith.constant 0 : index
    %c0_29 = arith.constant 0 : index
    %c0_30 = arith.constant 0 : index
    %42 = vector.load %arg13[%c0_28, %c0_29, %c0_30] : memref<1x1x256xf32, #tpu.memory_space<vmem>>, vector<1x1x256xf32>
    %43 = vector.shape_cast %42 : vector<1x1x256xf32> to vector<1x256xf32>
    %44 = vector.broadcast %43 : vector<1x256xf32> to vector<256x256xf32>
    %45 = arith.mulf %41, %44 : vector<256x256xf32>
    %c0_31 = arith.constant 0 : index
    %c0_32 = arith.constant 0 : index
    %c0_33 = arith.constant 0 : index
    %46 = vector.load %arg14[%c0_31, %c0_32, %c0_33] : memref<1x1x256xf32, #tpu.memory_space<vmem>>, vector<1x1x256xf32>
    %47 = vector.shape_cast %46 : vector<1x1x256xf32> to vector<1x256xf32>
    %48 = vector.broadcast %47 : vector<1x256xf32> to vector<256x256xf32>
    %49 = arith.addf %45, %48 : vector<256x256xf32>
    %c1_i32 = arith.constant 1 : i32
    %50 = arith.cmpi ne, %arg0, %c1_i32 : i32
    %51 = arith.extui %50 : i1 to i32
    %c0_i32_34 = arith.constant 0 : i32
    %52 = arith.cmpi ne, %51, %c0_i32_34 : i32
    scf.if %52 {
      %cst_37 = arith.constant 0.000000e+00 : f32
      %56 = vector.broadcast %cst_37 : f32 to vector<256x256xf32>
      %57 = arith.maximumf %49, %56 : vector<256x256xf32>
      %58 = arith.truncf %57 : vector<256x256xf32> to vector<256x256xbf16>
      %c0_38 = arith.constant 0 : index
      %c0_39 = arith.constant 0 : index
      %59 = vector.load %arg16[%c0_38, %c0_39] : memref<384x256xbf16, #tpu.memory_space<vmem>>, vector<256x256xbf16>
      tpu.vector_store %arg16[%c0_38, %c0_39], %58 {strides = array<i32>} : memref<384x256xbf16, #tpu.memory_space<vmem>>, vector<256x256xbf16>,
    } else {
    }
    %c1_i32_35 = arith.constant 1 : i32
    %53 = arith.cmpi eq, %arg0, %c1_i32_35 : i32
    %54 = arith.extui %53 : i1 to i32
    %c0_i32_36 = arith.constant 0 : i32
    %55 = arith.cmpi ne, %54, %c0_i32_36 : i32
    scf.if %55 {
      %56 = arith.truncf %49 : vector<256x256xf32> to vector<256x256xbf16>
      %c0_37 = arith.constant 0 : index
      %c0_38 = arith.constant 0 : index
      %57 = vector.load %arg4[%c0_37, %c0_38] : memref<16x256xbf16, #tpu.memory_space<vmem>>, vector<16x256xbf16>
      %cst_39 = arith.constant dense<0.000000e+00> : vector<16x256xf32>
      %58 = tpu.matmul %57, %56, %cst_39 {dimension_numbers = #tpu.dot_dimension_numbers<[1], [0], [0], [1], [0, 0, 1, 1], [], []>} : vector<16x256xbf16>, vector<256x256xbf16>, vector<16x256xf32> -> vector<16x256xf32>
      %c0_40 = arith.constant 0 : index
      %c0_41 = arith.constant 0 : index
      %59 = vector.load %arg5[%c0_40, %c0_41] : memref<16x1xf32, #tpu.memory_space<vmem>>, vector<16x1xf32>
      %60 = vector.broadcast %59 : vector<16x1xf32> to vector<16x256xf32>
      %61 = arith.mulf %58, %60 : vector<16x256xf32>
      %62 = arith.truncf %61 : vector<16x256xf32> to vector<16x256xbf16>
      %c0_42 = arith.constant 0 : index
      %c0_43 = arith.constant 0 : index
      %63 = vector.load %arg6[%c0_42, %c0_43] : memref<256x128xbf16, #tpu.memory_space<vmem>>, vector<256x128xbf16>
      %cst_44 = arith.constant dense<0.000000e+00> : vector<16x128xf32>
      %64 = tpu.matmul %62, %63, %cst_44 {dimension_numbers = #tpu.dot_dimension_numbers<[1], [0], [0], [1], [0, 0, 1, 1], [], []>} : vector<16x256xbf16>, vector<256x128xbf16>, vector<16x128xf32> -> vector<16x128xf32>
      %c0_45 = arith.constant 0 : index
      %c0_46 = arith.constant 0 : index
      %65 = vector.load %arg7[%c0_45, %c0_46] : memref<1x128xf32, #tpu.memory_space<vmem>>, vector<1x128xf32>
      %66 = vector.broadcast %65 : vector<1x128xf32> to vector<16x128xf32>
      %67 = arith.addf %64, %66 : vector<16x128xf32>
      %c0_47 = arith.constant 0 : index
      %c0_48 = arith.constant 0 : index
      %68 = vector.load %arg15[%c0_47, %c0_48] : memref<16x128xf32, #tpu.memory_space<vmem>>, vector<16x128xf32>
      tpu.vector_store %arg15[%c0_47, %c0_48], %67 {strides = array<i32>} : memref<16x128xf32, #tpu.memory_space<vmem>>, vector<16x128xf32>,
    } else {
    }
    return
  }
  func.func @transform_0(%arg0: i32) -> (i32, i32) {
    %c0_i32 = arith.constant 0 : i32
    %c0_i32_0 = arith.constant 0 : i32
    %c0_i32_1 = arith.constant 0 : i32
    return %c0_i32, %c0_i32_0 : i32, i32
  }
  func.func @transform_1(%arg0: i32) -> (i32, i32) {
    %c0_i32 = arith.constant 0 : i32
    %c0_i32_0 = arith.constant 0 : i32
    %c0_i32_1 = arith.constant 0 : i32
    return %c0_i32, %c0_i32_0 : i32, i32
  }
  func.func @transform_2(%arg0: i32) -> (i32, i32) {
    %c0_i32 = arith.constant 0 : i32
    %c0_i32_0 = arith.constant 0 : i32
    %c0_i32_1 = arith.constant 0 : i32
    return %c0_i32, %c0_i32_0 : i32, i32
  }
  func.func @transform_3(%arg0: i32) -> (i32, i32) {
    %c0_i32 = arith.constant 0 : i32
    %c0_i32_0 = arith.constant 0 : i32
    %c0_i32_1 = arith.constant 0 : i32
    return %c0_i32, %c0_i32_0 : i32, i32
  }
  func.func @transform_4(%arg0: i32) -> (i32, i32) {
    %c0_i32 = arith.constant 0 : i32
    %c0_i32_0 = arith.constant 0 : i32
    %c0_i32_1 = arith.constant 0 : i32
    return %c0_i32, %c0_i32_0 : i32, i32
  }
  func.func @transform_5(%arg0: i32) -> (i32, i32) {
    %c0_i32 = arith.constant 0 : i32
    %c0_i32_0 = arith.constant 0 : i32
    %c0_i32_1 = arith.constant 0 : i32
    return %c0_i32, %c0_i32_0 : i32, i32
  }
  func.func @transform_6(%arg0: i32) -> (i32, i32) {
    %c0_i32 = arith.constant 0 : i32
    %c0_i32_0 = arith.constant 0 : i32
    %c0_i32_1 = arith.constant 0 : i32
    return %c0_i32, %c0_i32_0 : i32, i32
  }
  func.func @transform_7(%arg0: i32) -> (i32, i32, i32) {
    %c0_i32 = arith.constant 0 : i32
    %c0_i32_0 = arith.constant 0 : i32
    %c0_i32_1 = arith.constant 0 : i32
    return %arg0, %c0_i32, %c0_i32_0 : i32, i32, i32
  }
  func.func @transform_8(%arg0: i32) -> (i32, i32, i32) {
    %c0_i32 = arith.constant 0 : i32
    %c0_i32_0 = arith.constant 0 : i32
    %c0_i32_1 = arith.constant 0 : i32
    return %arg0, %c0_i32, %c0_i32_0 : i32, i32, i32
  }
  func.func @transform_9(%arg0: i32) -> (i32, i32, i32) {
    %c0_i32 = arith.constant 0 : i32
    %c0_i32_0 = arith.constant 0 : i32
    %c0_i32_1 = arith.constant 0 : i32
    return %arg0, %c0_i32, %c0_i32_0 : i32, i32, i32
  }
  func.func @transform_10(%arg0: i32) -> (i32, i32, i32) {
    %c0_i32 = arith.constant 0 : i32
    %c0_i32_0 = arith.constant 0 : i32
    %c0_i32_1 = arith.constant 0 : i32
    return %arg0, %c0_i32, %c0_i32_0 : i32, i32, i32
  }
  func.func @transform_11(%arg0: i32) -> (i32, i32, i32) {
    %c0_i32 = arith.constant 0 : i32
    %c0_i32_0 = arith.constant 0 : i32
    %c0_i32_1 = arith.constant 0 : i32
    return %arg0, %c0_i32, %c0_i32_0 : i32, i32, i32
  }
  func.func @transform_12(%arg0: i32) -> (i32, i32, i32) {
    %c0_i32 = arith.constant 0 : i32
    %c0_i32_0 = arith.constant 0 : i32
    %c0_i32_1 = arith.constant 0 : i32
    return %arg0, %c0_i32, %c0_i32_0 : i32, i32, i32
  }
  func.func @transform_13(%arg0: i32) -> (i32, i32, i32) {
    %c0_i32 = arith.constant 0 : i32
    %c0_i32_0 = arith.constant 0 : i32
    %c0_i32_1 = arith.constant 0 : i32
    return %arg0, %c0_i32, %c0_i32_0 : i32, i32, i32
  }
  func.func @transform_14(%arg0: i32) -> (i32, i32) {
    %c0_i32 = arith.constant 0 : i32
    %c0_i32_0 = arith.constant 0 : i32
    %c0_i32_1 = arith.constant 0 : i32
    return %c0_i32, %c0_i32_0 : i32, i32
  }
}

</mosaic_0001>

<bundles_post_ra>
// kernel: tpu_custom_call.1
= control target key start
LH: loop header
LB: loop body
LE: loop exit
PB: predicated region body
PF: predicated region fallthrough
CT: control target
= control target key end

     0   :  { %s6695_s0 = inlined_call_operand.hbm [shape: bf16[256,384], index: 0, kind: input, shape index: {}]   ;;  %s6696_s1 = inlined_call_operand.hbm [shape: bf16[256,256], index: 1, kind: input, shape index: {}]   ;;  %s6697_s2 = inlined_call_operand.vmem [shape: f32[8,256], index: 2, kind: input, shape index: {}]   ;;  %s6698_s3 = inlined_call_operand.hbm [shape: bf16[16,256], index: 3, kind: input, shape index: {}]   ;;  %s6699_s4 = inlined_call_operand.vmem [shape: f32[16,1], index: 4, kind: input, shape index: {}]   ;;  %s6700_s5 = inlined_call_operand.hbm [shape: bf16[256,128], index: 5, kind: input, shape index: {}]   ;;  %s6701_s6 = inlined_call_operand.vmem [shape: f32[1,128], index: 6, kind: input, shape index: {}]   ;;  %s6702_s7 = inlined_call_operand.hbm [shape: bf16[2,128,256], index: 7, kind: input, shape index: {}]   ;;  %s6703_s8 = inlined_call_operand.hbm [shape: bf16[2,256,256], index: 8, kind: input, shape index: {}]   ;;  %s6704_s9 = inlined_call_operand.vmem [shape: f32[2,1,256], index: 9, kind: input, shape index: {}]   ;;  %s6705_s10 = inlined_call_operand.hbm [shape: bf16[2,256,256], index: 10, kind: input, shape index: {}]   ;;  %s6706_s11 = inlined_call_operand.vmem [shape: f32[2,1,256], index: 11, kind: input, shape index: {}]   ;;  %s6707_s12 = inlined_call_operand.vmem [shape: f32[2,1,256], index: 12, kind: input, shape index: {}]   ;;  %s6708_s13 = inlined_call_operand.vmem [shape: f32[2,1,256], index: 13, kind: input, shape index: {}]   ;;  %s6709_s14 = inlined_call_operand.hbm [shape: f32[16,128], index: 14, kind: output, shape index: {}]  }
   0x1   :  { %6777 = sst [smem:[#allocation61_spill]] %s6695_s0 }
   0x2   :  { %6778 = sst [smem:[#allocation62_spill]] %s6696_s1 }
   0x3   :  { %6779 = sst [smem:[#allocation63_spill]] %s6697_s2 }
   0x4   :  { %6780 = sst [smem:[#allocation64_spill]] %s6699_s4 }
   0x5   :  { %6781 = sst [smem:[#allocation65_spill]] %s6701_s6 }
   0x6   :  { %6782 = sst [smem:[#allocation66_spill]] %s6702_s7 }
   0x7   :  { %6783 = sst [smem:[#allocation67_spill]] %s6703_s8 }
   0x8   :  { %6784 = sst [smem:[#allocation68_spill]] %s6706_s11 }
   0x9   :  { %6785 = sst [smem:[#allocation69_spill]] %s6707_s12 }
   0xa   :  { %6786 = sst [smem:[#allocation70_spill]] %s6708_s13 }
   0xb   :  { %6787 = sst [smem:[#allocation71_spill]] %s6709_s14 }
   0xc   :  { %19 = vsyncpa [#allocation4], 0 }
   0xd   :  { %20 = vsyncpa [#allocation7], 0 }
   0xe   :  { %21 = vsyncpa [#allocation10], 0 }
   0xf   :  { %22 = vsyncpa [#allocation5], 0  ;;  %s4972_s29 = smov 0   ;;  %s4974_s30 = smov 0  }
  0x10   :  { %s4976_s15 = smov 0   ;;  %s4978_s16 = smov 0  }
  0x11 LB: > { %s4991_s17 = sadd.s32 4294967295, %s4877_s16   ;;  %p195_p0 = scmp.ne.s32.totalorder %s4869_s30, %s4865_s29  ;;  %s4877_s16 = sphi %s4978_s16, %s7008_s16   ;;  %s4873_s15 = sphi %s4976_s15, %s7012_s15   ;;  %s4869_s30 = sphi %s4974_s30, %s7011_s30   ;;  %s4865_s29 = sphi %s4972_s29, %s7010_s29  }
  0x12   : > { %p6712_p1 = scmp.eq.s32.totalorder %s4991_s17, 0  ;;  %p3806_p2 = scmp.ge.s32.totalorder %s4877_s16, 1 }
  0x13   : > { %p383_p3 = scmp.lt.s32.totalorder %s4877_s16, 3  ;;  %s4879_s20 = smov [#allocation3]  }
  0x14   : > { %p5000_p5 = por %p6712_p1, %p195_p0  ;;  %s395_s21 = sshll.u32 %s4879_s20, 4  ;;  %s396_s21 = int_to_ptr.vmem [resolvable:$true] %s395_s21 }
  0x15   : > { %p5004_p6 = pnand %p3806_p2, %p383_p3  ;;  %s5017_s23 = sadd.s32 1, %s4877_s16  }
  0x16   : > { %s6788_s18 = scalar_select %p5000_p5, 1, 0 }
  0x17   : > { %s6789_s19 = scalar_select %p5004_p6, 1, 0 }
  0x18   : > { %p4262_p7 = pneg %p5004_p6  ;;  %6791 = sst [smem:[#allocation20_spill]] %s5017_s23 }
  0x19   : > { %s182_s24 = sadd.s32 1, %s4873_s15  ;;  %s179_s25 = ssub.s32 %s4877_s16, %s5017_s23 }
  0x1a   : > { %p5012_p8 = pnand %p4262_p7, %p6712_p1  ;;  %s6792_s0 = sld [smem:[#allocation61_spill]] }
  0x1c   : > { %s6790_s22 = scalar_select %p5012_p8, 1, 0 }
  0x1d   : > { %p5030_p10 = pneg %p5012_p8 }
  0x1f   : > { %s6793_s14 = scalar_select %p5030_p10, 1, 0 }
  0x20   : > { %s4599_s28 = scalar_lea.hbm %s6792_s0, 6144 }
  0x21   : > { %p4600_p9 = scmp.ne.s32.totalorder %s6792_s0, %s4599_s28  ;;  %p4606_p13 = scmp.lt.u32.totalorder %s4599_s28, %s6792_s0 }
  0x23   : > { %p4602_p11 = pnand %p5030_p10, %p4600_p9 }
  0x25   : > { %p4603_p12 = pneg %p4602_p11 }
  0x27   : > { %p4608_p0 = pnand %p4606_p13, %p4603_p12 }
  0x29   : > { %4611 = shalt.err (!%p4608_p0)
}
  0x2a   : > { %s4612_s26 = scalar_lea.vmem %s396_s21, 6144  ;;  %p4620_p4 = scmp.lt.s32.totalorder %s396_s21, %s396_s21 }
  0x2b   : > { %p4613_p2 = scmp.ne.s32.totalorder %s396_s21, %s4612_s26  ;;  %p4621_p1 = scmp.lt.s32.totalorder %s4612_s26, %s4612_s26 }
  0x2d   : > { %p4615_p3 = pnand %p4613_p2, %p5030_p10  ;;  %p4622_p5 = por %p4621_p1, %p4620_p4 }
  0x2f   : > { %p4616_p7 = pneg %p4615_p3 }
  0x31   : > { %p4623_p6 = pnand %p4622_p5, %p4616_p7 }
  0x33   : > { %4626 = shalt.err (!%p4623_p6)
}
  0x34   : > { %s4880_s27 = smov 192   ;;  %s4881_s4 = smov 12  }
  0x35   : > { %4265 = dma.hbm_to_vmem [thread:$0]  (!%p5012_p8), %s6792_s0, 6144, %s396_s21, [#allocation4], %s4880_s27, %s4880_s27, %s4881_s4  }
  0x36   : > { %p180_p1 = scmp.eq.s32.totalorder %s179_s25, 0  ;;  %p189_p4 = scmp.ne.s32.totalorder %s4873_s15, %s4869_s30 }
  0x37   : > { %p190_p5 = scmp.eq.s32.totalorder %s4877_s16, 0  ;;  %p4289_p9 = scmp.lt.s32.totalorder %s4877_s16, 2 }
  0x38   : > { %s5050_s29 = scalar_select %p180_p1, %s4873_s15, %s182_s24  }
  0x39   : > { %p191_p6 = por %p190_p5, %p189_p4  ;;  %s457_s20 = sand.u32 1, %s4877_s16  }
  0x3a   : > { %6794 = sst [smem:[#allocation21_spill]] %s5050_s29  ;;  %s459_s26 = sand.u32 1, %s4873_s15  }
  0x3b   : > { %s3812_s23 = sshll.u32 %s459_s26, 7  ;;  %s4019_s2 = sshll.u32 %s4877_s16, 11 }
  0x3c   : > { %s6795_s7 = sld [smem:[#allocation66_spill]]  ;;  %s461_s21 = scalar_lea.vmem [#allocation11], %s3812_s23 }
  0x3d   : > { %s468_s25 = sshll.u32 %s461_s21, 4  ;;  %p5063_p11 = pnand %p4289_p9, %p191_p6  ;;  %s5067_s25 = int_to_ptr.vmem [resolvable:$true] %s468_s25 }
  0x3e   : > { %s4882_s27 = smov [#allocation6]   ;;  %s5071_s6 = scalar_lea.sflag [#allocation4], %s457_s20 }
  0x3f   : > { %s6796_s24 = scalar_select %p5063_p11, 1, 0 }
  0x40   : > { %s5069_s4 = sshll.u32 %s4882_s27, 4  ;;  %p5077_p13 = pneg %p5063_p11  ;;  %s409_s4 = int_to_ptr.vmem [resolvable:$true] %s5069_s4 }
  0x42   : > { %s5061_s11 = scalar_lea.hbm %s6795_s7, %s4019_s2  ;;  %s4632_s28 = scalar_lea.hbm %s6795_s7, 4096 }
  0x43   : > { %s4627_s2 = scalar_lea.hbm %s5061_s11, 2048  ;;  %p4633_p3 = scmp.lt.u32.totalorder %s5061_s11, %s6795_s7 }
  0x44   : > { %p4628_p12 = scmp.ne.s32.totalorder %s5061_s11, %s4627_s2  ;;  %p4634_p7 = scmp.lt.u32.totalorder %s4632_s28, %s4627_s2 }
  0x45   : > { %s6797_s12 = scalar_select %p5077_p13, 1, 0 }
  0x46   : > { %p4630_p0 = pnand %p5077_p13, %p4628_p12  ;;  %p4635_p1 = por %p4634_p7, %p4633_p3 }
  0x47   : > { %p4636_p4 = scmp.lt.u32.totalorder %s4627_s2, %s5061_s11 }
  0x48   : > { %p4631_p2 = pneg %p4630_p0 }
  0x49   : > { %p4637_p5 = por %p4636_p4, %p4635_p1 }
  0x4b   : > { %p4638_p6 = pnand %p4637_p5, %p4631_p2 }
  0x4d   : > { %4641 = shalt.err (!%p4638_p6)
}
  0x4e   : > { %s4642_s20 = scalar_lea.vmem %s5067_s25, 2048  ;;  %s4883_s13 = smov [#allocation11]  }
  0x4f   : > { %p4643_p9 = scmp.ne.s32.totalorder %s5067_s25, %s4642_s20  ;;  %s4647_s23 = sshll.u32 %s4883_s13, 4  ;;  %s4648_s23 = int_to_ptr.vmem [resolvable:$false] %s4647_s23 }
  0x50   : > { %s4649_s21 = scalar_lea.vmem %s4648_s23, 4096  ;;  %p4650_p8 = scmp.lt.s32.totalorder %s5067_s25, %s4648_s23 }
  0x51   : > { %p4645_p12 = pnand %p4643_p9, %p5077_p13  ;;  %p4651_p10 = scmp.lt.s32.totalorder %s4649_s21, %s4642_s20 }
  0x53   : > { %p4646_p0 = pneg %p4645_p12  ;;  %p4652_p3 = por %p4651_p10, %p4650_p8 }
  0x55   : > { %p4653_p7 = pnand %p4652_p3, %p4646_p0 }
  0x57   : > { %4656 = shalt.err (!%p4653_p7)
}
  0x58   : > { %s4884_s2 = smov 128   ;;  %s4885_s28 = smov 8  }
  0x59   : > { %4278 = dma.hbm_to_vmem [thread:$0]  (!%p5063_p11), %s5061_s11, 2048, %s5067_s25, %s5071_s6, %s4884_s2, %s4884_s2, %s4885_s28  }
  0x5a   : > { %s5107_s27 = sshll.u32 %s459_s26, 8  ;;  %s6798_s1 = sld [smem:[#allocation62_spill]] }
  0x5b   : > { %p6799_p10 = scmp.ne.s32.totalorder %s6793_s14, 0 }
  0x60   : > { %s4657_s23 = scalar_lea.hbm %s6798_s1, 4096 }
  0x61   : > { %p4658_p8 = scmp.ne.s32.totalorder %s6798_s1, %s4657_s23  ;;  %p4664_p4 = scmp.lt.u32.totalorder %s4657_s23, %s6798_s1 }
  0x63   : > { %p4660_p2 = pnand %p4658_p8, %p6799_p10 }
  0x65   : > { %p4661_p1 = pneg %p4660_p2 }
  0x67   : > { %p4666_p5 = pnand %p4664_p4, %p4661_p1 }
  0x69   : > { %4669 = shalt.err (!%p4666_p5)
}
  0x6a   : > { %s4670_s11 = scalar_lea.vmem %s409_s4, 4096  ;;  %p4678_p0 = scmp.lt.s32.totalorder %s409_s4, %s409_s4 }
  0x6b   : > { %p4671_p6 = scmp.ne.s32.totalorder %s409_s4, %s4670_s11  ;;  %p4679_p3 = scmp.lt.s32.totalorder %s4670_s11, %s4670_s11 }
  0x6d   : > { %p4673_p9 = pnand %p4671_p6, %p6799_p10  ;;  %p4680_p7 = por %p4679_p3, %p4678_p0 }
  0x6f   : > { %p4674_p12 = pneg %p4673_p9 }
  0x71   : > { %p4681_p11 = pnand %p4680_p7, %p4674_p12 }
  0x73   : > { %4684 = shalt.err (!%p4681_p11)
}
  0x74   : > { %p6800_p8 = scmp.ne.s32.totalorder %s6790_s22, 0  ;;  %s6724_s29 = sshll.u32 %s4877_s16, 12 }
  0x75   : > { %s6801_s8 = sld [smem:[#allocation67_spill]]  ;;  %s482_s13 = scalar_lea.vmem [#allocation12], %s5107_s27 }
  0x76   : > { %4268 = dma.hbm_to_vmem [thread:$0]  (!%p6800_p8), %s6798_s1, 4096, %s409_s4, [#allocation7], %s4884_s2, %s4884_s2, %s4885_s28  }
  0x77   : > { %s489_s23 = sshll.u32 %s482_s13, 4  ;;  %s5139_s23 = int_to_ptr.vmem [resolvable:$true] %s489_s23 }
  0x7b   : > { %s5136_s20 = scalar_lea.hbm %s6801_s8, %s6724_s29  ;;  %s4690_s0 = scalar_lea.hbm %s6801_s8, 8192 }
  0x7c   : > { %s4685_s21 = scalar_lea.hbm %s5136_s20, 4096  ;;  %p4691_p4 = scmp.lt.u32.totalorder %s5136_s20, %s6801_s8 }
  0x7d   : > { %p4686_p11 = scmp.ne.s32.totalorder %s5136_s20, %s4685_s21  ;;  %p4692_p5 = scmp.lt.u32.totalorder %s4690_s0, %s4685_s21 }
  0x7e   : > { %p4694_p9 = scmp.lt.u32.totalorder %s4685_s21, %s5136_s20 }
  0x7f   : > { %p4688_p2 = pnand %p4686_p11, %p5077_p13  ;;  %p4693_p6 = por %p4692_p5, %p4691_p4 }
  0x81   : > { %p4689_p1 = pneg %p4688_p2  ;;  %p4695_p12 = por %p4694_p9, %p4693_p6 }
  0x83   : > { %p4696_p0 = pnand %p4695_p12, %p4689_p1 }
  0x85   : > { %4699 = shalt.err (!%p4696_p0)
}
  0x86   : > { %s4700_s25 = scalar_lea.vmem %s5139_s23, 4096  ;;  %s4886_s13 = smov [#allocation12]  }
  0x87   : > { %p4701_p3 = scmp.ne.s32.totalorder %s5139_s23, %s4700_s25  ;;  %s4705_s4 = sshll.u32 %s4886_s13, 4  ;;  %s4706_s4 = int_to_ptr.vmem [resolvable:$false] %s4705_s4 }
  0x88   : > { %s4707_s11 = scalar_lea.vmem %s4706_s4, 8192  ;;  %p4708_p2 = scmp.lt.s32.totalorder %s5139_s23, %s4706_s4 }
  0x89   : > { %p4703_p7 = pnand %p4701_p3, %p5077_p13  ;;  %p4709_p8 = scmp.lt.s32.totalorder %s4707_s11, %s4700_s25 }
  0x8b   : > { %p4704_p11 = pneg %p4703_p7  ;;  %p4710_p4 = por %p4709_p8, %p4708_p2 }
  0x8d   : > { %p4711_p5 = pnand %p4710_p4, %p4704_p11 }
  0x8f   : > { %4714 = shalt.err (!%p4711_p5)
}
  0x90   : > { %p6802_p1 = scmp.ne.s32.totalorder %s6796_s24, 0  ;;  %s4887_s21 = smov [#allocation8]  }
  0x91   : > { %s424_s0 = sshll.u32 %s4887_s21, 4  ;;  %s4888_s7 = smov [#allocation9]   ;;  %s425_s0 = int_to_ptr.vmem [resolvable:$true] %s424_s0 }
  0x92   : > { %4281 = dma.hbm_to_vmem [thread:$0]  (!%p6802_p1), %s5136_s20, 4096, %s5139_s23, %s5071_s6, %s4884_s2, %s4884_s2, %s4885_s28  }
  0x93   : > { %s440_s26 = sshll.u32 %s4888_s7, 4  ;;  %s4715_s4 = scalar_lea.hbm %s6698_s3, 256  ;;  %s441_s26 = int_to_ptr.vmem [resolvable:$true] %s440_s26 }
  0x94   : > { %p4716_p8 = scmp.ne.s32.totalorder %s6698_s3, %s4715_s4  ;;  %p4722_p12 = scmp.lt.u32.totalorder %s4715_s4, %s6698_s3 }
  0x96   : > { %p4718_p6 = pnand %p4716_p8, %p6799_p10 }
  0x98   : > { %p4719_p9 = pneg %p4718_p6 }
  0x9a   : > { %p4724_p0 = pnand %p4722_p12, %p4719_p9 }
  0x9c   : > { %4727 = shalt.err (!%p4724_p0)
}
  0x9d   : > { %s4728_s20 = scalar_lea.vmem %s425_s0, 256  ;;  %p4736_p2 = scmp.lt.s32.totalorder %s425_s0, %s425_s0 }
  0x9e   : > { %p4729_p3 = scmp.ne.s32.totalorder %s425_s0, %s4728_s20  ;;  %p4737_p4 = scmp.lt.s32.totalorder %s4728_s20, %s4728_s20 }
  0xa0   : > { %p4731_p7 = pnand %p4729_p3, %p6799_p10  ;;  %p4738_p5 = por %p4737_p4, %p4736_p2 }
  0xa2   : > { %p4732_p11 = pneg %p4731_p7 }
  0xa4   : > { %p4739_p1 = pnand %p4738_p5, %p4732_p11 }
  0xa6   : > { %4742 = shalt.err (!%p4739_p1)
}
  0xa7   : > { %p6803_p8 = scmp.ne.s32.totalorder %s6790_s22, 0  ;;  %s4743_s21 = scalar_lea.hbm %s6700_s5, 2048 }
  0xa8   : > { %p4744_p6 = scmp.ne.s32.totalorder %s6700_s5, %s4743_s21  ;;  %p4750_p12 = scmp.lt.u32.totalorder %s4743_s21, %s6700_s5 }
  0xa9   : > { %4271 = dma.hbm_to_vmem [thread:$0]  (!%p6803_p8), %s6698_s3, 256, %s425_s0, [#allocation7], %s4884_s2, %s4884_s2, %s4885_s28  }
  0xaa   : > { %p4746_p1 = pnand %p4744_p6, %p6799_p10 }
  0xac   : > { %p4747_p9 = pneg %p4746_p1 }
  0xae   : > { %p4752_p0 = pnand %p4750_p12, %p4747_p9 }
  0xb0   : > { %4755 = shalt.err (!%p4752_p0)
}
  0xb1   : > { %s4756_s11 = scalar_lea.vmem %s441_s26, 2048  ;;  %p4764_p2 = scmp.lt.s32.totalorder %s441_s26, %s441_s26 }
  0xb2   : > { %p4757_p3 = scmp.ne.s32.totalorder %s441_s26, %s4756_s11  ;;  %p4765_p4 = scmp.lt.s32.totalorder %s4756_s11, %s4756_s11 }
  0xb4   : > { %p4759_p7 = pnand %p4757_p3, %p6799_p10  ;;  %p4766_p5 = por %p4765_p4, %p4764_p2 }
  0xb6   : > { %p4760_p11 = pneg %p4759_p7 }
  0xb8   : > { %p4767_p13 = pnand %p4766_p5, %p4760_p11 }
  0xba   : > { %4770 = shalt.err (!%p4767_p13)
}
  0xbb   : > { %s4889_s0 = smov 64   ;;  %s4890_s20 = smov 4  }
  0xbc   : > { %4274 = dma.hbm_to_vmem [thread:$0]  (!%p6803_p8), %s6700_s5, 2048, %s441_s26, [#allocation10], %s4889_s0, %s4889_s0, %s4890_s20  }
  0xbd   : > { %s6804_s29 = sshll.u32 %s4877_s16, 12  ;;  %s510_s7 = scalar_lea.vmem [#allocation13], %s5107_s27 }
  0xbe   : > { %s5210_s21 = scalar_lea.hbm %s6705_s10, %s6804_s29  ;;  %s517_s13 = sshll.u32 %s510_s7, 4  ;;  %s5213_s13 = int_to_ptr.vmem [resolvable:$true] %s517_s13 }
  0xbf   : > { %s4771_s25 = scalar_lea.hbm %s5210_s21, 4096  ;;  %p6805_p10 = scmp.ne.s32.totalorder %s6797_s12, 0 }
  0xc0   : > { %p4772_p13 = scmp.ne.s32.totalorder %s5210_s21, %s4771_s25  ;;  %s4776_s26 = scalar_lea.hbm %s6705_s10, 8192 }
  0xc1   : > { %p4777_p8 = scmp.lt.u32.totalorder %s5210_s21, %s6705_s10  ;;  %p4778_p9 = scmp.lt.u32.totalorder %s4776_s26, %s4771_s25 }
  0xc2   : > { %p4774_p6 = pnand %p4772_p13, %p6805_p10  ;;  %p4780_p0 = scmp.lt.u32.totalorder %s4771_s25, %s5210_s21 }
  0xc3   : > { %p4779_p12 = por %p4778_p9, %p4777_p8 }
  0xc4   : > { %p4775_p1 = pneg %p4774_p6 }
  0xc5   : > { %p4781_p3 = por %p4780_p0, %p4779_p12 }
  0xc7   : > { %p4782_p7 = pnand %p4781_p3, %p4775_p1 }
  0xc9   : > { %4785 = shalt.err (!%p4782_p7)
}
  0xca   : > { %s4786_s27 = scalar_lea.vmem %s5213_s13, 4096  ;;  %s4891_s0 = smov [#allocation13]  }
  0xcb   : > { %p4787_p11 = scmp.ne.s32.totalorder %s5213_s13, %s4786_s27  ;;  %s4791_s20 = sshll.u32 %s4891_s0, 4  ;;  %s4792_s20 = int_to_ptr.vmem [resolvable:$false] %s4791_s20 }
  0xcc   : > { %s4793_s1 = scalar_lea.vmem %s4792_s20, 8192  ;;  %p4794_p5 = scmp.lt.s32.totalorder %s5213_s13, %s4792_s20 }
  0xcd   : > { %p4789_p2 = pnand %p4787_p11, %p6805_p10  ;;  %p4795_p13 = scmp.lt.s32.totalorder %s4793_s1, %s4786_s27 }
  0xcf   : > { %p4790_p4 = pneg %p4789_p2  ;;  %p4796_p6 = por %p4795_p13, %p4794_p5 }
  0xd1   : > { %p4797_p8 = pnand %p4796_p6, %p4790_p4 }
  0xd3   : > { %4800 = shalt.err (!%p4797_p8)
}
  0xd4   : > { %p6806_p1 = scmp.ne.s32.totalorder %s6796_s24, 0  ;;  %p6807_p10 = scmp.ne.s32.totalorder %s6789_s19, 0 }
  0xd6   : > { %4284 = dma.hbm_to_vmem [thread:$0]  (!%p6806_p1), %s5210_s21, 4096, %s5213_s13, %s5071_s6, %s4884_s2, %s4884_s2, %s4885_s28  }
  0xd7   : > { %550 = sbr.rel (%p6807_p10) target bundleno = 2093 (0x82d), region = 76 }
  0xde   : > { %p6808_p9 = scmp.eq.s32.totalorder %s4991_s17, 0 }
  0xe0   : > { %4844 = dma.done.wait (%p6808_p9), [#allocation4], 6144   ;;  %p6809_p12 = pmov %p6808_p9 }
  0xe1   : > { %p6810_p0 = pmov %p6808_p9 }
  0xe2   : > { %4846 = vsyncadd (%p6809_p12), [#allocation4], 4294961152 }
  0xe3   : > { %4848 = dma.done.wait (%p6810_p0), [#allocation7], 4352   ;;  %p6811_p3 = pmov %p6810_p0 }
  0xe4   : > { %p6812_p7 = pmov %p6810_p0 }
  0xe5   : > { %4850 = vsyncadd (%p6811_p3), [#allocation7], 4294962944 }
  0xe6   : > { %4852 = dma.done.wait (%p6812_p7), [#allocation10], 2048   ;;  %p6813_p11 = pmov %p6810_p0 }
  0xe7   : > { %s568_s19 = sand.u32 1, %s4991_s17   ;;  %s570_s24 = sand.u32 1, %s4869_s30  }
  0xe8   : > { %4854 = vsyncadd (%p6813_p11), [#allocation10], 4294965248  ;;  %s3826_s6 = sshll.u32 %s570_s24, 7  ;;  %s569_s12 = scalar_lea.sflag [#allocation4], %s568_s19 }
  0xe9   : > { %s5256_s2 = scalar_lea.vmem [#allocation11], %s3826_s6  ;;  %p6814_p2 = scmp.ne.s32.totalorder %s6788_s18, 0 }
  0xeb   : > { %4856 = dma.done.wait (%p6814_p2), %s569_s12, 10240  }
  0xec   : > { %4858 = vsyncadd (%p6814_p2), %s569_s12, 4294957056  ;;  %s3827_s28 = sshll.u32 %s570_s24, 8  ;;  %p656_p4 = scmp.lt.s32.totalorder %s4991_s17, 1 }
  0xed   : > { %s6815_s25 = sld [smem:[#allocation68_spill]]  ;;  %s6816_s26 = sld [smem:[#allocation69_spill]] }
  0xee   : > { %s657_s8 = scalar_select %p656_p4, %s4991_s17, 1 }
  0xef   : > { %s6817_s0 = sld [smem:[#allocation70_spill]]  ;;  %s5282_s1 = scalar_lea.vmem [#allocation12], %s3827_s28 }
  0xf0   : > { %s5264_s29 = sshll.u32 %s657_s8, 1  ;;  %s5284_s19 = scalar_lea.vmem [#allocation13], %s3827_s28 }
  0xf1   : > { %s659_s21 = scalar_lea.vmem %s6704_s9, %s5264_s29  ;;  %p6818_p5 = scmp.ne.s32.totalorder %s4991_s17, 0 }
  0xf2   : > { %v4343_v0 = vld [vmem:[#allocation6] ss:$8 sps:$4 sm:$0xff] (!%p6818_p5)   ;;  %v4345_v1 = vld [vmem:[#allocation6 + $0x4] ss:$8 sps:$4 sm:$0xff] (!%p6818_p5)   ;;  %v4346_v2 = vld [vmem:[#allocation6 + $0x10] ss:$8 sps:$4 sm:$0xff] (!%p6818_p5)  }
  0xf3   : > { %s663_s18 = scalar_lea.vmem %s6815_s25, %s5264_s29  ;;  %s667_s4 = scalar_lea.vmem %s6816_s26, %s5264_s29  ;;  %869 = vst [vmem:[#allocation2] sm:$0xff] (!%p6818_p5), %v4343_v0  ;;  %v4348_v3 = vld [vmem:[#allocation6 + $0x14] ss:$8 sps:$4 sm:$0xff] (!%p6818_p5)   ;;  %870 = vst [vmem:[#allocation2 + $0x8] sm:$0xff] (!%p6818_p5), %v4345_v1  ;;  %v4349_v4 = vld [vmem:[#allocation6 + $0x20] ss:$8 sps:$4 sm:$0xff] (!%p6818_p5)  }
  0xf4   : > { %676 = sbr.rel (%p6818_p5) target bundleno = 259 (0x103), region = 108  ;;  %v4351_v5 = vld [vmem:[#allocation6 + $0x24] ss:$8 sps:$4 sm:$0xff] (!%p6818_p5)   ;;  %871 = vst [vmem:[#allocation2 + $0x10] sm:$0xff] (!%p6818_p5), %v4346_v2  ;;  %872 = vst [vmem:[#allocation2 + $0x18] sm:$0xff] (!%p6818_p5), %v4348_v3 }
  0xf5   : > { %s671_s20 = scalar_lea.vmem %s6817_s0, %s5264_s29  ;;  %v4352_v6 = vld [vmem:[#allocation6 + $0x30] ss:$8 sps:$4 sm:$0xff] (!%p6818_p5)   ;;  %873 = vst [vmem:[#allocation2 + $0x20] sm:$0xff] (!%p6818_p5), %v4349_v4  ;;  %874 = vst [vmem:[#allocation2 + $0x28] sm:$0xff] (!%p6818_p5), %v4351_v5  ;;  %v4354_v7 = vld [vmem:[#allocation6 + $0x34] ss:$8 sps:$4 sm:$0xff] (!%p6818_p5)  }
  0xf6   : > { %875 = vst [vmem:[#allocation2 + $0x30] sm:$0xff] (!%p6818_p5), %v4352_v6  ;;  %v4355_v8 = vld [vmem:[#allocation6 + $0x40] ss:$8 sps:$4 sm:$0xff] (!%p6818_p5)   ;;  %v4357_v9 = vld [vmem:[#allocation6 + $0x44] ss:$8 sps:$4 sm:$0xff] (!%p6818_p5)   ;;  %876 = vst [vmem:[#allocation2 + $0x38] sm:$0xff] (!%p6818_p5), %v4354_v7 }
  0xf7   : > { %v4358_v10 = vld [vmem:[#allocation6 + $0x50] ss:$8 sps:$4 sm:$0xff] (!%p6818_p5)   ;;  %v4360_v11 = vld [vmem:[#allocation6 + $0x54] ss:$8 sps:$4 sm:$0xff] (!%p6818_p5)   ;;  %877 = vst [vmem:[#allocation2 + $0x40] sm:$0xff] (!%p6818_p5), %v4355_v8  ;;  %878 = vst [vmem:[#allocation2 + $0x48] sm:$0xff] (!%p6818_p5), %v4357_v9 }
  0xf8   : > { %v4361_v12 = vld [vmem:[#allocation6 + $0x60] ss:$8 sps:$4 sm:$0xff] (!%p6818_p5)   ;;  %879 = vst [vmem:[#allocation2 + $0x50] sm:$0xff] (!%p6818_p5), %v4358_v10  ;;  %880 = vst [vmem:[#allocation2 + $0x58] sm:$0xff] (!%p6818_p5), %v4360_v11  ;;  %v4363_v13 = vld [vmem:[#allocation6 + $0x64] ss:$8 sps:$4 sm:$0xff] (!%p6818_p5)  }
  0xf9   : > { %881 = vst [vmem:[#allocation2 + $0x60] sm:$0xff] (!%p6818_p5), %v4361_v12  ;;  %v4364_v14 = vld [vmem:[#allocation6 + $0x70] ss:$8 sps:$4 sm:$0xff] (!%p6818_p5)   ;;  %v4366_v15 = vld [vmem:[#allocation6 + $0x74] ss:$8 sps:$4 sm:$0xff] (!%p6818_p5)   ;;  %882 = vst [vmem:[#allocation2 + $0x68] sm:$0xff] (!%p6818_p5), %v4363_v13 }
  0xfa   : > { %v4367_v16 = vld [vmem:[#allocation6 + $0x80] ss:$8 sps:$4 sm:$0xff] (!%p6818_p5)   ;;  %v4369_v17 = vld [vmem:[#allocation6 + $0x84] ss:$8 sps:$4 sm:$0xff] (!%p6818_p5)   ;;  %883 = vst [vmem:[#allocation2 + $0x70] sm:$0xff] (!%p6818_p5), %v4364_v14  ;;  %884 = vst [vmem:[#allocation2 + $0x78] sm:$0xff] (!%p6818_p5), %v4366_v15 }
  0xfb   : > { %v4370_v18 = vld [vmem:[#allocation6 + $0x90] ss:$8 sps:$4 sm:$0xff]   ;;  %885 = vst [vmem:[#allocation2 + $0x80] sm:$0xff] %v4367_v16  ;;  %886 = vst [vmem:[#allocation2 + $0x88] sm:$0xff] %v4369_v17  ;;  %v4372_v19 = vld [vmem:[#allocation6 + $0x94] ss:$8 sps:$4 sm:$0xff]  }
  0xfc   : > { %887 = vst [vmem:[#allocation2 + $0x90] sm:$0xff] %v4370_v18  ;;  %v4373_v20 = vld [vmem:[#allocation6 + $0xa0] ss:$8 sps:$4 sm:$0xff]   ;;  %v4375_v21 = vld [vmem:[#allocation6 + $0xa4] ss:$8 sps:$4 sm:$0xff]   ;;  %888 = vst [vmem:[#allocation2 + $0x98] sm:$0xff] %v4372_v19 }
  0xfd   : > { %v4376_v22 = vld [vmem:[#allocation6 + $0xb0] ss:$8 sps:$4 sm:$0xff]   ;;  %v4378_v23 = vld [vmem:[#allocation6 + $0xb4] ss:$8 sps:$4 sm:$0xff]   ;;  %889 = vst [vmem:[#allocation2 + $0xa0] sm:$0xff] %v4373_v20  ;;  %890 = vst [vmem:[#allocation2 + $0xa8] sm:$0xff] %v4375_v21 }
  0xfe   : > { %v4379_v24 = vld [vmem:[#allocation6 + $0xc0] ss:$8 sps:$4 sm:$0xff]   ;;  %891 = vst [vmem:[#allocation2 + $0xb0] sm:$0xff] %v4376_v22  ;;  %892 = vst [vmem:[#allocation2 + $0xb8] sm:$0xff] %v4378_v23  ;;  %v4381_v25 = vld [vmem:[#allocation6 + $0xc4] ss:$8 sps:$4 sm:$0xff]  }
  0xff   : > { %893 = vst [vmem:[#allocation2 + $0xc0] sm:$0xff] %v4379_v24  ;;  %v4382_v26 = vld [vmem:[#allocation6 + $0xd0] ss:$8 sps:$4 sm:$0xff]   ;;  %v4384_v27 = vld [vmem:[#allocation6 + $0xd4] ss:$8 sps:$4 sm:$0xff]   ;;  %894 = vst [vmem:[#allocation2 + $0xc8] sm:$0xff] %v4381_v25 }
 0x100   : > { %v4385_v28 = vld [vmem:[#allocation6 + $0xe0] ss:$8 sps:$4 sm:$0xff]   ;;  %v4387_v29 = vld [vmem:[#allocation6 + $0xe4] ss:$8 sps:$4 sm:$0xff]   ;;  %895 = vst [vmem:[#allocation2 + $0xd0] sm:$0xff] %v4382_v26  ;;  %896 = vst [vmem:[#allocation2 + $0xd8] sm:$0xff] %v4384_v27 }
 0x101   : > { %v4388_v30 = vld [vmem:[#allocation6 + $0xf0] ss:$8 sps:$4 sm:$0xff]   ;;  %897 = vst [vmem:[#allocation2 + $0xe0] sm:$0xff] %v4385_v28  ;;  %898 = vst [vmem:[#allocation2 + $0xe8] sm:$0xff] %v4387_v29  ;;  %v4390_v31 = vld [vmem:[#allocation6 + $0xf4] ss:$8 sps:$4 sm:$0xff]  }
 0x102   : > { %899 = vst [vmem:[#allocation2 + $0xf0] sm:$0xff] %v4388_v30  ;;  %900 = vst [vmem:[#allocation2 + $0xf8] sm:$0xff] %v4390_v31 }
 0x103 PF: > { %v1078_v32 = vld [vmem:[#allocation2 + $0x8] sm:$0xff]  ;;  %v1077_v33 = vld [vmem:[#allocation2] sm:$0xff]  ;;  %v1080_v34 = vld [vmem:[#allocation2 + $0x18] sm:$0xff]  ;;  %s6820_s23 = sld [smem:[#allocation63_spill]]  ;;  %p3994_p13 = scmp.eq.s32.totalorder %s4991_s17, 1 }
 0x104   : > { %1381 = vmatprep.subr.bf16.mxu0 %v1078_v32  ;;  %v1079_v35 = vld [vmem:[#allocation2 + $0x10] sm:$0xff]  ;;  %v1082_v36 = vld [vmem:[#allocation2 + $0x28] sm:$0xff]  ;;  %v1081_v37 = vld [vmem:[#allocation2 + $0x20] sm:$0xff] }
 0x105   : > { %1382 = vmatpush1.bf16.msra.mxu0 %v1077_v33  ;;  %v1084_v38 = vld [vmem:[#allocation2 + $0x38] sm:$0xff]  ;;  %v1083_v39 = vld [vmem:[#allocation2 + $0x30] sm:$0xff]  ;;  %v5295_v46 = vld [vmem:[%s5256_s2 + $0x14] ss:$8 sps:$4 sm:$0xff]  }
 0x106   : > { %1383 = vmatprep.subr.bf16.mxu0 %v1080_v34  ;;  %v1086_v40 = vld [vmem:[#allocation2 + $0x48] sm:$0xff]  ;;  %v4393_v41 = vld [vmem:[#allocation3 + $0x4] ss:$12 sps:$4 sm:$0xff]   ;;  %v5289_v42 = vld [vmem:[%s5256_s2 + $0x4] ss:$8 sps:$4 sm:$0xff]  }
 0x107   : > { %1413 = vmatprep.mubr.bf16.mxu0 %v4393_v41  ;;  %v5292_v43 = vld [vmem:[%s5256_s2] ss:$8 sps:$4 sm:$0xff]   ;;  %v1085_v44 = vld [vmem:[#allocation2 + $0x40] sm:$0xff]  ;;  %v4412_v50 = vld [vmem:[%s5256_s2 + $0x24] ss:$8 sps:$4 sm:$0xff]  }
 0x108   : > { %v1088_v45 = vld [vmem:[#allocation2 + $0x58] sm:$0xff]  ;;  %v5298_v47 = vld [vmem:[%s5256_s2 + $0x10] ss:$8 sps:$4 sm:$0xff]   ;;  %v1087_v48 = vld [vmem:[#allocation2 + $0x50] sm:$0xff] }
 0x109   : > { %1384 = vmatpush1.bf16.msra.mxu0 %v1079_v35  ;;  %v1090_v49 = vld [vmem:[#allocation2 + $0x68] sm:$0xff]  ;;  %v5302_v51 = vld [vmem:[%s5256_s2 + $0x20] ss:$8 sps:$4 sm:$0xff]   ;;  %v1089_v52 = vld [vmem:[#allocation2 + $0x60] sm:$0xff] }
 0x10a   : > { %1385 = vmatprep.subr.bf16.mxu0 %v1082_v36  ;;  %v1092_v53 = vld [vmem:[#allocation2 + $0x78] sm:$0xff]  ;;  %v4421_v54 = vld [vmem:[%s5256_s2 + $0x34] ss:$8 sps:$4 sm:$0xff]   ;;  %v4423_v55 = vld [vmem:[%s5256_s2 + $0x30] ss:$8 sps:$4 sm:$0xff]  }
 0x10b   : > { %v1091_v56 = vld [vmem:[#allocation2 + $0x70] sm:$0xff]  ;;  %v1094_v57 = vld [vmem:[#allocation2 + $0x88] sm:$0xff]  ;;  %v1093_v60 = vld [vmem:[#allocation2 + $0x80] sm:$0xff] }
 0x10c   : > { %v4430_v58 = vld [vmem:[%s5256_s2 + $0x44] ss:$8 sps:$4 sm:$0xff]   ;;  %v4432_v59 = vld [vmem:[%s5256_s2 + $0x40] ss:$8 sps:$4 sm:$0xff]   ;;  %v4439_v62 = vld [vmem:[%s5256_s2 + $0x54] ss:$8 sps:$4 sm:$0xff]  }
 0x10d   : > { %1386 = vmatpush1.bf16.msra.mxu0 %v1081_v37  ;;  %v1096_v61 = vld [vmem:[#allocation2 + $0x98] sm:$0xff]  ;;  %v4441_v63 = vld [vmem:[%s5256_s2 + $0x50] ss:$8 sps:$4 sm:$0xff]   ;;  %v1095_v0 = vld [vmem:[#allocation2 + $0x90] sm:$0xff] }
 0x10e   : > { %1387 = vmatprep.subr.bf16.mxu0 %v1084_v38  ;;  %v1098_v1 = vld [vmem:[#allocation2 + $0xa8] sm:$0xff]  ;;  %v4448_v2 = vld [vmem:[%s5256_s2 + $0x64] ss:$8 sps:$4 sm:$0xff]   ;;  %v4450_v3 = vld [vmem:[%s5256_s2 + $0x60] ss:$8 sps:$4 sm:$0xff]  }
 0x10f   : > { %v1097_v4 = vld [vmem:[#allocation2 + $0xa0] sm:$0xff]  ;;  %v1100_v5 = vld [vmem:[#allocation2 + $0xb8] sm:$0xff]  ;;  %v1099_v6 = vld [vmem:[#allocation2 + $0xb0] sm:$0xff] }
 0x110   : > { %v1102_v7 = vld [vmem:[#allocation2 + $0xc8] sm:$0xff]  ;;  %v1101_v8 = vld [vmem:[#allocation2 + $0xc0] sm:$0xff]  ;;  %v1104_v9 = vld [vmem:[#allocation2 + $0xd8] sm:$0xff] }
 0x111   : > { %1388 = vmatpush1.bf16.msra.mxu0 %v1083_v39  ;;  %v1103_v10 = vld [vmem:[#allocation2 + $0xd0] sm:$0xff]  ;;  %v4457_v11 = vld [vmem:[%s5256_s2 + $0x74] ss:$8 sps:$4 sm:$0xff]   ;;  %v4459_v12 = vld [vmem:[%s5256_s2 + $0x70] ss:$8 sps:$4 sm:$0xff]  }
 0x112   : > { %1389 = vmatprep.subr.bf16.mxu0 %v1086_v40  ;;  %v1106_v13 = vld [vmem:[#allocation2 + $0xe8] sm:$0xff]  ;;  %v1105_v14 = vld [vmem:[#allocation2 + $0xe0] sm:$0xff]  ;;  %v1108_v15 = vld [vmem:[#allocation2 + $0xf8] sm:$0xff] }
 0x113   : > { %v1107_v16 = vld [vmem:[#allocation2 + $0xf0] sm:$0xff]  ;;  %v4391_v17 = vld [vmem:[#allocation3] ss:$12 sps:$4 sm:$0xff]   ;;  %v4397_v18 = vld [vmem:[#allocation3 + $0x1c] ss:$12 sps:$4 sm:$0xff]  }
 0x114   : > { %v4399_v19 = vld [vmem:[#allocation3 + $0x18] ss:$12 sps:$4 sm:$0xff]   ;;  %v4400_v20 = vld [vmem:[#allocation3 + $0x34] ss:$12 sps:$4 sm:$0xff]   ;;  %v4402_v21 = vld [vmem:[#allocation3 + $0x30] ss:$12 sps:$4 sm:$0xff]  }
 0x115   : > { %1390 = vmatpush1.bf16.msra.mxu0 %v1085_v44  ;;  %v4406_v22 = vld [vmem:[#allocation3 + $0x4c] ss:$12 sps:$4 sm:$0xff]   ;;  %v4408_v23 = vld [vmem:[#allocation3 + $0x48] ss:$12 sps:$4 sm:$0xff]   ;;  %v4409_v24 = vld [vmem:[#allocation3 + $0x64] ss:$12 sps:$4 sm:$0xff]  }
 0x116   : > { %1391 = vmatprep.subr.bf16.mxu0 %v1088_v45  ;;  %v4411_v25 = vld [vmem:[#allocation3 + $0x60] ss:$12 sps:$4 sm:$0xff]   ;;  %v4415_v26 = vld [vmem:[#allocation3 + $0x7c] ss:$12 sps:$4 sm:$0xff]   ;;  %v4417_v27 = vld [vmem:[#allocation3 + $0x78] ss:$12 sps:$4 sm:$0xff]  }
 0x117   : > { %v4418_v28 = vld [vmem:[#allocation3 + $0x94] ss:$12 sps:$4 sm:$0xff]   ;;  %v4420_v29 = vld [vmem:[#allocation3 + $0x90] ss:$12 sps:$4 sm:$0xff]   ;;  %v4424_v30 = vld [vmem:[#allocation3 + $0xac] ss:$12 sps:$4 sm:$0xff]  }
 0x118   : > { %v4426_v31 = vld [vmem:[#allocation3 + $0xa8] ss:$12 sps:$4 sm:$0xff]   ;;  %v4427_v32 = vld [vmem:[#allocation3 + $0xc4] ss:$12 sps:$4 sm:$0xff]   ;;  %v4429_v33 = vld [vmem:[#allocation3 + $0xc0] ss:$12 sps:$4 sm:$0xff]  }
 0x119   : > { %1392 = vmatpush1.bf16.msra.mxu0 %v1087_v48  ;;  %v4433_v34 = vld [vmem:[#allocation3 + $0xdc] ss:$12 sps:$4 sm:$0xff]   ;;  %v4435_v35 = vld [vmem:[#allocation3 + $0xd8] ss:$12 sps:$4 sm:$0xff]   ;;  %v4436_v36 = vld [vmem:[#allocation3 + $0xf4] ss:$12 sps:$4 sm:$0xff]  }
 0x11a   : > { %1393 = vmatprep.subr.bf16.mxu0 %v1090_v49  ;;  %v4438_v37 = vld [vmem:[#allocation3 + $0xf0] ss:$12 sps:$4 sm:$0xff]   ;;  %v4442_v38 = vld [vmem:[#allocation3 + $0x10c] ss:$12 sps:$4 sm:$0xff]   ;;  %v4444_v39 = vld [vmem:[#allocation3 + $0x108] ss:$12 sps:$4 sm:$0xff]  }
 0x11b   : > { %v4445_v40 = vld [vmem:[#allocation3 + $0x124] ss:$12 sps:$4 sm:$0xff]   ;;  %v4447_v41 = vld [vmem:[#allocation3 + $0x120] ss:$12 sps:$4 sm:$0xff]   ;;  %v4479_v48 = vld [vmem:[%s5282_s1 + $0x4] ss:$8 sps:$4 sm:$0xff]  }
 0x11c   : > { %v4454_v44 = vld [vmem:[#allocation3 + $0x154] ss:$12 sps:$4 sm:$0xff]   ;;  %v4456_v45 = vld [vmem:[#allocation3 + $0x150] ss:$12 sps:$4 sm:$0xff]   ;;  %2003 = vmatprep.subr.bf16.mxu1 %v4479_v48 }
 0x11d   : > { %1394 = vmatpush1.bf16.msra.mxu0 %v1089_v52  ;;  %v4481_v49 = vld [vmem:[%s5282_s1] ss:$8 sps:$4 sm:$0xff]   ;;  %v4484_v52 = vld [vmem:[%s5282_s1 + $0x10] ss:$8 sps:$4 sm:$0xff]  }
 0x11e   : > { %1395 = vmatprep.subr.bf16.mxu0 %v1092_v53  ;;  %2004 = vmatpush1.bf16.msra.mxu1 %v4481_v49  ;;  %v4463_v53 = vld [vmem:[#allocation3 + $0x8] ss:$12 sps:$4 sm:$0xff]  }
 0x121   : > { %1396 = vmatpush1.bf16.msra.mxu0 %v1091_v56  ;;  %v4488_v56 = vld [vmem:[%s5282_s1 + $0x34] ss:$8 sps:$4 sm:$0xff]  }
 0x122   : > { %1397 = vmatprep.subr.bf16.mxu0 %v1094_v57  ;;  %v4490_v57 = vld [vmem:[%s5282_s1 + $0x30] ss:$8 sps:$4 sm:$0xff]  }
 0x125   : > { %1398 = vmatpush1.bf16.msra.mxu0 %v1093_v60  ;;  %v4493_v60 = vld [vmem:[%s5282_s1 + $0x40] ss:$8 sps:$4 sm:$0xff]  }
 0x126   : > { %1399 = vmatprep.subr.bf16.mxu0 %v1096_v61  ;;  %v4494_v61 = vld [vmem:[%s5282_s1 + $0x54] ss:$8 sps:$4 sm:$0xff]  }
 0x129   : > { %1400 = vmatpush1.bf16.msra.mxu0 %v1095_v0  ;;  %v4497_v0 = vld [vmem:[%s5282_s1 + $0x64] ss:$8 sps:$4 sm:$0xff]  }
 0x12a   : > { %1401 = vmatprep.subr.bf16.mxu0 %v1098_v1  ;;  %v4499_v1 = vld [vmem:[%s5282_s1 + $0x60] ss:$8 sps:$4 sm:$0xff]  }
 0x12d   : > { %1402 = vmatpush1.bf16.msra.mxu0 %v1097_v4  ;;  %v4466_v4 = vld [vmem:[#allocation3 + $0x50] ss:$12 sps:$4 sm:$0xff]  }
 0x12e   : > { %1403 = vmatprep.subr.bf16.mxu0 %v1100_v5  ;;  %v4503_v5 = vld [vmem:[%s5282_s1 + $0x84] ss:$8 sps:$4 sm:$0xff]  }
 0x131   : > { %1404 = vmatpush1.bf16.msra.mxu0 %v1099_v6  ;;  %v4505_v6 = vld [vmem:[%s5282_s1 + $0x80] ss:$8 sps:$4 sm:$0xff]  }
 0x132   : > { %1405 = vmatprep.subr.bf16.mxu0 %v1102_v7  ;;  %v4506_v7 = vld [vmem:[%s5282_s1 + $0x94] ss:$8 sps:$4 sm:$0xff]  }
 0x135   : > { %1406 = vmatpush1.bf16.msra.mxu0 %v1101_v8  ;;  %v4508_v8 = vld [vmem:[%s5282_s1 + $0x90] ss:$8 sps:$4 sm:$0xff]  }
 0x136   : > { %1407 = vmatprep.subr.bf16.mxu0 %v1104_v9  ;;  %v4467_v9 = vld [vmem:[#allocation3 + $0x68] ss:$12 sps:$4 sm:$0xff]  }
 0x139   : > { %1408 = vmatpush1.bf16.msra.mxu0 %v1103_v10  ;;  %v4509_v10 = vld [vmem:[%s5282_s1 + $0xa4] ss:$8 sps:$4 sm:$0xff]  }
 0x13a   : > { %1409 = vmatprep.subr.bf16.mxu0 %v1106_v13  ;;  %v4514_v13 = vld [vmem:[%s5282_s1 + $0xb0] ss:$8 sps:$4 sm:$0xff]  }
 0x13d   : > { %1410 = vmatpush1.bf16.msra.mxu0 %v1105_v14  ;;  %v4468_v14 = vld [vmem:[#allocation3 + $0x80] ss:$12 sps:$4 sm:$0xff]  }
 0x13e   : > { %1411 = vmatprep.subr.bf16.mxu0 %v1108_v15  ;;  %v4515_v15 = vld [vmem:[%s5282_s1 + $0xc4] ss:$8 sps:$4 sm:$0xff]  }
 0x141   : > { %1412 = vmatpush1.bf16.msra.mxu0 %v1107_v16  ;;  %v4517_v16 = vld [vmem:[%s5282_s1 + $0xc0] ss:$8 sps:$4 sm:$0xff]  }
 0x142   : > { %1574 = vmatprep.subr.bf16.mxu0 %v5289_v42  ;;  %v4451_v42 = vld [vmem:[#allocation3 + $0x13c] ss:$12 sps:$4 sm:$0xff]  }
 0x144   : > { %1414 = vmatmul.mubr.bf16.vlgmr.msra.gmra.mrb[0].mxu0 %v4391_v17  ;;  %v4518_v17 = vld [vmem:[%s5282_s1 + $0xd4] ss:$8 sps:$4 sm:$0xff]  }
 0x145   : > { %1575 = vmatpush1.bf16.msra.mxu0 %v5292_v43  ;;  %1423 = vmatprep.mubr.bf16.mxu0 %v4397_v18  ;;  %v4453_v43 = vld [vmem:[#allocation3 + $0x138] ss:$12 sps:$4 sm:$0xff]   ;;  %v4520_v18 = vld [vmem:[%s5282_s1 + $0xd0] ss:$8 sps:$4 sm:$0xff]  }
 0x146   : > { %1576 = vmatprep.subr.bf16.mxu0 %v5295_v46  ;;  %v4460_v46 = vld [vmem:[#allocation3 + $0x16c] ss:$12 sps:$4 sm:$0xff]  }
 0x149   : > { %1577 = vmatpush1.bf16.msra.mxu0 %v5298_v47  ;;  %v4462_v47 = vld [vmem:[#allocation3 + $0x168] ss:$12 sps:$4 sm:$0xff]  }
 0x14a   : > { %1578 = vmatprep.subr.bf16.mxu0 %v4412_v50  ;;  %v4482_v50 = vld [vmem:[%s5282_s1 + $0x14] ss:$8 sps:$4 sm:$0xff]  }
 0x14b   : > { %2005 = vmatprep.subr.bf16.mxu1 %v4482_v50  ;;  %v4533_v50 = vld [vmem:[%s5284_s19 + $0x20] ss:$8 sps:$4 sm:$0xff]  }
 0x14c   : > { %1424 = vmatmul.mubr.bf16.gmra.mrb[4].mxu0 %v4399_v19  ;;  %2006 = vmatpush1.bf16.msra.mxu1 %v4484_v52  ;;  %v4469_v19 = vld [vmem:[#allocation3 + $0x98] ss:$12 sps:$4 sm:$0xff]  }
 0x14d   : > { %1433 = vmatprep.mubr.bf16.mxu0 %v4400_v20  ;;  %1579 = vmatpush1.bf16.msra.mxu0 %v5302_v51  ;;  %v4892_v51 = vmov 0   ;;  %v4521_v20 = vld [vmem:[%s5282_s1 + $0xe4] ss:$8 sps:$4 sm:$0xff]  }
 0x14e   : > { %1580 = vmatprep.subr.bf16.mxu0 %v4421_v54  ;;  %v4485_v54 = vld [vmem:[%s5282_s1 + $0x24] ss:$8 sps:$4 sm:$0xff]  }
 0x14f   : > { %2007 = vmatprep.subr.bf16.mxu1 %v4485_v54 }
 0x151   : > { %1581 = vmatpush1.bf16.msra.mxu0 %v4423_v55  ;;  %v4487_v55 = vld [vmem:[%s5282_s1 + $0x20] ss:$8 sps:$4 sm:$0xff]  }
 0x152   : > { %1582 = vmatprep.subr.bf16.mxu0 %v4430_v58  ;;  %2008 = vmatpush1.bf16.msra.mxu1 %v4487_v55  ;;  %v4464_v58 = vld [vmem:[#allocation3 + $0x20] ss:$12 sps:$4 sm:$0xff]   ;;  %v4541_v55 = vld [vmem:[%s5284_s19 + $0x44] ss:$8 sps:$4 sm:$0xff]  }
 0x153   : > { %2009 = vmatprep.subr.bf16.mxu1 %v4488_v56 }
 0x154   : > { %1434 = vmatmul.mubr.bf16.gmra.mrb[8].mxu0 %v4402_v21  ;;  %v4470_v21 = vld [vmem:[#allocation3 + $0xb0] ss:$12 sps:$4 sm:$0xff]  }
 0x155   : > { %1443 = vmatprep.mubr.bf16.mxu0 %v4406_v22  ;;  %1583 = vmatpush1.bf16.msra.mxu0 %v4432_v59  ;;  %v4491_v59 = vld [vmem:[%s5282_s1 + $0x44] ss:$8 sps:$4 sm:$0xff]  }
 0x156   : > { %1584 = vmatprep.subr.bf16.mxu0 %v4439_v62  ;;  %2010 = vmatpush1.bf16.msra.mxu1 %v4490_v57  ;;  %v4496_v62 = vld [vmem:[%s5282_s1 + $0x50] ss:$8 sps:$4 sm:$0xff]  }
 0x157   : > { %2011 = vmatprep.subr.bf16.mxu1 %v4491_v59  ;;  %v4471_v22 = vld [vmem:[#allocation3 + $0xc8] ss:$12 sps:$4 sm:$0xff]  }
 0x159   : > { %1585 = vmatpush1.bf16.msra.mxu0 %v4441_v63  ;;  %v4465_v63 = vld [vmem:[#allocation3 + $0x38] ss:$12 sps:$4 sm:$0xff]  }
 0x15a   : > { %1586 = vmatprep.subr.bf16.mxu0 %v4448_v2  ;;  %2012 = vmatpush1.bf16.msra.mxu1 %v4493_v60  ;;  %v4500_v2 = vld [vmem:[%s5282_s1 + $0x74] ss:$8 sps:$4 sm:$0xff]   ;;  %v4539_v60 = vld [vmem:[%s5284_s19 + $0x40] ss:$8 sps:$4 sm:$0xff]  }
 0x15b   : > { %2013 = vmatprep.subr.bf16.mxu1 %v4494_v61  ;;  %v4544_v61 = vld [vmem:[%s5284_s19 + $0x54] ss:$8 sps:$4 sm:$0xff]  }
 0x15c   : > { %1444 = vmatmul.mubr.bf16.gmra.mrb[12].mxu0 %v4408_v23  ;;  %v4472_v23 = vld [vmem:[#allocation3 + $0xe0] ss:$12 sps:$4 sm:$0xff]  }
 0x15d   : > { %1453 = vmatprep.mubr.bf16.mxu0 %v4409_v24  ;;  %1587 = vmatpush1.bf16.msra.mxu0 %v4450_v3  ;;  %v4502_v3 = vld [vmem:[%s5282_s1 + $0x70] ss:$8 sps:$4 sm:$0xff]   ;;  %v4473_v24 = vld [vmem:[#allocation3 + $0xf8] ss:$12 sps:$4 sm:$0xff]  }
 0x15e   : > { %1588 = vmatprep.subr.bf16.mxu0 %v4457_v11  ;;  %2014 = vmatpush1.bf16.msra.mxu1 %v4496_v62  ;;  %v4511_v11 = vld [vmem:[%s5282_s1 + $0xa0] ss:$8 sps:$4 sm:$0xff]  }
 0x15f   : > { %2015 = vmatprep.subr.bf16.mxu1 %v4497_v0 }
 0x161   : > { %1589 = vmatpush1.bf16.msra.mxu0 %v4459_v12  ;;  %v4512_v12 = vld [vmem:[%s5282_s1 + $0xb4] ss:$8 sps:$4 sm:$0xff]  }
 0x162   : > { %2016 = vmatpush1.bf16.msra.mxu1 %v4499_v1  ;;  %v4547_v1 = vld [vmem:[%s5284_s19 + $0x64] ss:$8 sps:$4 sm:$0xff]  }
 0x163   : > { %2017 = vmatprep.subr.bf16.mxu1 %v4500_v2 }
 0x164   : > { %1454 = vmatmul.mubr.bf16.gmra.mrb[16].mxu0 %v4411_v25  ;;  %v4523_v25 = vld [vmem:[%s5282_s1 + $0xe0] ss:$8 sps:$4 sm:$0xff]  }
 0x165   : > { %1463 = vmatprep.mubr.bf16.mxu0 %v4415_v26  ;;  %v4474_v26 = vld [vmem:[#allocation3 + $0x110] ss:$12 sps:$4 sm:$0xff]  }
 0x166   : > { %2018 = vmatpush1.bf16.msra.mxu1 %v4502_v3 }
 0x167   : > { %2019 = vmatprep.subr.bf16.mxu1 %v4503_v5 }
 0x16a   : > { %2020 = vmatpush1.bf16.msra.mxu1 %v4505_v6  ;;  %v4545_v6 = vld [vmem:[%s5284_s19 + $0x60] ss:$8 sps:$4 sm:$0xff]  }
 0x16b   : > { %2021 = vmatprep.subr.bf16.mxu1 %v4506_v7  ;;  %v4550_v7 = vld [vmem:[%s5284_s19 + $0x74] ss:$8 sps:$4 sm:$0xff]  }
 0x16c   : > { %1464 = vmatmul.mubr.bf16.gmra.mrb[20].mxu0 %v4417_v27  ;;  %v4524_v27 = vld [vmem:[%s5282_s1 + $0xf4] ss:$8 sps:$4 sm:$0xff]  }
 0x16d   : > { %1473 = vmatprep.mubr.bf16.mxu0 %v4418_v28  ;;  %v4526_v28 = vld [vmem:[%s5282_s1 + $0xf0] ss:$8 sps:$4 sm:$0xff]  }
 0x16e   : > { %2022 = vmatpush1.bf16.msra.mxu1 %v4508_v8 }
 0x16f   : > { %2023 = vmatprep.subr.bf16.mxu1 %v4509_v10 }
 0x172   : > { %2024 = vmatpush1.bf16.msra.mxu1 %v4511_v11  ;;  %v4553_v11 = vld [vmem:[%s5284_s19 + $0x84] ss:$8 sps:$4 sm:$0xff]  }
 0x173   : > { %2025 = vmatprep.subr.bf16.mxu1 %v4512_v12 }
 0x174   : > { %1474 = vmatmul.mubr.bf16.gmra.mrb[24].mxu0 %v4420_v29  ;;  %v4475_v29 = vld [vmem:[#allocation3 + $0x128] ss:$12 sps:$4 sm:$0xff]  }
 0x175   : > { %1483 = vmatprep.mubr.bf16.mxu0 %v4424_v30  ;;  %v4476_v30 = vld [vmem:[#allocation3 + $0x140] ss:$12 sps:$4 sm:$0xff]  }
 0x176   : > { %2026 = vmatpush1.bf16.msra.mxu1 %v4514_v13 }
 0x177   : > { %2027 = vmatprep.subr.bf16.mxu1 %v4515_v15 }
 0x17a   : > { %2028 = vmatpush1.bf16.msra.mxu1 %v4517_v16  ;;  %v4551_v16 = vld [vmem:[%s5284_s19 + $0x80] ss:$8 sps:$4 sm:$0xff]  }
 0x17b   : > { %2029 = vmatprep.subr.bf16.mxu1 %v4518_v17  ;;  %v4556_v17 = vld [vmem:[%s5284_s19 + $0x94] ss:$8 sps:$4 sm:$0xff]  }
 0x17c   : > { %1484 = vmatmul.mubr.bf16.gmra.mrb[28].mxu0 %v4426_v31  ;;  %v4477_v31 = vld [vmem:[#allocation3 + $0x158] ss:$12 sps:$4 sm:$0xff]  }
 0x17d   : > { %1493 = vmatprep.mubr.bf16.mxu0 %v4427_v32  ;;  %v4478_v32 = vld [vmem:[#allocation3 + $0x170] ss:$12 sps:$4 sm:$0xff]  }
 0x17e   : > { %2030 = vmatpush1.bf16.msra.mxu1 %v4520_v18 }
 0x17f   : > { %2031 = vmatprep.subr.bf16.mxu1 %v4521_v20 }
 0x182   : > { %2032 = vmatpush1.bf16.msra.mxu1 %v4523_v25 }
 0x183   : > { %2033 = vmatprep.subr.bf16.mxu1 %v4524_v27  ;;  %v4562_v27 = vld [vmem:[%s5284_s19 + $0xb4] ss:$8 sps:$4 sm:$0xff]  }
 0x184   : > { %1494 = vmatmul.mubr.bf16.gmra.mrb[32].mxu0 %v4429_v33  ;;  %v4529_v33 = vld [vmem:[%s5284_s19 + $0x4] ss:$8 sps:$4 sm:$0xff]  }
 0x185   : > { %1503 = vmatprep.mubr.bf16.mxu0 %v4433_v34 }
 0x186   : > { %2034 = vmatpush1.bf16.msra.mxu1 %v4526_v28 }
 0x187   : > { %2496 = vmatprep.subr.bf16.mxu1 %v4529_v33 }
 0x18c   : > { %1504 = vmatmul.mubr.bf16.gmra.mrb[36].mxu0 %v4435_v35 }
 0x18d   : > { %1513 = vmatprep.mubr.bf16.mxu0 %v4436_v36 }
 0x194   : > { %1514 = vmatmul.mubr.bf16.gmra.mrb[40].mxu0 %v4438_v37 }
 0x195   : > { %1523 = vmatprep.mubr.bf16.mxu0 %v4442_v38 }
 0x19c   : > { %1524 = vmatmul.mubr.bf16.gmra.mrb[44].mxu0 %v4444_v39 }
 0x19d   : > { %1533 = vmatprep.mubr.bf16.mxu0 %v4445_v40  ;;  %v4527_v40 = vld [vmem:[%s5284_s19] ss:$8 sps:$4 sm:$0xff]  }
 0x1a4   : > { %1534 = vmatmul.mubr.bf16.gmra.mrb[48].mxu0 %v4447_v41  ;;  %v4532_v41 = vld [vmem:[%s5284_s19 + $0x14] ss:$8 sps:$4 sm:$0xff]  }
 0x1a5   : > { %1543 = vmatprep.mubr.bf16.mxu0 %v4451_v42 }
 0x1ac   : > { %1544 = vmatmul.mubr.bf16.gmra.mrb[52].mxu0 %v4453_v43  ;;  %v4530_v43 = vld [vmem:[%s5284_s19 + $0x10] ss:$8 sps:$4 sm:$0xff]  }
 0x1ad   : > { %1553 = vmatprep.mubr.bf16.mxu0 %v4454_v44 }
 0x1b4   : > { %1554 = vmatmul.mubr.bf16.gmra.mrb[56].mxu0 %v4456_v45  ;;  %v4535_v45 = vld [vmem:[%s5284_s19 + $0x24] ss:$8 sps:$4 sm:$0xff]  }
 0x1b5   : > { %1563 = vmatprep.mubr.bf16.mxu0 %v4460_v46 }
 0x1bc   : > { %1564 = vmatmul.mubr.bf16.gmra.mrb[60].mxu0 %v4462_v47 }
 0x1bd   : > { %1606 = vmatprep.mubr.bf16.mxu0 %v4892_v51 }
 0x1c4   : > { %1607 = vmatmul.mubr.bf16.vlgmr.msra.gmra.mrb[0].mxu0 %v4463_v53  ;;  %v4536_v53 = vld [vmem:[%s5284_s19 + $0x30] ss:$8 sps:$4 sm:$0xff]  }
 0x1c5   : > { %1616 = vmatprep.mubr.bf16.mxu0 %v4892_v51 }
 0x1cc   : > { %1617 = vmatmul.mubr.bf16.gmra.mrb[4].mxu0 %v4464_v58 }
 0x1cd   : > { %1626 = vmatprep.mubr.bf16.mxu0 %v4892_v51 }
 0x1d4   : > { %1627 = vmatmul.mubr.bf16.gmra.mrb[8].mxu0 %v4465_v63  ;;  %v4542_v63 = vld [vmem:[%s5284_s19 + $0x50] ss:$8 sps:$4 sm:$0xff]  }
 0x1d5   : > { %1636 = vmatprep.mubr.bf16.mxu0 %v4892_v51 }
 0x1dc   : > { %1637 = vmatmul.mubr.bf16.gmra.mrb[12].mxu0 %v4466_v4 }
 0x1dd   : > { %1646 = vmatprep.mubr.bf16.mxu0 %v4892_v51 }
 0x1e4   : > { %1647 = vmatmul.mubr.bf16.gmra.mrb[16].mxu0 %v4467_v9  ;;  %v4548_v9 = vld [vmem:[%s5284_s19 + $0x70] ss:$8 sps:$4 sm:$0xff]  }
 0x1e5   : > { %1656 = vmatprep.mubr.bf16.mxu0 %v4892_v51 }
 0x1ec   : > { %1657 = vmatmul.mubr.bf16.gmra.mrb[20].mxu0 %v4468_v14 }
 0x1ed   : > { %1666 = vmatprep.mubr.bf16.mxu0 %v4892_v51 }
 0x1f4   : > { %1667 = vmatmul.mubr.bf16.gmra.mrb[24].mxu0 %v4469_v19  ;;  %v4554_v19 = vld [vmem:[%s5284_s19 + $0x90] ss:$8 sps:$4 sm:$0xff]  }
 0x1f5   : > { %1676 = vmatprep.mubr.bf16.mxu0 %v4892_v51 }
 0x1fc   : > { %1677 = vmatmul.mubr.bf16.gmra.mrb[28].mxu0 %v4470_v21  ;;  %v4559_v21 = vld [vmem:[%s5284_s19 + $0xa4] ss:$8 sps:$4 sm:$0xff]  }
 0x1fd   : > { %1686 = vmatprep.mubr.bf16.mxu0 %v4892_v51 }
 0x204   : > { %1687 = vmatmul.mubr.bf16.gmra.mrb[32].mxu0 %v4471_v22 }
 0x205   : > { %1696 = vmatprep.mubr.bf16.mxu0 %v4892_v51 }
 0x20c   : > { %1697 = vmatmul.mubr.bf16.gmra.mrb[36].mxu0 %v4472_v23 }
 0x20d   : > { %1706 = vmatprep.mubr.bf16.mxu0 %v4892_v51 }
 0x214   : > { %1707 = vmatmul.mubr.bf16.gmra.mrb[40].mxu0 %v4473_v24 }
 0x215   : > { %1716 = vmatprep.mubr.bf16.mxu0 %v4892_v51 }
 0x21c   : > { %1717 = vmatmul.mubr.bf16.gmra.mrb[44].mxu0 %v4474_v26  ;;  %v4557_v26 = vld [vmem:[%s5284_s19 + $0xa0] ss:$8 sps:$4 sm:$0xff]  }
 0x21d   : > { %1726 = vmatprep.mubr.bf16.mxu0 %v4892_v51 }
 0x224   : > { %1727 = vmatmul.mubr.bf16.gmra.mrb[48].mxu0 %v4475_v29  ;;  %v4560_v29 = vld [vmem:[%s5284_s19 + $0xb0] ss:$8 sps:$4 sm:$0xff]  }
 0x225   : > { %1736 = vmatprep.mubr.bf16.mxu0 %v4892_v51 }
 0x22c   : > { %1737 = vmatmul.mubr.bf16.gmra.mrb[52].mxu0 %v4476_v30 }
 0x22d   : > { %1746 = vmatprep.mubr.bf16.mxu0 %v4892_v51 }
 0x234   : > { %1747 = vmatmul.mubr.bf16.gmra.mrb[56].mxu0 %v4477_v31  ;;  %v4565_v31 = vld [vmem:[%s5284_s19 + $0xc4] ss:$8 sps:$4 sm:$0xff]  }
 0x235   : > { %1756 = vmatprep.mubr.bf16.mxu0 %v4892_v51  ;;  %v4538_v51 = vld [vmem:[%s5284_s19 + $0x34] ss:$8 sps:$4 sm:$0xff]  }
 0x23c   : > { %1757 = vmatmul.mubr.bf16.gmra.mrb[60].mxu0 %v4478_v32 }
 0x297   : > { %v1608_v34 = vpop.f32.mrb[0].mxu0 }
 0x298   : > { %v1610_v35 = vpop.f32.mrb[1].mxu0 }
 0x299   : > { %v1612_v36 = vpop.f32.mrb[2].mxu0 }
 0x29a   : > { %v1767_v37 = vpack.c.bf16 %v1612_v36, %v1608_v34  ;;  %v1614_v38 = vpop.f32.mrb[3].mxu0  ;;  %v4563_v36 = vld [vmem:[%s5284_s19 + $0xc0] ss:$8 sps:$4 sm:$0xff]  }
 0x29b   : > { %v1768_v39 = vpack.c.bf16 %v1614_v38, %v1610_v35 }
 0x29d   : > { %2035 = vmatprep.mubr.bf16.mxu1 %v1768_v39  ;;  %v4566_v39 = vld [vmem:[%s5284_s19 + $0xd0] ss:$8 sps:$4 sm:$0xff]  }
 0x29e   : > { %2036 = vmatmul.mubr.bf16.vlgmr.msra.gmra.mrb[0].mxu1 %v1767_v37  ;;  %v4568_v37 = vld [vmem:[%s5284_s19 + $0xd4] ss:$8 sps:$4 sm:$0xff]  }
 0x29f   : > { %v1618_v42 = vpop.f32.mrb[4].mxu0  ;;  %2497 = vmatpush1.bf16.msra.mxu1 %v4527_v40 }
 0x2a0   : > { %v1620_v44 = vpop.f32.mrb[5].mxu0  ;;  %2498 = vmatprep.subr.bf16.mxu1 %v4532_v41  ;;  %v4571_v41 = vld [vmem:[%s5284_s19 + $0xe4] ss:$8 sps:$4 sm:$0xff]  }
 0x2a1   : > { %v1622_v46 = vpop.f32.mrb[6].mxu0 }
 0x2a2   : > { %v1769_v47 = vpack.c.bf16 %v1622_v46, %v1618_v42  ;;  %v1624_v48 = vpop.f32.mrb[7].mxu0  ;;  %v4569_v46 = vld [vmem:[%s5284_s19 + $0xe0] ss:$8 sps:$4 sm:$0xff]  }
 0x2a3   : > { %v1770_v49 = vpack.c.bf16 %v1624_v48, %v1620_v44  ;;  %2499 = vmatpush1.bf16.msra.mxu1 %v4530_v43 }
 0x2a4   : > { %2500 = vmatprep.subr.bf16.mxu1 %v4535_v45 }
 0x2a5   : > { %2045 = vmatprep.mubr.bf16.mxu1 %v1770_v49 }
 0x2a6   : > { %2046 = vmatmul.mubr.bf16.gmra.mrb[4].mxu1 %v1769_v47 }
 0x2a7   : > { %v1628_v52 = vpop.f32.mrb[8].mxu0  ;;  %2501 = vmatpush1.bf16.msra.mxu1 %v4533_v50 }
 0x2a8   : > { %v1630_v54 = vpop.f32.mrb[9].mxu0  ;;  %2502 = vmatprep.subr.bf16.mxu1 %v4538_v51 }
 0x2a9   : > { %v1632_v56 = vpop.f32.mrb[10].mxu0 }
 0x2aa   : > { %v1771_v57 = vpack.c.bf16 %v1632_v56, %v1628_v52  ;;  %v1634_v58 = vpop.f32.mrb[11].mxu0 }
 0x2ab   : > { %v1772_v59 = vpack.c.bf16 %v1634_v58, %v1630_v54  ;;  %2503 = vmatpush1.bf16.msra.mxu1 %v4536_v53 }
 0x2ac   : > { %2504 = vmatprep.subr.bf16.mxu1 %v4541_v55 }
 0x2ad   : > { %2055 = vmatprep.mubr.bf16.mxu1 %v1772_v59 }
 0x2ae   : > { %2056 = vmatmul.mubr.bf16.gmra.mrb[8].mxu1 %v1771_v57 }
 0x2af   : > { %v1638_v62 = vpop.f32.mrb[12].mxu0  ;;  %2505 = vmatpush1.bf16.msra.mxu1 %v4539_v60 }
 0x2b0   : > { %v1640_v0 = vpop.f32.mrb[13].mxu0  ;;  %2506 = vmatprep.subr.bf16.mxu1 %v4544_v61 }
 0x2b1   : > { %v1642_v2 = vpop.f32.mrb[14].mxu0 }
 0x2b2   : > { %v1773_v3 = vpack.c.bf16 %v1642_v2, %v1638_v62  ;;  %v1644_v4 = vpop.f32.mrb[15].mxu0 }
 0x2b3   : > { %v1774_v5 = vpack.c.bf16 %v1644_v4, %v1640_v0  ;;  %2507 = vmatpush1.bf16.msra.mxu1 %v4542_v63 }
 0x2b4   : > { %2508 = vmatprep.subr.bf16.mxu1 %v4547_v1 }
 0x2b5   : > { %2065 = vmatprep.mubr.bf16.mxu1 %v1774_v5 }
 0x2b6   : > { %2066 = vmatmul.mubr.bf16.gmra.mrb[12].mxu1 %v1773_v3 }
 0x2b7   : > { %v1648_v8 = vpop.f32.mrb[16].mxu0  ;;  %2509 = vmatpush1.bf16.msra.mxu1 %v4545_v6 }
 0x2b8   : > { %v1650_v10 = vpop.f32.mrb[17].mxu0  ;;  %2510 = vmatprep.subr.bf16.mxu1 %v4550_v7  ;;  %v4574_v7 = vld [vmem:[%s5284_s19 + $0xf4] ss:$8 sps:$4 sm:$0xff]  }
 0x2b9   : > { %v1652_v12 = vpop.f32.mrb[18].mxu0 }
 0x2ba   : > { %v1775_v13 = vpack.c.bf16 %v1652_v12, %v1648_v8  ;;  %v1654_v14 = vpop.f32.mrb[19].mxu0 }
 0x2bb   : > { %v1776_v15 = vpack.c.bf16 %v1654_v14, %v1650_v10  ;;  %2511 = vmatpush1.bf16.msra.mxu1 %v4548_v9  ;;  %v4572_v9 = vld [vmem:[%s5284_s19 + $0xf0] ss:$8 sps:$4 sm:$0xff]  }
 0x2bc   : > { %2512 = vmatprep.subr.bf16.mxu1 %v4553_v11 }
 0x2bd   : > { %2075 = vmatprep.mubr.bf16.mxu1 %v1776_v15 }
 0x2be   : > { %2076 = vmatmul.mubr.bf16.gmra.mrb[16].mxu1 %v1775_v13 }
 0x2bf   : > { %v1658_v18 = vpop.f32.mrb[20].mxu0  ;;  %2513 = vmatpush1.bf16.msra.mxu1 %v4551_v16 }
 0x2c0   : > { %v1660_v20 = vpop.f32.mrb[21].mxu0  ;;  %2514 = vmatprep.subr.bf16.mxu1 %v4556_v17 }
 0x2c1   : > { %v1662_v22 = vpop.f32.mrb[22].mxu0 }
 0x2c2   : > { %v1777_v23 = vpack.c.bf16 %v1662_v22, %v1658_v18  ;;  %v1664_v24 = vpop.f32.mrb[23].mxu0 }
 0x2c3   : > { %v1778_v25 = vpack.c.bf16 %v1664_v24, %v1660_v20  ;;  %2515 = vmatpush1.bf16.msra.mxu1 %v4554_v19 }
 0x2c4   : > { %2516 = vmatprep.subr.bf16.mxu1 %v4559_v21 }
 0x2c5   : > { %2085 = vmatprep.mubr.bf16.mxu1 %v1778_v25 }
 0x2c6   : > { %2086 = vmatmul.mubr.bf16.gmra.mrb[20].mxu1 %v1777_v23 }
 0x2c7   : > { %v1668_v28 = vpop.f32.mrb[24].mxu0  ;;  %2517 = vmatpush1.bf16.msra.mxu1 %v4557_v26 }
 0x2c8   : > { %v1670_v30 = vpop.f32.mrb[25].mxu0  ;;  %2518 = vmatprep.subr.bf16.mxu1 %v4562_v27 }
 0x2c9   : > { %v1672_v32 = vpop.f32.mrb[26].mxu0 }
 0x2ca   : > { %v1779_v33 = vpack.c.bf16 %v1672_v32, %v1668_v28  ;;  %v1674_v34 = vpop.f32.mrb[27].mxu0 }
 0x2cb   : > { %v1780_v35 = vpack.c.bf16 %v1674_v34, %v1670_v30  ;;  %2519 = vmatpush1.bf16.msra.mxu1 %v4560_v29 }
 0x2cc   : > { %2520 = vmatprep.subr.bf16.mxu1 %v4565_v31 }
 0x2cd   : > { %2095 = vmatprep.mubr.bf16.mxu1 %v1780_v35 }
 0x2ce   : > { %2096 = vmatmul.mubr.bf16.gmra.mrb[24].mxu1 %v1779_v33  ;;  %v1833_v33 = vlaneseq }
 0x2cf   : > { %v1678_v38 = vpop.f32.mrb[28].mxu0  ;;  %2521 = vmatpush1.bf16.msra.mxu1 %v4563_v36  ;;  %v1831_v36 = vld [vmem:[%s659_s21] sm:$0x3] }
 0x2d0   : > { %v1680_v40 = vpop.f32.mrb[29].mxu0  ;;  %2522 = vmatprep.subr.bf16.mxu1 %v4568_v37  ;;  %v1834_v34 = vshrl.u32 %v1833_v33, 7 }
 0x2d1   : > { %v1682_v42 = vpop.f32.mrb[30].mxu0 }
 0x2d2   : > { %v1781_v43 = vpack.c.bf16 %v1682_v42, %v1678_v38  ;;  %v1684_v44 = vpop.f32.mrb[31].mxu0  ;;  %v5399_v35 = vsub.s32 0, %v1834_v34  ;;  %v5406_v37 = vsub.s32 1, %v1834_v34 }
 0x2d3   : > { %v1782_v45 = vpack.c.bf16 %v1684_v44, %v1680_v40  ;;  %2523 = vmatpush1.bf16.msra.mxu1 %v4566_v39 }
 0x2d4   : > { %2524 = vmatprep.subr.bf16.mxu1 %v4571_v41  ;;  %v5409_v38 = vrot.slane %v1831_v36, %v5399_v35  ;;  %v5412_v39 = vrot.slane %v1831_v36, %v5406_v37 }
 0x2d5   : > { %2105 = vmatprep.mubr.bf16.mxu1 %v1782_v45 }
 0x2d6   : > { %2106 = vmatmul.mubr.bf16.gmra.mrb[28].mxu1 %v1781_v43 }
 0x2d7   : > { %v1688_v47 = vpop.f32.mrb[32].mxu0  ;;  %2525 = vmatpush1.bf16.msra.mxu1 %v4569_v46 }
 0x2d8   : > { %v1690_v48 = vpop.f32.mrb[33].mxu0  ;;  %2526 = vmatprep.subr.bf16.mxu1 %v4574_v7 }
 0x2d9   : > { %v1692_v49 = vpop.f32.mrb[34].mxu0 }
 0x2da   : > { %v1783_v50 = vpack.c.bf16 %v1692_v49, %v1688_v47  ;;  %v1694_v51 = vpop.f32.mrb[35].mxu0 }
 0x2db   : > { %v1784_v52 = vpack.c.bf16 %v1694_v51, %v1690_v48  ;;  %2527 = vmatpush1.bf16.msra.mxu1 %v4572_v9 }
 0x2dd   : > { %2115 = vmatprep.mubr.bf16.mxu1 %v1784_v52 }
 0x2de   : > { %2116 = vmatmul.mubr.bf16.gmra.mrb[32].mxu1 %v1783_v50 }
 0x2df   : > { %v1698_v53 = vpop.f32.mrb[36].mxu0 }
 0x2e0   : > { %v1700_v54 = vpop.f32.mrb[37].mxu0 }
 0x2e1   : > { %v1702_v55 = vpop.f32.mrb[38].mxu0 }
 0x2e2   : > { %v1785_v56 = vpack.c.bf16 %v1702_v55, %v1698_v53  ;;  %v1704_v57 = vpop.f32.mrb[39].mxu0 }
 0x2e3   : > { %v1786_v58 = vpack.c.bf16 %v1704_v57, %v1700_v54 }
 0x2e5   : > { %2125 = vmatprep.mubr.bf16.mxu1 %v1786_v58 }
 0x2e6   : > { %2126 = vmatmul.mubr.bf16.gmra.mrb[36].mxu1 %v1785_v56 }
 0x2e7   : > { %v1708_v59 = vpop.f32.mrb[40].mxu0 }
 0x2e8   : > { %v1710_v60 = vpop.f32.mrb[41].mxu0 }
 0x2e9   : > { %v1712_v61 = vpop.f32.mrb[42].mxu0 }
 0x2ea   : > { %v1787_v62 = vpack.c.bf16 %v1712_v61, %v1708_v59  ;;  %v1714_v63 = vpop.f32.mrb[43].mxu0 }
 0x2eb   : > { %v1788_v0 = vpack.c.bf16 %v1714_v63, %v1710_v60 }
 0x2ed   : > { %2135 = vmatprep.mubr.bf16.mxu1 %v1788_v0 }
 0x2ee   : > { %2136 = vmatmul.mubr.bf16.gmra.mrb[40].mxu1 %v1787_v62 }
 0x2ef   : > { %v1718_v1 = vpop.f32.mrb[44].mxu0 }
 0x2f0   : > { %v1720_v2 = vpop.f32.mrb[45].mxu0 }
 0x2f1   : > { %v1722_v3 = vpop.f32.mrb[46].mxu0 }
 0x2f2   : > { %v1789_v4 = vpack.c.bf16 %v1722_v3, %v1718_v1  ;;  %v1724_v5 = vpop.f32.mrb[47].mxu0 }
 0x2f3   : > { %v1790_v6 = vpack.c.bf16 %v1724_v5, %v1720_v2 }
 0x2f5   : > { %2145 = vmatprep.mubr.bf16.mxu1 %v1790_v6 }
 0x2f6   : > { %2146 = vmatmul.mubr.bf16.gmra.mrb[44].mxu1 %v1789_v4 }
 0x2f7   : > { %v1728_v8 = vpop.f32.mrb[48].mxu0 }
 0x2f8   : > { %v1730_v10 = vpop.f32.mrb[49].mxu0 }
 0x2f9   : > { %v1732_v11 = vpop.f32.mrb[50].mxu0 }
 0x2fa   : > { %v1791_v12 = vpack.c.bf16 %v1732_v11, %v1728_v8  ;;  %v1734_v13 = vpop.f32.mrb[51].mxu0 }
 0x2fb   : > { %v1792_v14 = vpack.c.bf16 %v1734_v13, %v1730_v10 }
 0x2fd   : > { %2155 = vmatprep.mubr.bf16.mxu1 %v1792_v14 }
 0x2fe   : > { %2156 = vmatmul.mubr.bf16.gmra.mrb[48].mxu1 %v1791_v12 }
 0x2ff   : > { %v1738_v15 = vpop.f32.mrb[52].mxu0 }
 0x300   : > { %v1740_v16 = vpop.f32.mrb[53].mxu0 }
 0x301   : > { %v1742_v17 = vpop.f32.mrb[54].mxu0 }
 0x302   : > { %v1793_v18 = vpack.c.bf16 %v1742_v17, %v1738_v15  ;;  %v1744_v19 = vpop.f32.mrb[55].mxu0 }
 0x303   : > { %v1794_v20 = vpack.c.bf16 %v1744_v19, %v1740_v16 }
 0x305   : > { %2165 = vmatprep.mubr.bf16.mxu1 %v1794_v20 }
 0x306   : > { %2166 = vmatmul.mubr.bf16.gmra.mrb[52].mxu1 %v1793_v18 }
 0x307   : > { %v1748_v21 = vpop.f32.mrb[56].mxu0 }
 0x308   : > { %v1750_v22 = vpop.f32.mrb[57].mxu0 }
 0x309   : > { %v1752_v23 = vpop.f32.mrb[58].mxu0 }
 0x30a   : > { %v1795_v24 = vpack.c.bf16 %v1752_v23, %v1748_v21  ;;  %v1754_v25 = vpop.f32.mrb[59].mxu0 }
 0x30b   : > { %v1796_v26 = vpack.c.bf16 %v1754_v25, %v1750_v22 }
 0x30d   : > { %2175 = vmatprep.mubr.bf16.mxu1 %v1796_v26 }
 0x30e   : > { %2176 = vmatmul.mubr.bf16.gmra.mrb[56].mxu1 %v1795_v24 }
 0x30f   : > { %v1758_v27 = vpop.f32.mrb[60].mxu0 }
 0x310   : > { %v1760_v28 = vpop.f32.mrb[61].mxu0 }
 0x311   : > { %v1762_v29 = vpop.f32.mrb[62].mxu0 }
 0x312   : > { %v1797_v30 = vpack.c.bf16 %v1762_v29, %v1758_v27  ;;  %v1764_v31 = vpop.f32.mrb[63].mxu0 }
 0x313   : > { %v1798_v32 = vpack.c.bf16 %v1764_v31, %v1760_v28 }
 0x315   : > { %2185 = vmatprep.mubr.bf16.mxu1 %v1798_v32 }
 0x316   : > { %2186 = vmatmul.mubr.bf16.gmra.mrb[60].mxu1 %v1797_v30 }
 0x371   : > { %v2037_v40 = vpop.f32.mrb[0].mxu1 }
 0x372   : > { %v2038_v41 = vadd.f32 %v2037_v40, %v5409_v38  ;;  %v2039_v42 = vpop.f32.mrb[1].mxu1 }
 0x373   : > { %v2040_v43 = vadd.f32 %v2039_v42, %v5412_v39  ;;  %v2041_v44 = vpop.f32.mrb[2].mxu1 }
 0x374   : > { %v2042_v45 = vadd.f32 %v2041_v44, %v5409_v38  ;;  %v2043_v46 = vpop.f32.mrb[3].mxu1  ;;  %v2196_v48 = vmax.f32 %v2038_v41, 0.0 }
 0x375   : > { %v2044_v47 = vadd.f32 %v2043_v46, %v5412_v39  ;;  %v2197_v50 = vmax.f32 %v2040_v43, 0.0 }
 0x376   : > { %v2198_v49 = vmax.f32 %v2042_v45, 0.0 }
 0x377   : > { %v2199_v51 = vmax.f32 %v2044_v47, 0.0 }
 0x378   : > { %v2260_v52 = vpack.c.bf16 %v2198_v49, %v2196_v48 }
 0x379   : > { %v2261_v53 = vpack.c.bf16 %v2199_v51, %v2197_v50  ;;  %v2047_v54 = vpop.f32.mrb[4].mxu1 }
 0x37a   : > { %v2048_v55 = vadd.f32 %v2047_v54, %v5409_v38  ;;  %v2049_v56 = vpop.f32.mrb[5].mxu1 }
 0x37b   : > { %v2050_v57 = vadd.f32 %v2049_v56, %v5412_v39  ;;  %v2051_v58 = vpop.f32.mrb[6].mxu1  ;;  %2528 = vmatprep.mubr.bf16.mxu1 %v2261_v53 }
 0x37c   : > { %v2052_v59 = vadd.f32 %v2051_v58, %v5409_v38  ;;  %v2053_v60 = vpop.f32.mrb[7].mxu1  ;;  %2529 = vmatmul.mubr.bf16.vlgmr.msra.gmra.mrb[64].mxu1 %v2260_v52  ;;  %v2200_v62 = vmax.f32 %v2048_v55, 0.0 }
 0x37d   : > { %v2054_v61 = vadd.f32 %v2053_v60, %v5412_v39  ;;  %v2201_v0 = vmax.f32 %v2050_v57, 0.0 }
 0x37e   : > { %v2202_v63 = vmax.f32 %v2052_v59, 0.0 }
 0x37f   : > { %v2203_v1 = vmax.f32 %v2054_v61, 0.0 }
 0x380   : > { %v2262_v2 = vpack.c.bf16 %v2202_v63, %v2200_v62 }
 0x381   : > { %v2263_v3 = vpack.c.bf16 %v2203_v1, %v2201_v0  ;;  %v2057_v4 = vpop.f32.mrb[8].mxu1 }
 0x382   : > { %v2058_v5 = vadd.f32 %v2057_v4, %v5409_v38  ;;  %v2059_v6 = vpop.f32.mrb[9].mxu1 }
 0x383   : > { %v2060_v7 = vadd.f32 %v2059_v6, %v5412_v39  ;;  %v2061_v8 = vpop.f32.mrb[10].mxu1  ;;  %2538 = vmatprep.mubr.bf16.mxu1 %v2263_v3 }
 0x384   : > { %v2062_v9 = vadd.f32 %v2061_v8, %v5409_v38  ;;  %v2063_v10 = vpop.f32.mrb[11].mxu1  ;;  %2539 = vmatmul.mubr.bf16.gmra.mrb[68].mxu1 %v2262_v2  ;;  %v2204_v12 = vmax.f32 %v2058_v5, 0.0 }
 0x385   : > { %v2064_v11 = vadd.f32 %v2063_v10, %v5412_v39  ;;  %v2205_v14 = vmax.f32 %v2060_v7, 0.0 }
 0x386   : > { %v2206_v13 = vmax.f32 %v2062_v9, 0.0 }
 0x387   : > { %v2207_v15 = vmax.f32 %v2064_v11, 0.0 }
 0x388   : > { %v2264_v16 = vpack.c.bf16 %v2206_v13, %v2204_v12 }
 0x389   : > { %v2265_v17 = vpack.c.bf16 %v2207_v15, %v2205_v14  ;;  %v2067_v18 = vpop.f32.mrb[12].mxu1 }
 0x38a   : > { %v2068_v19 = vadd.f32 %v2067_v18, %v5409_v38  ;;  %v2069_v20 = vpop.f32.mrb[13].mxu1 }
 0x38b   : > { %v2070_v21 = vadd.f32 %v2069_v20, %v5412_v39  ;;  %v2071_v22 = vpop.f32.mrb[14].mxu1  ;;  %2548 = vmatprep.mubr.bf16.mxu1 %v2265_v17 }
 0x38c   : > { %v2072_v23 = vadd.f32 %v2071_v22, %v5409_v38  ;;  %v2073_v24 = vpop.f32.mrb[15].mxu1  ;;  %2549 = vmatmul.mubr.bf16.gmra.mrb[72].mxu1 %v2264_v16  ;;  %v2208_v26 = vmax.f32 %v2068_v19, 0.0 }
 0x38d   : > { %v2074_v25 = vadd.f32 %v2073_v24, %v5412_v39  ;;  %v2209_v28 = vmax.f32 %v2070_v21, 0.0 }
 0x38e   : > { %v2210_v27 = vmax.f32 %v2072_v23, 0.0 }
 0x38f   : > { %v2211_v29 = vmax.f32 %v2074_v25, 0.0 }
 0x390   : > { %v2266_v30 = vpack.c.bf16 %v2210_v27, %v2208_v26 }
 0x391   : > { %v2267_v31 = vpack.c.bf16 %v2211_v29, %v2209_v28  ;;  %v2077_v32 = vpop.f32.mrb[16].mxu1 }
 0x392   : > { %v2078_v33 = vadd.f32 %v2077_v32, %v5409_v38  ;;  %v2079_v34 = vpop.f32.mrb[17].mxu1 }
 0x393   : > { %v2080_v36 = vadd.f32 %v2079_v34, %v5412_v39  ;;  %v2081_v40 = vpop.f32.mrb[18].mxu1  ;;  %2558 = vmatprep.mubr.bf16.mxu1 %v2267_v31 }
 0x394   : > { %v2082_v41 = vadd.f32 %v2081_v40, %v5409_v38  ;;  %v2083_v42 = vpop.f32.mrb[19].mxu1  ;;  %2559 = vmatmul.mubr.bf16.gmra.mrb[76].mxu1 %v2266_v30  ;;  %v2212_v44 = vmax.f32 %v2078_v33, 0.0 }
 0x395   : > { %v2084_v43 = vadd.f32 %v2083_v42, %v5412_v39  ;;  %v2213_v46 = vmax.f32 %v2080_v36, 0.0 }
 0x396   : > { %v2214_v45 = vmax.f32 %v2082_v41, 0.0 }
 0x397   : > { %v2215_v47 = vmax.f32 %v2084_v43, 0.0 }
 0x398   : > { %v2268_v48 = vpack.c.bf16 %v2214_v45, %v2212_v44 }
 0x399   : > { %v2269_v49 = vpack.c.bf16 %v2215_v47, %v2213_v46  ;;  %v2087_v50 = vpop.f32.mrb[20].mxu1 }
 0x39a   : > { %v2088_v51 = vadd.f32 %v2087_v50, %v5409_v38  ;;  %v2089_v52 = vpop.f32.mrb[21].mxu1 }
 0x39b   : > { %v2090_v53 = vadd.f32 %v2089_v52, %v5412_v39  ;;  %v2091_v54 = vpop.f32.mrb[22].mxu1  ;;  %2568 = vmatprep.mubr.bf16.mxu1 %v2269_v49 }
 0x39c   : > { %v2092_v55 = vadd.f32 %v2091_v54, %v5409_v38  ;;  %v2093_v56 = vpop.f32.mrb[23].mxu1  ;;  %2569 = vmatmul.mubr.bf16.gmra.mrb[80].mxu1 %v2268_v48  ;;  %v2216_v58 = vmax.f32 %v2088_v51, 0.0 }
 0x39d   : > { %v2094_v57 = vadd.f32 %v2093_v56, %v5412_v39  ;;  %v2217_v60 = vmax.f32 %v2090_v53, 0.0 }
 0x39e   : > { %v2218_v59 = vmax.f32 %v2092_v55, 0.0 }
 0x39f   : > { %v2219_v61 = vmax.f32 %v2094_v57, 0.0 }
 0x3a0   : > { %v2270_v62 = vpack.c.bf16 %v2218_v59, %v2216_v58 }
 0x3a1   : > { %v2271_v63 = vpack.c.bf16 %v2219_v61, %v2217_v60  ;;  %v2097_v0 = vpop.f32.mrb[24].mxu1 }
 0x3a2   : > { %v2098_v1 = vadd.f32 %v2097_v0, %v5409_v38  ;;  %v2099_v2 = vpop.f32.mrb[25].mxu1 }
 0x3a3   : > { %v2100_v3 = vadd.f32 %v2099_v2, %v5412_v39  ;;  %v2101_v4 = vpop.f32.mrb[26].mxu1  ;;  %2578 = vmatprep.mubr.bf16.mxu1 %v2271_v63 }
 0x3a4   : > { %v2102_v5 = vadd.f32 %v2101_v4, %v5409_v38  ;;  %v2103_v6 = vpop.f32.mrb[27].mxu1  ;;  %2579 = vmatmul.mubr.bf16.gmra.mrb[84].mxu1 %v2270_v62  ;;  %v2220_v8 = vmax.f32 %v2098_v1, 0.0 }
 0x3a5   : > { %v2104_v7 = vadd.f32 %v2103_v6, %v5412_v39  ;;  %v2221_v10 = vmax.f32 %v2100_v3, 0.0 }
 0x3a6   : > { %v2222_v9 = vmax.f32 %v2102_v5, 0.0 }
 0x3a7   : > { %v2223_v11 = vmax.f32 %v2104_v7, 0.0 }
 0x3a8   : > { %v2272_v12 = vpack.c.bf16 %v2222_v9, %v2220_v8 }
 0x3a9   : > { %v2273_v13 = vpack.c.bf16 %v2223_v11, %v2221_v10  ;;  %v2107_v14 = vpop.f32.mrb[28].mxu1 }
 0x3aa   : > { %v2108_v15 = vadd.f32 %v2107_v14, %v5409_v38  ;;  %v2109_v16 = vpop.f32.mrb[29].mxu1 }
 0x3ab   : > { %v2110_v17 = vadd.f32 %v2109_v16, %v5412_v39  ;;  %v2111_v18 = vpop.f32.mrb[30].mxu1  ;;  %2588 = vmatprep.mubr.bf16.mxu1 %v2273_v13 }
 0x3ac   : > { %v2112_v19 = vadd.f32 %v2111_v18, %v5409_v38  ;;  %v2113_v20 = vpop.f32.mrb[31].mxu1  ;;  %2589 = vmatmul.mubr.bf16.gmra.mrb[88].mxu1 %v2272_v12  ;;  %v2224_v22 = vmax.f32 %v2108_v15, 0.0 }
 0x3ad   : > { %v2114_v21 = vadd.f32 %v2113_v20, %v5412_v39  ;;  %v2225_v24 = vmax.f32 %v2110_v17, 0.0 }
 0x3ae   : > { %v2226_v23 = vmax.f32 %v2112_v19, 0.0 }
 0x3af   : > { %v2227_v25 = vmax.f32 %v2114_v21, 0.0 }
 0x3b0   : > { %v2274_v26 = vpack.c.bf16 %v2226_v23, %v2224_v22 }
 0x3b1   : > { %v2275_v27 = vpack.c.bf16 %v2227_v25, %v2225_v24  ;;  %v2117_v28 = vpop.f32.mrb[32].mxu1 }
 0x3b2   : > { %v2118_v29 = vadd.f32 %v2117_v28, %v5409_v38  ;;  %v2119_v30 = vpop.f32.mrb[33].mxu1 }
 0x3b3   : > { %v2120_v31 = vadd.f32 %v2119_v30, %v5412_v39  ;;  %v2121_v32 = vpop.f32.mrb[34].mxu1  ;;  %2598 = vmatprep.mubr.bf16.mxu1 %v2275_v27 }
 0x3b4   : > { %v2122_v33 = vadd.f32 %v2121_v32, %v5409_v38  ;;  %v2123_v34 = vpop.f32.mrb[35].mxu1  ;;  %2599 = vmatmul.mubr.bf16.gmra.mrb[92].mxu1 %v2274_v26  ;;  %v2228_v40 = vmax.f32 %v2118_v29, 0.0 }
 0x3b5   : > { %v2124_v36 = vadd.f32 %v2123_v34, %v5412_v39  ;;  %v2229_v42 = vmax.f32 %v2120_v31, 0.0 }
 0x3b6   : > { %v2230_v41 = vmax.f32 %v2122_v33, 0.0 }
 0x3b7   : > { %v2231_v43 = vmax.f32 %v2124_v36, 0.0 }
 0x3b8   : > { %v2276_v44 = vpack.c.bf16 %v2230_v41, %v2228_v40 }
 0x3b9   : > { %v2277_v45 = vpack.c.bf16 %v2231_v43, %v2229_v42  ;;  %v2127_v46 = vpop.f32.mrb[36].mxu1 }
 0x3ba   : > { %v2128_v47 = vadd.f32 %v2127_v46, %v5409_v38  ;;  %v2129_v48 = vpop.f32.mrb[37].mxu1 }
 0x3bb   : > { %v2130_v49 = vadd.f32 %v2129_v48, %v5412_v39  ;;  %v2131_v50 = vpop.f32.mrb[38].mxu1  ;;  %2608 = vmatprep.mubr.bf16.mxu1 %v2277_v45 }
 0x3bc   : > { %v2132_v51 = vadd.f32 %v2131_v50, %v5409_v38  ;;  %v2133_v52 = vpop.f32.mrb[39].mxu1  ;;  %2609 = vmatmul.mubr.bf16.gmra.mrb[96].mxu1 %v2276_v44  ;;  %v2232_v54 = vmax.f32 %v2128_v47, 0.0 }
 0x3bd   : > { %v2134_v53 = vadd.f32 %v2133_v52, %v5412_v39  ;;  %v2233_v56 = vmax.f32 %v2130_v49, 0.0 }
 0x3be   : > { %v2234_v55 = vmax.f32 %v2132_v51, 0.0 }
 0x3bf   : > { %v2235_v57 = vmax.f32 %v2134_v53, 0.0 }
 0x3c0   : > { %v2278_v58 = vpack.c.bf16 %v2234_v55, %v2232_v54 }
 0x3c1   : > { %v2279_v59 = vpack.c.bf16 %v2235_v57, %v2233_v56  ;;  %v2137_v60 = vpop.f32.mrb[40].mxu1 }
 0x3c2   : > { %v2138_v61 = vadd.f32 %v2137_v60, %v5409_v38  ;;  %v2139_v62 = vpop.f32.mrb[41].mxu1 }
 0x3c3   : > { %v2140_v63 = vadd.f32 %v2139_v62, %v5412_v39  ;;  %v2141_v0 = vpop.f32.mrb[42].mxu1  ;;  %2618 = vmatprep.mubr.bf16.mxu1 %v2279_v59 }
 0x3c4   : > { %v2142_v1 = vadd.f32 %v2141_v0, %v5409_v38  ;;  %v2143_v2 = vpop.f32.mrb[43].mxu1  ;;  %2619 = vmatmul.mubr.bf16.gmra.mrb[100].mxu1 %v2278_v58  ;;  %v2236_v4 = vmax.f32 %v2138_v61, 0.0 }
 0x3c5   : > { %v2144_v3 = vadd.f32 %v2143_v2, %v5412_v39  ;;  %v2237_v6 = vmax.f32 %v2140_v63, 0.0 }
 0x3c6   : > { %v2238_v5 = vmax.f32 %v2142_v1, 0.0 }
 0x3c7   : > { %v2239_v7 = vmax.f32 %v2144_v3, 0.0 }
 0x3c8   : > { %v2280_v8 = vpack.c.bf16 %v2238_v5, %v2236_v4 }
 0x3c9   : > { %v2281_v9 = vpack.c.bf16 %v2239_v7, %v2237_v6  ;;  %v2147_v10 = vpop.f32.mrb[44].mxu1 }
 0x3ca   : > { %v2148_v11 = vadd.f32 %v2147_v10, %v5409_v38  ;;  %v2149_v12 = vpop.f32.mrb[45].mxu1 }
 0x3cb   : > { %v2150_v13 = vadd.f32 %v2149_v12, %v5412_v39  ;;  %v2151_v14 = vpop.f32.mrb[46].mxu1  ;;  %2628 = vmatprep.mubr.bf16.mxu1 %v2281_v9 }
 0x3cc   : > { %v2152_v15 = vadd.f32 %v2151_v14, %v5409_v38  ;;  %v2153_v16 = vpop.f32.mrb[47].mxu1  ;;  %2629 = vmatmul.mubr.bf16.gmra.mrb[104].mxu1 %v2280_v8  ;;  %v2240_v18 = vmax.f32 %v2148_v11, 0.0 }
 0x3cd   : > { %v2154_v17 = vadd.f32 %v2153_v16, %v5412_v39  ;;  %v2241_v20 = vmax.f32 %v2150_v13, 0.0 }
 0x3ce   : > { %v2242_v19 = vmax.f32 %v2152_v15, 0.0 }
 0x3cf   : > { %v2243_v21 = vmax.f32 %v2154_v17, 0.0 }
 0x3d0   : > { %v2282_v22 = vpack.c.bf16 %v2242_v19, %v2240_v18 }
 0x3d1   : > { %v2283_v23 = vpack.c.bf16 %v2243_v21, %v2241_v20  ;;  %v2157_v24 = vpop.f32.mrb[48].mxu1  ;;  %v2324_v20 = vld [vmem:[%s663_s18] sm:$0x3] }
 0x3d2   : > { %v2158_v25 = vadd.f32 %v2157_v24, %v5409_v38  ;;  %v2159_v26 = vpop.f32.mrb[49].mxu1  ;;  %v5484_v21 = vrot.slane %v2324_v20, %v5406_v37 }
 0x3d3   : > { %v2160_v27 = vadd.f32 %v2159_v26, %v5412_v39  ;;  %v2161_v28 = vpop.f32.mrb[50].mxu1  ;;  %2638 = vmatprep.mubr.bf16.mxu1 %v2283_v23 }
 0x3d4   : > { %v2162_v29 = vadd.f32 %v2161_v28, %v5409_v38  ;;  %v2163_v30 = vpop.f32.mrb[51].mxu1  ;;  %2639 = vmatmul.mubr.bf16.gmra.mrb[108].mxu1 %v2282_v22  ;;  %v2244_v32 = vmax.f32 %v2158_v25, 0.0  ;;  %v2690_v25 = vld [vmem:[%s6820_s23 + $0x8] sm:$0xff] }
 0x3d5   : > { %v2164_v31 = vadd.f32 %v2163_v30, %v5412_v39  ;;  %v2245_v34 = vmax.f32 %v2160_v27, 0.0  ;;  %2755 = vmatprep.mubr.f32.mxu0 %v2690_v25 }
 0x3d6   : > { %v2246_v33 = vmax.f32 %v2162_v29, 0.0 }
 0x3d7   : > { %v2247_v36 = vmax.f32 %v2164_v31, 0.0 }
 0x3d8   : > { %v2284_v40 = vpack.c.bf16 %v2246_v33, %v2244_v32 }
 0x3d9   : > { %v2285_v41 = vpack.c.bf16 %v2247_v36, %v2245_v34  ;;  %v2167_v42 = vpop.f32.mrb[52].mxu1 }
 0x3da   : > { %v2168_v43 = vadd.f32 %v2167_v42, %v5409_v38  ;;  %v2169_v44 = vpop.f32.mrb[53].mxu1 }
 0x3db   : > { %v2170_v45 = vadd.f32 %v2169_v44, %v5412_v39  ;;  %v2171_v46 = vpop.f32.mrb[54].mxu1  ;;  %2648 = vmatprep.mubr.bf16.mxu1 %v2285_v41 }
 0x3dc   : > { %v2172_v47 = vadd.f32 %v2171_v46, %v5409_v38  ;;  %v2173_v48 = vpop.f32.mrb[55].mxu1  ;;  %2649 = vmatmul.mubr.bf16.gmra.mrb[112].mxu1 %v2284_v40  ;;  %v2248_v50 = vmax.f32 %v2168_v43, 0.0 }
 0x3dd   : > { %v2174_v49 = vadd.f32 %v2173_v48, %v5412_v39  ;;  %v2249_v52 = vmax.f32 %v2170_v45, 0.0 }
 0x3de   : > { %v2250_v51 = vmax.f32 %v2172_v47, 0.0 }
 0x3df   : > { %v2251_v53 = vmax.f32 %v2174_v49, 0.0 }
 0x3e0   : > { %v2286_v54 = vpack.c.bf16 %v2250_v51, %v2248_v50 }
 0x3e1   : > { %v2287_v55 = vpack.c.bf16 %v2251_v53, %v2249_v52  ;;  %v2177_v56 = vpop.f32.mrb[56].mxu1 }
 0x3e2   : > { %v2178_v57 = vadd.f32 %v2177_v56, %v5409_v38  ;;  %v2179_v58 = vpop.f32.mrb[57].mxu1 }
 0x3e3   : > { %v2180_v59 = vadd.f32 %v2179_v58, %v5412_v39  ;;  %v2181_v60 = vpop.f32.mrb[58].mxu1  ;;  %2658 = vmatprep.mubr.bf16.mxu1 %v2287_v55 }
 0x3e4   : > { %v2182_v61 = vadd.f32 %v2181_v60, %v5409_v38  ;;  %v2183_v62 = vpop.f32.mrb[59].mxu1  ;;  %2659 = vmatmul.mubr.bf16.gmra.mrb[116].mxu1 %v2286_v54  ;;  %v2252_v0 = vmax.f32 %v2178_v57, 0.0 }
 0x3e5   : > { %v2184_v63 = vadd.f32 %v2183_v62, %v5412_v39  ;;  %v2253_v2 = vmax.f32 %v2180_v59, 0.0 }
 0x3e6   : > { %v2254_v1 = vmax.f32 %v2182_v61, 0.0 }
 0x3e7   : > { %v2255_v3 = vmax.f32 %v2184_v63, 0.0 }
 0x3e8   : > { %v2288_v4 = vpack.c.bf16 %v2254_v1, %v2252_v0 }
 0x3e9   : > { %v2289_v5 = vpack.c.bf16 %v2255_v3, %v2253_v2  ;;  %v2187_v6 = vpop.f32.mrb[60].mxu1 }
 0x3ea   : > { %v2188_v7 = vadd.f32 %v2187_v6, %v5409_v38  ;;  %v2189_v8 = vpop.f32.mrb[61].mxu1 }
 0x3eb   : > { %v2190_v9 = vadd.f32 %v2189_v8, %v5412_v39  ;;  %v2191_v10 = vpop.f32.mrb[62].mxu1  ;;  %2668 = vmatprep.mubr.bf16.mxu1 %v2289_v5 }
 0x3ec   : > { %v2192_v11 = vadd.f32 %v2191_v10, %v5409_v38  ;;  %v2193_v12 = vpop.f32.mrb[63].mxu1  ;;  %2669 = vmatmul.mubr.bf16.gmra.mrb[120].mxu1 %v2288_v4  ;;  %v2256_v14 = vmax.f32 %v2188_v7, 0.0  ;;  %v5487_v38 = vrot.slane %v2324_v20, %v5399_v35 }
 0x3ed   : > { %v2194_v13 = vadd.f32 %v2193_v12, %v5412_v39  ;;  %v2257_v16 = vmax.f32 %v2190_v9, 0.0 }
 0x3ee   : > { %v2258_v15 = vmax.f32 %v2192_v11, 0.0 }
 0x3ef   : > { %v2259_v17 = vmax.f32 %v2194_v13, 0.0 }
 0x3f0   : > { %v2290_v18 = vpack.c.bf16 %v2258_v15, %v2256_v14 }
 0x3f1   : > { %v2291_v19 = vpack.c.bf16 %v2259_v17, %v2257_v16 }
 0x3f3   : > { %2678 = vmatprep.mubr.bf16.mxu1 %v2291_v19 }
 0x3f4   : > { %2679 = vmatmul.mubr.bf16.gmra.mrb[124].mxu1 %v2290_v18 }
 0x3f5   : > { %2890 = vmatprep.mubr.f32.mxu1 %v2690_v25 }
 0x44f   : > { %v2530_v39 = vpop.f32.mrb[64].mxu1 }
 0x450   : > { %v2532_v22 = vpop.f32.mrb[65].mxu1  ;;  %v5496_v26 = vadd.f32 %v2530_v39, %v5487_v38 }
 0x451   : > { %v5490_v23 = vadd.f32 %v2532_v22, %v5484_v21  ;;  %v2534_v24 = vpop.f32.mrb[66].mxu1 }
 0x452   : > { %v5499_v27 = vadd.f32 %v2534_v24, %v5487_v38  ;;  %v2536_v28 = vpop.f32.mrb[67].mxu1  ;;  %v2762_v34 = vmul.f32 %v5496_v26, %v5496_v26 }
 0x453   : > { %v5502_v29 = vadd.f32 %v2536_v28, %v5484_v21  ;;  %v2763_v31 = vmul.f32 %v5490_v23, %v5490_v23 }
 0x454   : > { %v2764_v30 = vmul.f32 %v5499_v27, %v5499_v27  ;;  %v4046_v36 = vpack.c.bf16 %v5499_v27, %v5496_v26 }
 0x455   : > { %v2765_v32 = vmul.f32 %v5502_v29, %v5502_v29  ;;  %v4044_v33 = vpack.c.bf16 %v5502_v29, %v5490_v23 }
 0x456   : > { %v4110_v42 = vpack.c.bf16 %v2764_v30, %v2762_v34 }
 0x457   : > { %v2540_v40 = vpop.f32.mrb[68].mxu1  ;;  %4045 = vmatprep.subr.bf16.mxu0 %v4044_v33  ;;  %v4108_v41 = vpack.c.bf16 %v2765_v32, %v2763_v31 }
 0x458   : > { %v2542_v43 = vpop.f32.mrb[69].mxu1  ;;  %4047 = vmatpush1.bf16.msra.mxu0 %v4046_v36  ;;  %v5520_v46 = vadd.f32 %v2540_v40, %v5487_v38 }
 0x459   : > { %v5517_v44 = vadd.f32 %v2542_v43, %v5484_v21  ;;  %v2544_v45 = vpop.f32.mrb[70].mxu1  ;;  %4109 = vmatprep.subr.bf16.mxu1 %v4108_v41 }
 0x45a   : > { %v5523_v47 = vadd.f32 %v2544_v45, %v5487_v38  ;;  %v2546_v48 = vpop.f32.mrb[71].mxu1  ;;  %4111 = vmatpush1.bf16.msra.mxu1 %v4110_v42  ;;  %v2766_v54 = vmul.f32 %v5520_v46, %v5520_v46 }
 0x45b   : > { %v5526_v49 = vadd.f32 %v2546_v48, %v5484_v21  ;;  %v2767_v51 = vmul.f32 %v5517_v44, %v5517_v44 }
 0x45c   : > { %v2768_v50 = vmul.f32 %v5523_v47, %v5523_v47  ;;  %v4050_v55 = vpack.c.bf16 %v5523_v47, %v5520_v46 }
 0x45d   : > { %v2769_v52 = vmul.f32 %v5526_v49, %v5526_v49  ;;  %v4048_v53 = vpack.c.bf16 %v5526_v49, %v5517_v44 }
 0x45e   : > { %v4114_v58 = vpack.c.bf16 %v2768_v50, %v2766_v54 }
 0x45f   : > { %v2550_v56 = vpop.f32.mrb[72].mxu1  ;;  %4049 = vmatprep.subr.bf16.mxu0 %v4048_v53  ;;  %v4112_v57 = vpack.c.bf16 %v2769_v52, %v2767_v51 }
 0x460   : > { %v2552_v59 = vpop.f32.mrb[73].mxu1  ;;  %4051 = vmatpush1.bf16.msra.mxu0 %v4050_v55  ;;  %v5544_v62 = vadd.f32 %v2550_v56, %v5487_v38 }
 0x461   : > { %v5541_v60 = vadd.f32 %v2552_v59, %v5484_v21  ;;  %v2554_v61 = vpop.f32.mrb[74].mxu1  ;;  %4113 = vmatprep.subr.bf16.mxu1 %v4112_v57 }
 0x462   : > { %v5547_v63 = vadd.f32 %v2554_v61, %v5487_v38  ;;  %v2556_v0 = vpop.f32.mrb[75].mxu1  ;;  %4115 = vmatpush1.bf16.msra.mxu1 %v4114_v58  ;;  %v2770_v6 = vmul.f32 %v5544_v62, %v5544_v62 }
 0x463   : > { %v5550_v1 = vadd.f32 %v2556_v0, %v5484_v21  ;;  %v2771_v3 = vmul.f32 %v5541_v60, %v5541_v60 }
 0x464   : > { %v2772_v2 = vmul.f32 %v5547_v63, %v5547_v63  ;;  %v4054_v7 = vpack.c.bf16 %v5547_v63, %v5544_v62 }
 0x465   : > { %v2773_v4 = vmul.f32 %v5550_v1, %v5550_v1  ;;  %v4052_v5 = vpack.c.bf16 %v5550_v1, %v5541_v60 }
 0x466   : > { %v4118_v10 = vpack.c.bf16 %v2772_v2, %v2770_v6 }
 0x467   : > { %v2560_v8 = vpop.f32.mrb[76].mxu1  ;;  %4053 = vmatprep.subr.bf16.mxu0 %v4052_v5  ;;  %v4116_v9 = vpack.c.bf16 %v2773_v4, %v2771_v3 }
 0x468   : > { %v2562_v11 = vpop.f32.mrb[77].mxu1  ;;  %4055 = vmatpush1.bf16.msra.mxu0 %v4054_v7  ;;  %v5568_v14 = vadd.f32 %v2560_v8, %v5487_v38 }
 0x469   : > { %v5565_v12 = vadd.f32 %v2562_v11, %v5484_v21  ;;  %v2564_v13 = vpop.f32.mrb[78].mxu1  ;;  %4117 = vmatprep.subr.bf16.mxu1 %v4116_v9 }
 0x46a   : > { %v5571_v15 = vadd.f32 %v2564_v13, %v5487_v38  ;;  %v2566_v16 = vpop.f32.mrb[79].mxu1  ;;  %4119 = vmatpush1.bf16.msra.mxu1 %v4118_v10  ;;  %v2774_v22 = vmul.f32 %v5568_v14, %v5568_v14 }
 0x46b   : > { %v5574_v17 = vadd.f32 %v2566_v16, %v5484_v21  ;;  %v2775_v19 = vmul.f32 %v5565_v12, %v5565_v12 }
 0x46c   : > { %v2776_v18 = vmul.f32 %v5571_v15, %v5571_v15  ;;  %v4058_v24 = vpack.c.bf16 %v5571_v15, %v5568_v14 }
 0x46d   : > { %v2777_v20 = vmul.f32 %v5574_v17, %v5574_v17  ;;  %v4056_v39 = vpack.c.bf16 %v5574_v17, %v5565_v12 }
 0x46e   : > { %v4122_v30 = vpack.c.bf16 %v2776_v18, %v2774_v22 }
 0x46f   : > { %v2570_v25 = vpop.f32.mrb[80].mxu1  ;;  %4057 = vmatprep.subr.bf16.mxu0 %v4056_v39  ;;  %v4120_v28 = vpack.c.bf16 %v2777_v20, %v2775_v19 }
 0x470   : > { %v2572_v31 = vpop.f32.mrb[81].mxu1  ;;  %4059 = vmatpush1.bf16.msra.mxu0 %v4058_v24  ;;  %v5592_v34 = vadd.f32 %v2570_v25, %v5487_v38 }
 0x471   : > { %v5589_v32 = vadd.f32 %v2572_v31, %v5484_v21  ;;  %v2574_v33 = vpop.f32.mrb[82].mxu1  ;;  %4121 = vmatprep.subr.bf16.mxu1 %v4120_v28 }
 0x472   : > { %v5595_v36 = vadd.f32 %v2574_v33, %v5487_v38  ;;  %v2576_v40 = vpop.f32.mrb[83].mxu1  ;;  %4123 = vmatpush1.bf16.msra.mxu1 %v4122_v30  ;;  %v2778_v50 = vmul.f32 %v5592_v34, %v5592_v34 }
 0x473   : > { %v5598_v41 = vadd.f32 %v2576_v40, %v5484_v21  ;;  %v2779_v43 = vmul.f32 %v5589_v32, %v5589_v32 }
 0x474   : > { %v2780_v42 = vmul.f32 %v5595_v36, %v5595_v36  ;;  %v4062_v51 = vpack.c.bf16 %v5595_v36, %v5592_v34 }
 0x475   : > { %v2781_v45 = vmul.f32 %v5598_v41, %v5598_v41  ;;  %v4060_v48 = vpack.c.bf16 %v5598_v41, %v5589_v32 }
 0x476   : > { %v4126_v54 = vpack.c.bf16 %v2780_v42, %v2778_v50 }
 0x477   : > { %v2580_v52 = vpop.f32.mrb[84].mxu1  ;;  %4061 = vmatprep.subr.bf16.mxu0 %v4060_v48  ;;  %v4124_v53 = vpack.c.bf16 %v2781_v45, %v2779_v43 }
 0x478   : > { %v2582_v55 = vpop.f32.mrb[85].mxu1  ;;  %4063 = vmatpush1.bf16.msra.mxu0 %v4062_v51  ;;  %v5616_v58 = vadd.f32 %v2580_v52, %v5487_v38 }
 0x479   : > { %v5613_v56 = vadd.f32 %v2582_v55, %v5484_v21  ;;  %v2584_v57 = vpop.f32.mrb[86].mxu1  ;;  %4125 = vmatprep.subr.bf16.mxu1 %v4124_v53 }
 0x47a   : > { %v5619_v59 = vadd.f32 %v2584_v57, %v5487_v38  ;;  %v2586_v61 = vpop.f32.mrb[87].mxu1  ;;  %4127 = vmatpush1.bf16.msra.mxu1 %v4126_v54  ;;  %v2782_v6 = vmul.f32 %v5616_v58, %v5616_v58 }
 0x47b   : > { %v5622_v0 = vadd.f32 %v2586_v61, %v5484_v21  ;;  %v2783_v3 = vmul.f32 %v5613_v56, %v5613_v56 }
 0x47c   : > { %v2784_v2 = vmul.f32 %v5619_v59, %v5619_v59  ;;  %v4066_v7 = vpack.c.bf16 %v5619_v59, %v5616_v58 }
 0x47d   : > { %6821 = vst [vmem:[#allocation22_spill] sm:$0xff] %v5622_v0  ;;  %v2785_v4 = vmul.f32 %v5622_v0, %v5622_v0  ;;  %v4064_v5 = vpack.c.bf16 %v5622_v0, %v5613_v56 }
 0x47e   : > { %v4130_v10 = vpack.c.bf16 %v2784_v2, %v2782_v6 }
 0x47f   : > { %v2590_v8 = vpop.f32.mrb[88].mxu1  ;;  %4065 = vmatprep.subr.bf16.mxu0 %v4064_v5  ;;  %v4128_v9 = vpack.c.bf16 %v2785_v4, %v2783_v3 }
 0x480   : > { %v2592_v11 = vpop.f32.mrb[89].mxu1  ;;  %4067 = vmatpush1.bf16.msra.mxu0 %v4066_v7  ;;  %v5640_v18 = vadd.f32 %v2590_v8, %v5487_v38 }
 0x481   : > { %v5637_v13 = vadd.f32 %v2592_v11, %v5484_v21  ;;  %v2594_v16 = vpop.f32.mrb[90].mxu1  ;;  %4129 = vmatprep.subr.bf16.mxu1 %v4128_v9 }
 0x482   : > { %v5643_v19 = vadd.f32 %v2594_v16, %v5487_v38  ;;  %v2596_v20 = vpop.f32.mrb[91].mxu1  ;;  %4131 = vmatpush1.bf16.msra.mxu1 %v4130_v10  ;;  %v2786_v30 = vmul.f32 %v5640_v18, %v5640_v18 }
 0x483   : > { %6822 = vst [vmem:[#allocation23_spill] sm:$0xff] %v5637_v13  ;;  %v5646_v39 = vadd.f32 %v2596_v20, %v5484_v21  ;;  %v2787_v24 = vmul.f32 %v5637_v13, %v5637_v13 }
 0x484   : > { %v2788_v22 = vmul.f32 %v5643_v19, %v5643_v19  ;;  %v4070_v31 = vpack.c.bf16 %v5643_v19, %v5640_v18 }
 0x485   : > { %6823 = vst [vmem:[#allocation24_spill] sm:$0xff] %v5646_v39  ;;  %v2789_v25 = vmul.f32 %v5646_v39, %v5646_v39  ;;  %v4068_v28 = vpack.c.bf16 %v5646_v39, %v5637_v13 }
 0x486   : > { %v4134_v42 = vpack.c.bf16 %v2788_v22, %v2786_v30 }
 0x487   : > { %v2600_v33 = vpop.f32.mrb[92].mxu1  ;;  %4069 = vmatprep.subr.bf16.mxu0 %v4068_v28  ;;  %v4132_v40 = vpack.c.bf16 %v2789_v25, %v2787_v24 }
 0x488   : > { %v2602_v43 = vpop.f32.mrb[93].mxu1  ;;  %4071 = vmatpush1.bf16.msra.mxu0 %v4070_v31  ;;  %v5664_v50 = vadd.f32 %v2600_v33, %v5487_v38 }
 0x489   : > { %v5661_v45 = vadd.f32 %v2602_v43, %v5484_v21  ;;  %v2604_v48 = vpop.f32.mrb[94].mxu1  ;;  %4133 = vmatprep.subr.bf16.mxu1 %v4132_v40 }
 0x48a   : > { %v5667_v51 = vadd.f32 %v2604_v48, %v5487_v38  ;;  %v2606_v52 = vpop.f32.mrb[95].mxu1  ;;  %4135 = vmatpush1.bf16.msra.mxu1 %v4134_v42  ;;  %v2790_v2 = vmul.f32 %v5664_v50, %v5664_v50 }
 0x48b   : > { %6824 = vst [vmem:[#allocation25_spill] sm:$0xff] %v5661_v45  ;;  %v5670_v53 = vadd.f32 %v2606_v52, %v5484_v21  ;;  %v2791_v55 = vmul.f32 %v5661_v45, %v5661_v45 }
 0x48c   : > { %v2792_v54 = vmul.f32 %v5667_v51, %v5667_v51  ;;  %v4074_v3 = vpack.c.bf16 %v5667_v51, %v5664_v50 }
 0x48d   : > { %6825 = vst [vmem:[#allocation26_spill] sm:$0xff] %v5670_v53  ;;  %v2793_v57 = vmul.f32 %v5670_v53, %v5670_v53  ;;  %v4072_v61 = vpack.c.bf16 %v5670_v53, %v5661_v45 }
 0x48e   : > { %v4138_v6 = vpack.c.bf16 %v2792_v54, %v2790_v2 }
 0x48f   : > { %v2610_v4 = vpop.f32.mrb[96].mxu1  ;;  %4073 = vmatprep.subr.bf16.mxu0 %v4072_v61  ;;  %v4136_v5 = vpack.c.bf16 %v2793_v57, %v2791_v55 }
 0x490   : > { %v2612_v7 = vpop.f32.mrb[97].mxu1  ;;  %4075 = vmatpush1.bf16.msra.mxu0 %v4074_v3  ;;  %v5688_v10 = vadd.f32 %v2610_v4, %v5487_v38 }
 0x491   : > { %v5685_v8 = vadd.f32 %v2612_v7, %v5484_v21  ;;  %v2614_v9 = vpop.f32.mrb[98].mxu1  ;;  %4137 = vmatprep.subr.bf16.mxu1 %v4136_v5 }
 0x492   : > { %v5691_v11 = vadd.f32 %v2614_v9, %v5487_v38  ;;  %v2616_v16 = vpop.f32.mrb[99].mxu1  ;;  %4139 = vmatpush1.bf16.msra.mxu1 %v4138_v6  ;;  %v2794_v30 = vmul.f32 %v5688_v10, %v5688_v10 }
 0x493   : > { %6826 = vst [vmem:[#allocation27_spill] sm:$0xff] %v5685_v8  ;;  %v5694_v20 = vadd.f32 %v2616_v16, %v5484_v21  ;;  %v2795_v24 = vmul.f32 %v5685_v8, %v5685_v8 }
 0x494   : > { %v2796_v22 = vmul.f32 %v5691_v11, %v5691_v11  ;;  %v4078_v31 = vpack.c.bf16 %v5691_v11, %v5688_v10 }
 0x495   : > { %6827 = vst [vmem:[#allocation28_spill] sm:$0xff] %v5694_v20  ;;  %v2797_v25 = vmul.f32 %v5694_v20, %v5694_v20  ;;  %v4076_v28 = vpack.c.bf16 %v5694_v20, %v5685_v8 }
 0x496   : > { %v4142_v42 = vpack.c.bf16 %v2796_v22, %v2794_v30 }
 0x497   : > { %v2620_v33 = vpop.f32.mrb[100].mxu1  ;;  %4077 = vmatprep.subr.bf16.mxu0 %v4076_v28  ;;  %v4140_v40 = vpack.c.bf16 %v2797_v25, %v2795_v24 }
 0x498   : > { %v2622_v43 = vpop.f32.mrb[101].mxu1  ;;  %4079 = vmatpush1.bf16.msra.mxu0 %v4078_v31  ;;  %v5712_v54 = vadd.f32 %v2620_v33, %v5487_v38 }
 0x499   : > { %v5709_v48 = vadd.f32 %v2622_v43, %v5484_v21  ;;  %v2624_v52 = vpop.f32.mrb[102].mxu1  ;;  %4141 = vmatprep.subr.bf16.mxu1 %v4140_v40 }
 0x49a   : > { %v5715_v55 = vadd.f32 %v2624_v52, %v5487_v38  ;;  %v2626_v57 = vpop.f32.mrb[103].mxu1  ;;  %4143 = vmatpush1.bf16.msra.mxu1 %v4142_v42  ;;  %v2798_v6 = vmul.f32 %v5712_v54, %v5712_v54 }
 0x49b   : > { %6828 = vst [vmem:[#allocation29_spill] sm:$0xff] %v5709_v48  ;;  %v5718_v61 = vadd.f32 %v2626_v57, %v5484_v21  ;;  %v2799_v3 = vmul.f32 %v5709_v48, %v5709_v48 }
 0x49c   : > { %v2800_v2 = vmul.f32 %v5715_v55, %v5715_v55  ;;  %v4082_v7 = vpack.c.bf16 %v5715_v55, %v5712_v54 }
 0x49d   : > { %6829 = vst [vmem:[#allocation30_spill] sm:$0xff] %v5718_v61  ;;  %v2801_v4 = vmul.f32 %v5718_v61, %v5718_v61  ;;  %v4080_v5 = vpack.c.bf16 %v5718_v61, %v5709_v48 }
 0x49e   : > { %v4146_v22 = vpack.c.bf16 %v2800_v2, %v2798_v6 }
 0x49f   : > { %v2630_v9 = vpop.f32.mrb[104].mxu1  ;;  %4081 = vmatprep.subr.bf16.mxu0 %v4080_v5  ;;  %v4144_v16 = vpack.c.bf16 %v2801_v4, %v2799_v3 }
 0x4a0   : > { %v2632_v24 = vpop.f32.mrb[105].mxu1  ;;  %4083 = vmatpush1.bf16.msra.mxu0 %v4082_v7  ;;  %v5736_v30 = vadd.f32 %v2630_v9, %v5487_v38 }
 0x4a1   : > { %v5733_v25 = vadd.f32 %v2632_v24, %v5484_v21  ;;  %v2634_v28 = vpop.f32.mrb[106].mxu1  ;;  %4145 = vmatprep.subr.bf16.mxu1 %v4144_v16 }
 0x4a2   : > { %v5739_v31 = vadd.f32 %v2634_v28, %v5487_v38  ;;  %v2636_v33 = vpop.f32.mrb[107].mxu1  ;;  %4147 = vmatpush1.bf16.msra.mxu1 %v4146_v22  ;;  %v2802_v2 = vmul.f32 %v5736_v30, %v5736_v30 }
 0x4a3   : > { %6830 = vst [vmem:[#allocation31_spill] sm:$0xff] %v5733_v25  ;;  %v5742_v40 = vadd.f32 %v2636_v33, %v5484_v21  ;;  %v2803_v43 = vmul.f32 %v5733_v25, %v5733_v25 }
 0x4a4   : > { %v2804_v42 = vmul.f32 %v5739_v31, %v5739_v31  ;;  %v4086_v3 = vpack.c.bf16 %v5739_v31, %v5736_v30 }
 0x4a5   : > { %6831 = vst [vmem:[#allocation32_spill] sm:$0xff] %v5742_v40  ;;  %v2805_v52 = vmul.f32 %v5742_v40, %v5742_v40  ;;  %v4084_v57 = vpack.c.bf16 %v5742_v40, %v5733_v25 }
 0x4a6   : > { %v4150_v6 = vpack.c.bf16 %v2804_v42, %v2802_v2 }
 0x4a7   : > { %v2640_v4 = vpop.f32.mrb[108].mxu1  ;;  %4085 = vmatprep.subr.bf16.mxu0 %v4084_v57  ;;  %v4148_v5 = vpack.c.bf16 %v2805_v52, %v2803_v43 }
 0x4a8   : > { %v2642_v7 = vpop.f32.mrb[109].mxu1  ;;  %4087 = vmatpush1.bf16.msra.mxu0 %v4086_v3  ;;  %v5760_v22 = vadd.f32 %v2640_v4, %v5487_v38 }
 0x4a9   : > { %v5757_v9 = vadd.f32 %v2642_v7, %v5484_v21  ;;  %v2644_v16 = vpop.f32.mrb[110].mxu1  ;;  %4149 = vmatprep.subr.bf16.mxu1 %v4148_v5 }
 0x4aa   : > { %v5763_v24 = vadd.f32 %v2644_v16, %v5487_v38  ;;  %v2646_v28 = vpop.f32.mrb[111].mxu1  ;;  %4151 = vmatpush1.bf16.msra.mxu1 %v4150_v6  ;;  %v2806_v2 = vmul.f32 %v5760_v22, %v5760_v22 }
 0x4ab   : > { %6832 = vst [vmem:[#allocation33_spill] sm:$0xff] %v5757_v9  ;;  %v5766_v33 = vadd.f32 %v2646_v28, %v5484_v21  ;;  %v2807_v43 = vmul.f32 %v5757_v9, %v5757_v9 }
 0x4ac   : > { %v2808_v42 = vmul.f32 %v5763_v24, %v5763_v24  ;;  %v4090_v3 = vpack.c.bf16 %v5763_v24, %v5760_v22 }
 0x4ad   : > { %6833 = vst [vmem:[#allocation34_spill] sm:$0xff] %v5766_v33  ;;  %v2809_v52 = vmul.f32 %v5766_v33, %v5766_v33  ;;  %v4088_v57 = vpack.c.bf16 %v5766_v33, %v5757_v9 }
 0x4ae   : > { %v4154_v6 = vpack.c.bf16 %v2808_v42, %v2806_v2 }
 0x4af   : > { %v2650_v4 = vpop.f32.mrb[112].mxu1  ;;  %4089 = vmatprep.subr.bf16.mxu0 %v4088_v57  ;;  %v4152_v5 = vpack.c.bf16 %v2809_v52, %v2807_v43 }
 0x4b0   : > { %v2652_v7 = vpop.f32.mrb[113].mxu1  ;;  %4091 = vmatpush1.bf16.msra.mxu0 %v4090_v3  ;;  %v5784_v40 = vadd.f32 %v2650_v4, %v5487_v38 }
 0x4b1   : > { %v5781_v16 = vadd.f32 %v2652_v7, %v5484_v21  ;;  %v2654_v28 = vpop.f32.mrb[114].mxu1  ;;  %4153 = vmatprep.subr.bf16.mxu1 %v4152_v5 }
 0x4b2   : > { %v5787_v33 = vadd.f32 %v2654_v28, %v5487_v38  ;;  %v2656_v9 = vpop.f32.mrb[115].mxu1  ;;  %4155 = vmatpush1.bf16.msra.mxu1 %v4154_v6  ;;  %v2810_v2 = vmul.f32 %v5784_v40, %v5784_v40 }
 0x4b3   : > { %6834 = vst [vmem:[#allocation35_spill] sm:$0xff] %v5781_v16  ;;  %v5790_v25 = vadd.f32 %v2656_v9, %v5484_v21  ;;  %v2811_v43 = vmul.f32 %v5781_v16, %v5781_v16 }
 0x4b4   : > { %v2812_v42 = vmul.f32 %v5787_v33, %v5787_v33  ;;  %v4094_v3 = vpack.c.bf16 %v5787_v33, %v5784_v40 }
 0x4b5   : > { %6835 = vst [vmem:[#allocation36_spill] sm:$0xff] %v5790_v25  ;;  %v2813_v52 = vmul.f32 %v5790_v25, %v5790_v25  ;;  %v4092_v57 = vpack.c.bf16 %v5790_v25, %v5781_v16 }
 0x4b6   : > { %v4158_v5 = vpack.c.bf16 %v2812_v42, %v2810_v2 }
 0x4b7   : > { %v2660_v9 = vpop.f32.mrb[116].mxu1  ;;  %4093 = vmatprep.subr.bf16.mxu0 %v4092_v57  ;;  %v4156_v4 = vpack.c.bf16 %v2813_v52, %v2811_v43 }
 0x4b8   : > { %v2662_v6 = vpop.f32.mrb[117].mxu1  ;;  %4095 = vmatpush1.bf16.msra.mxu0 %v4094_v3  ;;  %v5808_v61 = vadd.f32 %v2660_v9, %v5487_v38 }
 0x4b9   : > { %v5805_v7 = vadd.f32 %v2662_v6, %v5484_v21  ;;  %v2664_v28 = vpop.f32.mrb[118].mxu1  ;;  %4157 = vmatprep.subr.bf16.mxu1 %v4156_v4 }
 0x4ba   : > { %v5811_v25 = vadd.f32 %v2664_v28, %v5487_v38  ;;  %v2666_v16 = vpop.f32.mrb[119].mxu1  ;;  %4159 = vmatpush1.bf16.msra.mxu1 %v4158_v5  ;;  %v2814_v2 = vmul.f32 %v5808_v61, %v5808_v61 }
 0x4bb   : > { %6836 = vst [vmem:[#allocation37_spill] sm:$0xff] %v5805_v7  ;;  %v5814_v48 = vadd.f32 %v2666_v16, %v5484_v21  ;;  %v2815_v43 = vmul.f32 %v5805_v7, %v5805_v7 }
 0x4bc   : > { %v2816_v42 = vmul.f32 %v5811_v25, %v5811_v25  ;;  %v4098_v3 = vpack.c.bf16 %v5811_v25, %v5808_v61 }
 0x4bd   : > { %6837 = vst [vmem:[#allocation38_spill] sm:$0xff] %v5814_v48  ;;  %v2817_v52 = vmul.f32 %v5814_v48, %v5814_v48  ;;  %v4096_v57 = vpack.c.bf16 %v5814_v48, %v5805_v7 }
 0x4be   : > { %v4162_v4 = vpack.c.bf16 %v2816_v42, %v2814_v2 }
 0x4bf   : > { %v2670_v16 = vpop.f32.mrb[120].mxu1  ;;  %4097 = vmatprep.subr.bf16.mxu0 %v4096_v57  ;;  %v4160_v9 = vpack.c.bf16 %v2817_v52, %v2815_v43 }
 0x4c0   : > { %v2672_v5 = vpop.f32.mrb[121].mxu1  ;;  %4099 = vmatpush1.bf16.msra.mxu0 %v4098_v3  ;;  %v5832_v20 = vadd.f32 %v2670_v16, %v5487_v38 }
 0x4c1   : > { %v5829_v6 = vadd.f32 %v2672_v5, %v5484_v21  ;;  %v2674_v28 = vpop.f32.mrb[122].mxu1  ;;  %4161 = vmatprep.subr.bf16.mxu1 %v4160_v9 }
 0x4c2   : > { %v5835_v48 = vadd.f32 %v2674_v28, %v5487_v38  ;;  %v2676_v7 = vpop.f32.mrb[123].mxu1  ;;  %4163 = vmatpush1.bf16.msra.mxu1 %v4162_v4  ;;  %v2818_v2 = vmul.f32 %v5832_v20, %v5832_v20 }
 0x4c3   : > { %6838 = vst [vmem:[#allocation39_spill] sm:$0xff] %v5829_v6  ;;  %v5838_v8 = vadd.f32 %v2676_v7, %v5484_v21  ;;  %v2819_v43 = vmul.f32 %v5829_v6, %v5829_v6 }
 0x4c4   : > { %v2820_v42 = vmul.f32 %v5835_v48, %v5835_v48  ;;  %v4102_v3 = vpack.c.bf16 %v5835_v48, %v5832_v20 }
 0x4c5   : > { %6839 = vst [vmem:[#allocation40_spill] sm:$0xff] %v5838_v8  ;;  %v2821_v52 = vmul.f32 %v5838_v8, %v5838_v8  ;;  %v4100_v57 = vpack.c.bf16 %v5838_v8, %v5829_v6 }
 0x4c6   : > { %v4166_v9 = vpack.c.bf16 %v2820_v42, %v2818_v2 }
 0x4c7   : > { %v2680_v7 = vpop.f32.mrb[124].mxu1  ;;  %4101 = vmatprep.subr.bf16.mxu0 %v4100_v57  ;;  %v4164_v16 = vpack.c.bf16 %v2821_v52, %v2819_v43 }
 0x4c8   : > { %v2682_v4 = vpop.f32.mrb[125].mxu1  ;;  %4103 = vmatpush1.bf16.msra.mxu0 %v4102_v3  ;;  %v5856_v53 = vadd.f32 %v2680_v7, %v5487_v38  ;;  %v2689_v3 = vld [vmem:[%s6820_s23] sm:$0xff] }
 0x4c9   : > { %v5853_v5 = vadd.f32 %v2682_v4, %v5484_v21  ;;  %v2684_v28 = vpop.f32.mrb[126].mxu1  ;;  %4165 = vmatprep.subr.bf16.mxu1 %v4164_v16 }
 0x4ca   : > { %v5859_v8 = vadd.f32 %v2684_v28, %v5487_v38  ;;  %v2686_v6 = vpop.f32.mrb[127].mxu1  ;;  %4167 = vmatpush1.bf16.msra.mxu1 %v4166_v9  ;;  %v2822_v38 = vmul.f32 %v5856_v53, %v5856_v53  ;;  %v3049_v28 = vld [vmem:[%s667_s4] sm:$0x3] }
 0x4cb   : > { %6840 = vst [vmem:[#allocation41_spill] sm:$0xff] %v5853_v5  ;;  %v5862_v45 = vadd.f32 %v2686_v6, %v5484_v21  ;;  %v2823_v43 = vmul.f32 %v5853_v5, %v5853_v5 }
 0x4cc   : > { %v2824_v42 = vmul.f32 %v5859_v8, %v5859_v8  ;;  %v4106_v21 = vpack.c.bf16 %v5859_v8, %v5856_v53 }
 0x4cd   : > { %6841 = vst [vmem:[#allocation42_spill] sm:$0xff] %v5862_v45  ;;  %v2825_v52 = vmul.f32 %v5862_v45, %v5862_v45  ;;  %v4104_v57 = vpack.c.bf16 %v5862_v45, %v5853_v5 }
 0x4ce   : > { %v4170_v2 = vpack.c.bf16 %v2824_v42, %v2822_v38  ;;  %v3125_v42 = vld [vmem:[%s671_s20] sm:$0x3]  ;;  %v5893_v38 = vrot.slane %v3049_v28, %v5399_v35 }
 0x4cf   : > { %4105 = vmatprep.subr.bf16.mxu0 %v4104_v57  ;;  %v4168_v6 = vpack.c.bf16 %v2825_v52, %v2823_v43 }
 0x4d0   : > { %4107 = vmatpush1.bf16.msra.mxu0 %v4106_v21  ;;  %6844 = vst [vmem:[#allocation43_spill] sm:$0xff] %v5893_v38  ;;  %v5896_v21 = vrot.slane %v3049_v28, %v5406_v37  ;;  %v6855_v28 = vld [vmem:[#allocation33_spill] sm:$0xff]  ;;  %v6861_v38 = vld [vmem:[#allocation39_spill] sm:$0xff] }
 0x4d1   : > { %4169 = vmatprep.subr.bf16.mxu1 %v4168_v6  ;;  %v5899_v6 = vrot.slane %v3125_v42, %v5399_v35 }
 0x4d2   : > { %4171 = vmatpush1.bf16.msra.mxu1 %v4170_v2  ;;  %6845 = vst [vmem:[#allocation44_spill] sm:$0xff] %v5896_v21  ;;  %v5902_v2 = vrot.slane %v3125_v42, %v5406_v37  ;;  %v6859_v37 = vld [vmem:[#allocation37_spill] sm:$0xff] }
 0x4d3   : > { %2756 = vmatmul.mubr.f32.vlgmr.msra.gmra.mrb[64].mxu0 %v2689_v3 }
 0x4d4   : > { %6846 = vst [vmem:[#allocation45_spill] sm:$0xff] %v5902_v2 }
 0x4d5   : > { %2891 = vmatmul.mubr.f32.vlgmr.msra.gmra.mrb[128].mxu1 %v2689_v3 }
 0x4d7   : > { %v6896_v45 = vld [vmem:[#allocation43_spill] sm:$0xff] }
 0x5a6   : > { %v2757_v7 = vpop.f32.mrb[64].mxu0 }
 0x5a7   : > { %v2759_v16 = vpop.f32.mrb[65].mxu0  ;;  %v5890_v43 = vrot.slane %v2757_v7, %v5399_v35  ;;  %v2897_v52 = vmul.f32 %v2757_v7, %v2757_v7 }
 0x5a8   : > { %v2892_v9 = vpop.f32.mrb[128].mxu1  ;;  %v2898_v57 = vmul.f32 %v2759_v16, %v2759_v16  ;;  %v5905_v3 = vrot.slane %v2759_v16, %v5399_v35 }
 0x5a9   : > { %v2894_v4 = vpop.f32.mrb[129].mxu1  ;;  %v2899_v16 = vsub.f32 %v2892_v9, %v2897_v52  ;;  %v6865_v0 = vsub.f32 %v5499_v27, %v5890_v43  ;;  %v6866_v52 = vsub.f32 %v5520_v46, %v5890_v43  ;;  %v6870_v27 = vsub.f32 %v5568_v14, %v5890_v43 }
 0x5aa   : > { %v2900_v42 = vsub.f32 %v2894_v4, %v2898_v57  ;;  %v6871_v46 = vsub.f32 %v5571_v15, %v5890_v43  ;;  %v6875_v14 = vsub.f32 %v5619_v59, %v5890_v43  ;;  %v6876_v15 = vsub.f32 %v5640_v18, %v5890_v43 }
 0x5ab   : > { %v2973_v9 = vadd.f32 1e-05, %v2899_v16  ;;  %v6860_v16 = vld [vmem:[#allocation38_spill] sm:$0xff]  ;;  %v6880_v59 = vsub.f32 %v5688_v10, %v5890_v43  ;;  %v6881_v18 = vsub.f32 %v5691_v11, %v5890_v43  ;;  %v6885_v10 = vsub.f32 %v5739_v31, %v5890_v43 }
 0x5ac   : > { %v2974_v4 = vadd.f32 1e-05, %v2900_v42  ;;  %v6886_v11 = vsub.f32 %v5760_v22, %v5890_v43  ;;  %v6890_v31 = vsub.f32 %v5808_v61, %v5890_v43  ;;  %v6891_v22 = vsub.f32 %v5811_v25, %v5890_v43 }
 0x5ad   : > { %4575 = vrsqrt.f32 %v2973_v9  ;;  %v6864_v9 = vsub.f32 %v5496_v26, %v5890_v43  ;;  %v6869_v26 = vsub.f32 %v5547_v63, %v5890_v43  ;;  %v6874_v63 = vsub.f32 %v5616_v58, %v5890_v43 }
 0x5ae   : > { %4577 = vrsqrt.f32 %v2974_v4  ;;  %v6867_v4 = vsub.f32 %v5523_v47, %v5890_v43  ;;  %v6872_v47 = vsub.f32 %v5592_v34, %v5890_v43  ;;  %v6877_v34 = vsub.f32 %v5643_v19, %v5890_v43 }
 0x5af   : > { %v6879_v58 = vsub.f32 %v5667_v51, %v5890_v43  ;;  %v6882_v19 = vsub.f32 %v5712_v54, %v5890_v43  ;;  %v6884_v51 = vsub.f32 %v5736_v30, %v5890_v43  ;;  %v6887_v54 = vsub.f32 %v5763_v24, %v5890_v43 }
 0x5b0   : > { %v6889_v30 = vsub.f32 %v5787_v33, %v5890_v43  ;;  %v6892_v24 = vsub.f32 %v5832_v20, %v5890_v43  ;;  %v6894_v33 = vsub.f32 %v5856_v53, %v5890_v43  ;;  %v6895_v61 = vsub.f32 %v5859_v8, %v5890_v43 }
 0x5b7   : > { %v4576_v13 = vpop.eup %4575 }
 0x5b8   : > { %v4578_v2 = vpop.eup %4577  ;;  %v2980_v42 = vrot.slane %v4576_v13, %v5399_v35 }
 0x5b9   : > { %v6037_v7 = vrot.slane %v4578_v2, %v5399_v35  ;;  %v6868_v35 = vsub.f32 %v5544_v62, %v5890_v43  ;;  %v6873_v62 = vsub.f32 %v5595_v36, %v5890_v43  ;;  %v6878_v36 = vsub.f32 %v5664_v50, %v5890_v43 }
 0x5ba   : > { %v2985_v39 = vmul.f32 %v2980_v42, %v6864_v9  ;;  %v2987_v13 = vmul.f32 %v2980_v42, %v6865_v0  ;;  %v2989_v57 = vmul.f32 %v2980_v42, %v6866_v52  ;;  %v2991_v5 = vmul.f32 %v2980_v42, %v6867_v4 }
 0x5bb   : > { %v2993_v2 = vmul.f32 %v2980_v42, %v6868_v35  ;;  %v2995_v9 = vmul.f32 %v2980_v42, %v6869_v26  ;;  %v2997_v0 = vmul.f32 %v2980_v42, %v6870_v27  ;;  %v2999_v52 = vmul.f32 %v2980_v42, %v6871_v46 }
 0x5bc   : > { %v3001_v4 = vmul.f32 %v2980_v42, %v6872_v47  ;;  %v3003_v35 = vmul.f32 %v2980_v42, %v6873_v62  ;;  %v3005_v26 = vmul.f32 %v2980_v42, %v6874_v63  ;;  %v3007_v27 = vmul.f32 %v2980_v42, %v6875_v14 }
 0x5bd   : > { %v3009_v46 = vmul.f32 %v2980_v42, %v6876_v15  ;;  %v3011_v47 = vmul.f32 %v2980_v42, %v6877_v34  ;;  %v3013_v62 = vmul.f32 %v2980_v42, %v6878_v36  ;;  %v3015_v63 = vmul.f32 %v2980_v42, %v6879_v58 }
 0x5be   : > { %v3017_v14 = vmul.f32 %v2980_v42, %v6880_v59  ;;  %v3019_v15 = vmul.f32 %v2980_v42, %v6881_v18  ;;  %v3021_v34 = vmul.f32 %v2980_v42, %v6882_v19  ;;  %v6883_v50 = vsub.f32 %v5715_v55, %v5890_v43 }
 0x5bf   : > { %v3025_v58 = vmul.f32 %v2980_v42, %v6884_v51  ;;  %v3027_v59 = vmul.f32 %v2980_v42, %v6885_v10  ;;  %v3029_v18 = vmul.f32 %v2980_v42, %v6886_v11  ;;  %v3031_v19 = vmul.f32 %v2980_v42, %v6887_v54 }
 0x5c0   : > { %v3023_v36 = vmul.f32 %v2980_v42, %v6883_v50  ;;  %v6888_v55 = vsub.f32 %v5784_v40, %v5890_v43  ;;  %v3035_v51 = vmul.f32 %v2980_v42, %v6889_v30  ;;  %v3037_v10 = vmul.f32 %v2980_v42, %v6890_v31 }
 0x5c1   : > { %v3039_v11 = vmul.f32 %v2980_v42, %v6891_v22  ;;  %v3041_v54 = vmul.f32 %v2980_v42, %v6892_v24  ;;  %v6893_v40 = vsub.f32 %v5835_v48, %v5890_v43  ;;  %v3045_v30 = vmul.f32 %v2980_v42, %v6894_v33 }
 0x5c2   : > { %v3033_v50 = vmul.f32 %v2980_v42, %v6888_v55  ;;  %v3047_v31 = vmul.f32 %v2980_v42, %v6895_v61  ;;  %v3061_v21 = vmul.f32 %v6896_v45, %v2985_v39  ;;  %v3063_v25 = vmul.f32 %v6896_v45, %v2987_v13 }
 0x5c3   : > { %v3043_v55 = vmul.f32 %v2980_v42, %v6893_v40  ;;  %v3065_v22 = vmul.f32 %v6896_v45, %v2989_v57  ;;  %v3067_v20 = vmul.f32 %v6896_v45, %v2991_v5  ;;  %v3069_v24 = vmul.f32 %v6896_v45, %v2993_v2 }
 0x5c4   : > { %v3071_v48 = vmul.f32 %v6896_v45, %v2995_v9  ;;  %v3073_v40 = vmul.f32 %v6896_v45, %v2997_v0  ;;  %v3075_v53 = vmul.f32 %v6896_v45, %v2999_v52  ;;  %v3077_v33 = vmul.f32 %v6896_v45, %v3001_v4 }
 0x5c5   : > { %v3079_v8 = vmul.f32 %v6896_v45, %v3003_v35  ;;  %v3081_v39 = vmul.f32 %v6896_v45, %v3005_v26  ;;  %v3083_v43 = vmul.f32 %v6896_v45, %v3007_v27  ;;  %v3085_v57 = vmul.f32 %v6896_v45, %v3009_v46 }
 0x5c6   : > { %v3087_v5 = vmul.f32 %v6896_v45, %v3011_v47  ;;  %v3089_v42 = vmul.f32 %v6896_v45, %v3013_v62  ;;  %v3091_v13 = vmul.f32 %v6896_v45, %v3015_v63  ;;  %v3093_v2 = vmul.f32 %v6896_v45, %v3017_v14 }
 0x5c7   : > { %v3095_v9 = vmul.f32 %v6896_v45, %v3019_v15  ;;  %v3097_v0 = vmul.f32 %v6896_v45, %v3021_v34  ;;  %v3099_v52 = vmul.f32 %v6896_v45, %v3023_v36  ;;  %v3101_v4 = vmul.f32 %v6896_v45, %v3025_v58 }
 0x5c8   : > { %v3103_v35 = vmul.f32 %v6896_v45, %v3027_v59  ;;  %v3105_v26 = vmul.f32 %v6896_v45, %v3029_v18  ;;  %v3107_v27 = vmul.f32 %v6896_v45, %v3031_v19  ;;  %v3109_v46 = vmul.f32 %v6896_v45, %v3033_v50 }
 0x5c9   : > { %v3111_v47 = vmul.f32 %v6896_v45, %v3035_v51  ;;  %v3113_v62 = vmul.f32 %v6896_v45, %v3037_v10  ;;  %v3115_v63 = vmul.f32 %v6896_v45, %v3039_v11  ;;  %v3117_v14 = vmul.f32 %v6896_v45, %v3041_v54 }
 0x5ca   : > { %v3119_v15 = vmul.f32 %v6896_v45, %v3043_v55  ;;  %v3121_v34 = vmul.f32 %v6896_v45, %v3045_v30  ;;  %v3123_v36 = vmul.f32 %v6896_v45, %v3047_v31  ;;  %v6168_v58 = vadd.f32 %v5899_v6, %v3061_v21 }
 0x5cb   : > { %v6171_v59 = vadd.f32 %v5899_v6, %v3063_v25  ;;  %v6174_v18 = vadd.f32 %v5899_v6, %v3065_v22  ;;  %v6177_v19 = vadd.f32 %v5899_v6, %v3067_v20  ;;  %v6180_v50 = vadd.f32 %v5899_v6, %v3069_v24 }
 0x5cc   : > { %6897 = vst [vmem:[#allocation33_spill] sm:$0xff] %v6168_v58  ;;  %v6183_v51 = vadd.f32 %v5899_v6, %v3071_v48  ;;  %v6186_v45 = vadd.f32 %v5899_v6, %v3073_v40  ;;  %v6189_v21 = vadd.f32 %v5899_v6, %v3075_v53  ;;  %v6192_v10 = vadd.f32 %v5899_v6, %v3077_v33 }
 0x5cd   : > { %6898 = vst [vmem:[#allocation37_spill] sm:$0xff] %v6171_v59  ;;  %6899 = vst [vmem:[#allocation38_spill] sm:$0xff] %v6174_v18  ;;  %v6195_v11 = vadd.f32 %v5899_v6, %v3079_v8  ;;  %v6198_v54 = vadd.f32 %v5899_v6, %v3081_v39  ;;  %v6201_v55 = vadd.f32 %v5899_v6, %v3083_v43 }
 0x5ce   : > { %6900 = vst [vmem:[#allocation39_spill] sm:$0xff] %v6177_v19  ;;  %v6204_v30 = vadd.f32 %v5899_v6, %v3085_v57  ;;  %v6207_v61 = vadd.f32 %v5899_v6, %v3087_v5  ;;  %v6210_v31 = vadd.f32 %v5899_v6, %v3089_v42  ;;  %v6213_v25 = vadd.f32 %v5899_v6, %v3091_v13 }
 0x5cf   : > { %v6216_v22 = vadd.f32 %v5899_v6, %v3093_v2  ;;  %v6219_v20 = vadd.f32 %v5899_v6, %v3095_v9  ;;  %v6222_v24 = vadd.f32 %v5899_v6, %v3097_v0  ;;  %v6225_v48 = vadd.f32 %v5899_v6, %v3099_v52 }
 0x5d0   : > { %v6228_v40 = vadd.f32 %v5899_v6, %v3101_v4  ;;  %v6231_v53 = vadd.f32 %v5899_v6, %v3103_v35  ;;  %v6234_v33 = vadd.f32 %v5899_v6, %v3105_v26  ;;  %v6237_v8 = vadd.f32 %v5899_v6, %v3107_v27 }
 0x5d1   : > { %6901 = vst [vmem:[#allocation43_spill] sm:$0xff] %v6216_v22  ;;  %6902 = vst [vmem:[#allocation46_spill] sm:$0xff] %v6219_v20  ;;  %v6240_v39 = vadd.f32 %v5899_v6, %v3109_v46  ;;  %v6243_v43 = vadd.f32 %v5899_v6, %v3111_v47  ;;  %v6246_v57 = vadd.f32 %v5899_v6, %v3113_v62 }
 0x5d2   : > { %6903 = vst [vmem:[#allocation47_spill] sm:$0xff] %v6222_v24  ;;  %6904 = vst [vmem:[#allocation48_spill] sm:$0xff] %v6225_v48  ;;  %v6249_v5 = vadd.f32 %v5899_v6, %v3115_v63  ;;  %v6252_v42 = vadd.f32 %v5899_v6, %v3117_v14  ;;  %v6255_v13 = vadd.f32 %v5899_v6, %v3119_v15 }
 0x5d3   : > { %6905 = vst [vmem:[#allocation49_spill] sm:$0xff] %v6228_v40  ;;  %6906 = vst [vmem:[#allocation50_spill] sm:$0xff] %v6231_v53  ;;  %v6258_v2 = vadd.f32 %v5899_v6, %v3121_v34  ;;  %v6261_v9 = vadd.f32 %v5899_v6, %v3123_v36  ;;  %v6917_v0 = vsub.f32 %v5490_v23, %v5905_v3  ;;  %v6966_v53 = vld [vmem:[#allocation44_spill] sm:$0xff] }
 0x5d4   : > { %6907 = vst [vmem:[#allocation51_spill] sm:$0xff] %v6234_v33  ;;  %6908 = vst [vmem:[#allocation52_spill] sm:$0xff] %v6237_v8  ;;  %v6918_v4 = vsub.f32 %v5502_v29, %v5905_v3  ;;  %v6919_v26 = vsub.f32 %v5517_v44, %v5905_v3  ;;  %v6920_v46 = vsub.f32 %v5526_v49, %v5905_v3  ;;  %v6962_v8 = vld [vmem:[#allocation41_spill] sm:$0xff]  ;;  %v6964_v33 = vld [vmem:[#allocation42_spill] sm:$0xff] }
 0x5d5   : > { %6909 = vst [vmem:[#allocation53_spill] sm:$0xff] %v6240_v39  ;;  %6910 = vst [vmem:[#allocation54_spill] sm:$0xff] %v6243_v43  ;;  %v2986_v52 = vmul.f32 %v6037_v7, %v6917_v0  ;;  %v6921_v23 = vsub.f32 %v5541_v60, %v5905_v3  ;;  %v6922_v29 = vsub.f32 %v5550_v1, %v5905_v3  ;;  %v6928_v0 = vld [vmem:[#allocation22_spill] sm:$0xff]  ;;  %v6955_v43 = vld [vmem:[#allocation36_spill] sm:$0xff] }
 0x5d6   : > { %6911 = vst [vmem:[#allocation55_spill] sm:$0xff] %v6246_v57  ;;  %6912 = vst [vmem:[#allocation56_spill] sm:$0xff] %v6249_v5  ;;  %v2988_v35 = vmul.f32 %v6037_v7, %v6918_v4  ;;  %v2990_v27 = vmul.f32 %v6037_v7, %v6919_v26  ;;  %v2992_v6 = vmul.f32 %v6037_v7, %v6920_v46  ;;  %v6930_v26 = vld [vmem:[#allocation23_spill] sm:$0xff]  ;;  %v6951_v5 = vld [vmem:[#allocation34_spill] sm:$0xff] }
 0x5d7   : > { %6913 = vst [vmem:[#allocation57_spill] sm:$0xff] %v6252_v42  ;;  %6914 = vst [vmem:[#allocation58_spill] sm:$0xff] %v6255_v13  ;;  %v2994_v47 = vmul.f32 %v6037_v7, %v6921_v23  ;;  %v2996_v62 = vmul.f32 %v6037_v7, %v6922_v29  ;;  %v6923_v44 = vsub.f32 %v5565_v12, %v5905_v3  ;;  %v6932_v23 = vld [vmem:[#allocation24_spill] sm:$0xff]  ;;  %v6946_v13 = vld [vmem:[#allocation31_spill] sm:$0xff] }
 0x5d8   : > { %6915 = vst [vmem:[#allocation59_spill] sm:$0xff] %v6258_v2  ;;  %6916 = vst [vmem:[#allocation60_spill] sm:$0xff] %v6261_v9  ;;  %v6924_v49 = vsub.f32 %v5574_v17, %v5905_v3  ;;  %v6925_v60 = vsub.f32 %v5589_v32, %v5905_v3  ;;  %v6926_v1 = vsub.f32 %v5598_v41, %v5905_v3  ;;  %v6942_v9 = vld [vmem:[#allocation29_spill] sm:$0xff]  ;;  %v6944_v2 = vld [vmem:[#allocation30_spill] sm:$0xff] }
 0x5d9   : > { %v2998_v63 = vmul.f32 %v6037_v7, %v6923_v44  ;;  %v6927_v12 = vsub.f32 %v5613_v56, %v5905_v3  ;;  %v6929_v17 = vsub.f32 %v6928_v0, %v5905_v3  ;;  %v6931_v32 = vsub.f32 %v6930_v26, %v5905_v3  ;;  %v6934_v44 = vld [vmem:[#allocation25_spill] sm:$0xff]  ;;  %v6938_v0 = vld [vmem:[#allocation27_spill] sm:$0xff]  ;;  %v6948_v42 = vld [vmem:[#allocation32_spill] sm:$0xff] }
 0x5da   : > { %v3000_v14 = vmul.f32 %v6037_v7, %v6924_v49  ;;  %v3002_v15 = vmul.f32 %v6037_v7, %v6925_v60  ;;  %v3004_v34 = vmul.f32 %v6037_v7, %v6926_v1  ;;  %v6933_v41 = vsub.f32 %v6932_v23, %v5905_v3  ;;  %v6936_v60 = vld [vmem:[#allocation26_spill] sm:$0xff]  ;;  %v6953_v57 = vld [vmem:[#allocation35_spill] sm:$0xff]  ;;  %v6960_v39 = vld [vmem:[#allocation40_spill] sm:$0xff] }
 0x5db   : > { %v3006_v36 = vmul.f32 %v6037_v7, %v6927_v12  ;;  %v3008_v4 = vmul.f32 %v6037_v7, %v6929_v17  ;;  %v3010_v46 = vmul.f32 %v6037_v7, %v6931_v32  ;;  %v6935_v56 = vsub.f32 %v6934_v44, %v5905_v3  ;;  %v6940_v32 = vld [vmem:[#allocation28_spill] sm:$0xff] }
 0x5dc   : > { %v3012_v29 = vmul.f32 %v6037_v7, %v6933_v41  ;;  %v6937_v1 = vsub.f32 %v6936_v60, %v5905_v3  ;;  %v6939_v17 = vsub.f32 %v6938_v0, %v5905_v3  ;;  %v6941_v23 = vsub.f32 %v6940_v32, %v5905_v3 }
 0x5dd   : > { %v3014_v49 = vmul.f32 %v6037_v7, %v6935_v56  ;;  %v6943_v44 = vsub.f32 %v6942_v9, %v5905_v3  ;;  %v6945_v60 = vsub.f32 %v6944_v2, %v5905_v3  ;;  %v6947_v0 = vsub.f32 %v6946_v13, %v5905_v3 }
 0x5de   : > { %v3016_v12 = vmul.f32 %v6037_v7, %v6937_v1  ;;  %v3018_v26 = vmul.f32 %v6037_v7, %v6939_v17  ;;  %v3020_v41 = vmul.f32 %v6037_v7, %v6941_v23  ;;  %v6949_v32 = vsub.f32 %v6948_v42, %v5905_v3 }
 0x5df   : > { %v3022_v56 = vmul.f32 %v6037_v7, %v6943_v44  ;;  %v3024_v1 = vmul.f32 %v6037_v7, %v6945_v60  ;;  %v3026_v17 = vmul.f32 %v6037_v7, %v6947_v0  ;;  %v6950_v9 = vsub.f32 %v6855_v28, %v5905_v3 }
 0x5e0   : > { %v3028_v23 = vmul.f32 %v6037_v7, %v6949_v32  ;;  %v6952_v2 = vsub.f32 %v6951_v5, %v5905_v3  ;;  %v6954_v13 = vsub.f32 %v6953_v57, %v5905_v3  ;;  %v6956_v42 = vsub.f32 %v6955_v43, %v5905_v3 }
 0x5e1   : > { %v3030_v44 = vmul.f32 %v6037_v7, %v6950_v9  ;;  %v6957_v28 = vsub.f32 %v6859_v37, %v5905_v3  ;;  %v6958_v5 = vsub.f32 %v6860_v16, %v5905_v3  ;;  %v6959_v57 = vsub.f32 %v6861_v38, %v5905_v3 }
 0x5e2   : > { %v3032_v60 = vmul.f32 %v6037_v7, %v6952_v2  ;;  %v3034_v0 = vmul.f32 %v6037_v7, %v6954_v13  ;;  %v3036_v32 = vmul.f32 %v6037_v7, %v6956_v42  ;;  %v6961_v43 = vsub.f32 %v6960_v39, %v5905_v3 }
 0x5e3   : > { %v3038_v9 = vmul.f32 %v6037_v7, %v6957_v28  ;;  %v3040_v2 = vmul.f32 %v6037_v7, %v6958_v5  ;;  %v3042_v13 = vmul.f32 %v6037_v7, %v6959_v57  ;;  %v6963_v37 = vsub.f32 %v6962_v8, %v5905_v3 }
 0x5e4   : > { %v3044_v42 = vmul.f32 %v6037_v7, %v6961_v43  ;;  %v6965_v16 = vsub.f32 %v6964_v33, %v5905_v3  ;;  %v3062_v40 = vmul.f32 %v6966_v53, %v2986_v52  ;;  %v3064_v38 = vmul.f32 %v6966_v53, %v2988_v35 }
 0x5e5   : > { %v3046_v28 = vmul.f32 %v6037_v7, %v6963_v37  ;;  %v3066_v57 = vmul.f32 %v6966_v53, %v2990_v27  ;;  %v3068_v39 = vmul.f32 %v6966_v53, %v2992_v6  ;;  %v3070_v43 = vmul.f32 %v6966_v53, %v2994_v47 }
 0x5e6   : > { %v3048_v5 = vmul.f32 %v6037_v7, %v6965_v16  ;;  %v3072_v48 = vmul.f32 %v6966_v53, %v2996_v62  ;;  %v3074_v8 = vmul.f32 %v6966_v53, %v2998_v63  ;;  %v3076_v37 = vmul.f32 %v6966_v53, %v3000_v14 }
 0x5e7   : > { %v3078_v3 = vmul.f32 %v6966_v53, %v3002_v15  ;;  %v3080_v7 = vmul.f32 %v6966_v53, %v3004_v34  ;;  %v3082_v33 = vmul.f32 %v6966_v53, %v3006_v36  ;;  %v3084_v52 = vmul.f32 %v6966_v53, %v3008_v4 }
 0x5e8   : > { %v3086_v35 = vmul.f32 %v6966_v53, %v3010_v46  ;;  %v3088_v27 = vmul.f32 %v6966_v53, %v3012_v29  ;;  %v3090_v6 = vmul.f32 %v6966_v53, %v3014_v49  ;;  %v3092_v47 = vmul.f32 %v6966_v53, %v3016_v12 }
 0x5e9   : > { %v3094_v62 = vmul.f32 %v6966_v53, %v3018_v26  ;;  %v3096_v63 = vmul.f32 %v6966_v53, %v3020_v41  ;;  %v3098_v14 = vmul.f32 %v6966_v53, %v3022_v56  ;;  %v3100_v15 = vmul.f32 %v6966_v53, %v3024_v1 }
 0x5ea   : > { %v3102_v34 = vmul.f32 %v6966_v53, %v3026_v17  ;;  %v3104_v36 = vmul.f32 %v6966_v53, %v3028_v23  ;;  %v3106_v4 = vmul.f32 %v6966_v53, %v3030_v44  ;;  %v3108_v46 = vmul.f32 %v6966_v53, %v3032_v60  ;;  %v6967_v23 = vld [vmem:[#allocation45_spill] sm:$0xff] }
 0x5eb   : > { %v3110_v29 = vmul.f32 %v6966_v53, %v3034_v0  ;;  %v3112_v49 = vmul.f32 %v6966_v53, %v3036_v32  ;;  %v3114_v12 = vmul.f32 %v6966_v53, %v3038_v9  ;;  %v3116_v26 = vmul.f32 %v6966_v53, %v3040_v2 }
 0x5ec   : > { %v3118_v41 = vmul.f32 %v6966_v53, %v3042_v13  ;;  %v3120_v56 = vmul.f32 %v6966_v53, %v3044_v42  ;;  %v3122_v1 = vmul.f32 %v6966_v53, %v3046_v28  ;;  %v3124_v17 = vmul.f32 %v6966_v53, %v3048_v5 }
 0x5ed   : > { %v6424_v44 = vadd.f32 %v6967_v23, %v3062_v40  ;;  %v6427_v60 = vadd.f32 %v6967_v23, %v3064_v38  ;;  %v6430_v0 = vadd.f32 %v6967_v23, %v3066_v57  ;;  %v6433_v32 = vadd.f32 %v6967_v23, %v3068_v39 }
 0x5ee   : > { %v6436_v9 = vadd.f32 %v6967_v23, %v3070_v43  ;;  %v6439_v2 = vadd.f32 %v6967_v23, %v3072_v48  ;;  %v6442_v53 = vadd.f32 %v6967_v23, %v3074_v8  ;;  %v6445_v40 = vadd.f32 %v6967_v23, %v3076_v37 }
 0x5ef   : > { %6968 = vst [vmem:[#allocation22_spill] sm:$0xff] %v6427_v60  ;;  %6969 = vst [vmem:[#allocation23_spill] sm:$0xff] %v6430_v0  ;;  %v6448_v13 = vadd.f32 %v6967_v23, %v3078_v3  ;;  %v6451_v42 = vadd.f32 %v6967_v23, %v3080_v7  ;;  %v6454_v28 = vadd.f32 %v6967_v23, %v3082_v33  ;;  %3204 = sbr.rel (%p3994_p13) target bundleno = 1553 (0x611), region = 112 }
 0x5f0   : > { %v6457_v16 = vadd.f32 %v6967_v23, %v3084_v52  ;;  %v6460_v48 = vadd.f32 %v6967_v23, %v3086_v35  ;;  %v6463_v5 = vadd.f32 %v6967_v23, %v3088_v27  ;;  %v6466_v38 = vadd.f32 %v6967_v23, %v3090_v6 }
 0x5f1   : > { %v6469_v57 = vadd.f32 %v6967_v23, %v3092_v47  ;;  %v6472_v39 = vadd.f32 %v6967_v23, %v3094_v62  ;;  %v6475_v43 = vadd.f32 %v6967_v23, %v3096_v63  ;;  %v6478_v8 = vadd.f32 %v6967_v23, %v3098_v14 }
 0x5f2   : > { %v6481_v37 = vadd.f32 %v6967_v23, %v3100_v15  ;;  %v6484_v3 = vadd.f32 %v6967_v23, %v3102_v34  ;;  %v6487_v7 = vadd.f32 %v6967_v23, %v3104_v36  ;;  %v6490_v33 = vadd.f32 %v6967_v23, %v3106_v4 }
 0x5f3   : > { %v6493_v52 = vadd.f32 %v6967_v23, %v3108_v46  ;;  %v6496_v35 = vadd.f32 %v6967_v23, %v3110_v29  ;;  %v6499_v27 = vadd.f32 %v6967_v23, %v3112_v49  ;;  %v6502_v6 = vadd.f32 %v6967_v23, %v3114_v12 }
 0x5f4   : > { %v6505_v47 = vadd.f32 %v6967_v23, %v3116_v26  ;;  %v6508_v62 = vadd.f32 %v6967_v23, %v3118_v41  ;;  %v6511_v63 = vadd.f32 %v6967_v23, %v3120_v56  ;;  %v6514_v14 = vadd.f32 %v6967_v23, %v3122_v1 }
 0x5f5   : > { %v6517_v15 = vadd.f32 %v6967_v23, %v3124_v17  ;;  %v3205_v34 = vmax.f32 (!%p3994_p13), %v6168_v58, 0.0  ;;  %v3207_v36 = vmax.f32 (!%p3994_p13), %v6171_v59, 0.0  ;;  %v3206_v4 = vmax.f32 (!%p3994_p13), %v6424_v44, 0.0 }
 0x5f6   : > { %v3208_v46 = vmax.f32 %v6427_v60, 0.0  ;;  %v3209_v29 = vmax.f32 %v6174_v18, 0.0  ;;  %v3211_v49 = vmax.f32 %v6177_v19, 0.0  ;;  %v3210_v12 = vmax.f32 %v6430_v0, 0.0 }
 0x5f7   : > { %v3212_v26 = vmax.f32 %v6433_v32, 0.0  ;;  %v3269_v41 = vpack.c.bf16 %v3207_v36, %v3205_v34  ;;  %v3213_v1 = vmax.f32 %v6180_v50, 0.0  ;;  %v3215_v17 = vmax.f32 %v6183_v51, 0.0 }
 0x5f8   : > { %v3270_v56 = vpack.c.bf16 %v3208_v46, %v3206_v4  ;;  %v3271_v23 = vpack.c.bf16 %v3211_v49, %v3209_v29  ;;  %v3214_v58 = vmax.f32 %v6436_v9, 0.0  ;;  %v3216_v60 = vmax.f32 %v6439_v2, 0.0 }
 0x5f9   : > { %v3272_v59 = vpack.c.bf16 %v3212_v26, %v3210_v12  ;;  %3301 = vst [vmem:[#allocation2] sm:$0xff] %v3269_v41  ;;  %v3273_v18 = vpack.c.bf16 %v3215_v17, %v3213_v1  ;;  %v3217_v19 = vmax.f32 %v6186_v45, 0.0  ;;  %v3219_v0 = vmax.f32 %v6189_v21, 0.0 }
 0x5fa   : > { %3302 = vst [vmem:[#allocation2 + $0x8] sm:$0xff] %v3270_v56  ;;  %v3218_v34 = vmax.f32 %v6442_v53, 0.0  ;;  %3303 = vst [vmem:[#allocation2 + $0x10] sm:$0xff] %v3271_v23  ;;  %v3274_v36 = vpack.c.bf16 %v3216_v60, %v3214_v58  ;;  %v3220_v4 = vmax.f32 %v6445_v40, 0.0  ;;  %v3221_v46 = vmax.f32 %v6192_v10, 0.0 }
 0x5fb   : > { %3304 = vst [vmem:[#allocation2 + $0x18] sm:$0xff] %v3272_v59  ;;  %v3223_v29 = vmax.f32 %v6195_v11, 0.0  ;;  %3305 = vst [vmem:[#allocation2 + $0x20] sm:$0xff] %v3273_v18  ;;  %v3275_v49 = vpack.c.bf16 %v3219_v0, %v3217_v19  ;;  %v3222_v12 = vmax.f32 %v6448_v13, 0.0  ;;  %v3224_v26 = vmax.f32 %v6451_v42, 0.0 }
 0x5fc   : > { %v3225_v41 = vmax.f32 %v6198_v54, 0.0  ;;  %3306 = vst [vmem:[#allocation2 + $0x28] sm:$0xff] %v3274_v36  ;;  %v3276_v56 = vpack.c.bf16 %v3220_v4, %v3218_v34  ;;  %v3227_v59 = vmax.f32 %v6201_v55, 0.0  ;;  %v3226_v58 = vmax.f32 %v6454_v28, 0.0 }
 0x5fd   : > { %v3277_v1 = vpack.c.bf16 %v3223_v29, %v3221_v46  ;;  %3307 = vst [vmem:[#allocation2 + $0x30] sm:$0xff] %v3275_v49  ;;  %v3278_v60 = vpack.c.bf16 %v3224_v26, %v3222_v12  ;;  %v3228_v17 = vmax.f32 %v6457_v16, 0.0  ;;  %v3229_v18 = vmax.f32 %v6204_v30, 0.0 }
 0x5fe   : > { %v3231_v19 = vmax.f32 %v6207_v61, 0.0  ;;  %3308 = vst [vmem:[#allocation2 + $0x38] sm:$0xff] %v3276_v56  ;;  %v3279_v0 = vpack.c.bf16 %v3227_v59, %v3225_v41  ;;  %v3230_v23 = vmax.f32 %v6460_v48, 0.0  ;;  %v3232_v34 = vmax.f32 %v6463_v5, 0.0 }
 0x5ff   : > { %3309 = vst [vmem:[#allocation2 + $0x40] sm:$0xff] %v3277_v1  ;;  %v3233_v36 = vmax.f32 %v6210_v31, 0.0  ;;  %3310 = vst [vmem:[#allocation2 + $0x48] sm:$0xff] %v3278_v60  ;;  %v3280_v4 = vpack.c.bf16 %v3228_v17, %v3226_v58  ;;  %v3235_v29 = vmax.f32 %v6213_v25, 0.0  ;;  %v3234_v49 = vmax.f32 %v6466_v38, 0.0 }
 0x600   : > { %v3281_v46 = vpack.c.bf16 %v3231_v19, %v3229_v18  ;;  %3311 = vst [vmem:[#allocation2 + $0x50] sm:$0xff] %v3279_v0  ;;  %v3282_v12 = vpack.c.bf16 %v3232_v34, %v3230_v23  ;;  %v3236_v26 = vmax.f32 %v6469_v57, 0.0  ;;  %v3237_v56 = vmax.f32 %v6216_v22, 0.0  ;;  %v6970_v19 = vld [vmem:[#allocation48_spill] sm:$0xff] }
 0x601   : > { %v3239_v41 = vmax.f32 %v6219_v20, 0.0  ;;  %3312 = vst [vmem:[#allocation2 + $0x58] sm:$0xff] %v3280_v4  ;;  %v3283_v1 = vpack.c.bf16 %v3235_v29, %v3233_v36  ;;  %v3238_v59 = vmax.f32 %v6472_v39, 0.0  ;;  %v3240_v58 = vmax.f32 %v6475_v43, 0.0  ;;  %v6971_v4 = vld [vmem:[#allocation49_spill] sm:$0xff]  ;;  %v6972_v36 = vld [vmem:[#allocation50_spill] sm:$0xff] }
 0x602   : > { %3313 = vst [vmem:[#allocation2 + $0x60] sm:$0xff] %v3281_v46  ;;  %v3241_v60 = vmax.f32 %v6222_v24, 0.0  ;;  %3314 = vst [vmem:[#allocation2 + $0x68] sm:$0xff] %v3282_v12  ;;  %v3284_v17 = vpack.c.bf16 %v3236_v26, %v3234_v49  ;;  %v3243_v0 = vmax.f32 %v6970_v19, 0.0  ;;  %v3242_v23 = vmax.f32 %v6478_v8, 0.0  ;;  %v6973_v12 = vld [vmem:[#allocation51_spill] sm:$0xff] }
 0x603   : > { %v3285_v18 = vpack.c.bf16 %v3239_v41, %v3237_v56  ;;  %3315 = vst [vmem:[#allocation2 + $0x70] sm:$0xff] %v3283_v1  ;;  %v3286_v34 = vpack.c.bf16 %v3240_v58, %v3238_v59  ;;  %v3244_v20 = vmax.f32 %v6481_v37, 0.0  ;;  %v3245_v46 = vmax.f32 %v6971_v4, 0.0  ;;  %v6974_v1 = vld [vmem:[#allocation52_spill] sm:$0xff] }
 0x604   : > { %v3247_v29 = vmax.f32 %v6972_v36, 0.0  ;;  %3316 = vst [vmem:[#allocation2 + $0x78] sm:$0xff] %v3284_v17  ;;  %v3287_v22 = vpack.c.bf16 %v3243_v0, %v3241_v60  ;;  %v3246_v24 = vmax.f32 %v6484_v3, 0.0  ;;  %v3248_v49 = vmax.f32 %v6487_v7, 0.0  ;;  %v6975_v17 = vld [vmem:[#allocation53_spill] sm:$0xff]  ;;  %v6976_v60 = vld [vmem:[#allocation54_spill] sm:$0xff] }
 0x605   : > { %3317 = vst [vmem:[#allocation2 + $0x80] sm:$0xff] %v3285_v18  ;;  %v3249_v26 = vmax.f32 %v6973_v12, 0.0  ;;  %3318 = vst [vmem:[#allocation2 + $0x88] sm:$0xff] %v3286_v34  ;;  %v3288_v56 = vpack.c.bf16 %v3244_v20, %v3242_v23  ;;  %v3251_v59 = vmax.f32 %v6974_v1, 0.0  ;;  %v3250_v58 = vmax.f32 %v6490_v33, 0.0  ;;  %v6977_v23 = vld [vmem:[#allocation55_spill] sm:$0xff] }
 0x606   : > { %v3289_v41 = vpack.c.bf16 %v3247_v29, %v3245_v46  ;;  %3319 = vst [vmem:[#allocation2 + $0x90] sm:$0xff] %v3287_v22  ;;  %v3290_v19 = vpack.c.bf16 %v3248_v49, %v3246_v24  ;;  %v3252_v4 = vmax.f32 %v6493_v52, 0.0  ;;  %v3253_v18 = vmax.f32 %v6975_v17, 0.0  ;;  %v6978_v22 = vld [vmem:[#allocation56_spill] sm:$0xff] }
 0x607   : > { %v3255_v0 = vmax.f32 %v6976_v60, 0.0  ;;  %3320 = vst [vmem:[#allocation2 + $0x98] sm:$0xff] %v3288_v56  ;;  %v3291_v36 = vpack.c.bf16 %v3251_v59, %v3249_v26  ;;  %v3254_v12 = vmax.f32 %v6496_v35, 0.0  ;;  %v3256_v20 = vmax.f32 %v6499_v27, 0.0  ;;  %v6979_v56 = vld [vmem:[#allocation57_spill] sm:$0xff]  ;;  %v6980_v26 = vld [vmem:[#allocation58_spill] sm:$0xff] }
 0x608   : > { %3321 = vst [vmem:[#allocation2 + $0xa0] sm:$0xff] %v3289_v41  ;;  %v3257_v34 = vmax.f32 %v6977_v23, 0.0  ;;  %3322 = vst [vmem:[#allocation2 + $0xa8] sm:$0xff] %v3290_v19  ;;  %v3292_v46 = vpack.c.bf16 %v3252_v4, %v3250_v58  ;;  %v3259_v24 = vmax.f32 %v6978_v22, 0.0  ;;  %v3258_v49 = vmax.f32 %v6502_v6, 0.0  ;;  %v6981_v19 = vld [vmem:[#allocation59_spill] sm:$0xff] }
 0x609   : > { %v3293_v29 = vpack.c.bf16 %v3255_v0, %v3253_v18  ;;  %3323 = vst [vmem:[#allocation2 + $0xb0] sm:$0xff] %v3291_v36  ;;  %v3294_v1 = vpack.c.bf16 %v3256_v20, %v3254_v12  ;;  %v3260_v17 = vmax.f32 %v6505_v47, 0.0  ;;  %v3261_v41 = vmax.f32 %v6979_v56, 0.0  ;;  %v6982_v36 = vld [vmem:[#allocation60_spill] sm:$0xff] }
 0x60a   : > { %v3263_v59 = vmax.f32 %v6980_v26, 0.0  ;;  %3324 = vst [vmem:[#allocation2 + $0xb8] sm:$0xff] %v3292_v46  ;;  %v3295_v60 = vpack.c.bf16 %v3259_v24, %v3257_v34  ;;  %v3262_v23 = vmax.f32 %v6508_v62, 0.0  ;;  %v3264_v58 = vmax.f32 %v6511_v63, 0.0 }
 0x60b   : > { %3325 = vst [vmem:[#allocation2 + $0xc0] sm:$0xff] %v3293_v29  ;;  %v3265_v4 = vmax.f32 %v6981_v19, 0.0  ;;  %3326 = vst [vmem:[#allocation2 + $0xc8] sm:$0xff] %v3294_v1  ;;  %v3296_v18 = vpack.c.bf16 %v3260_v17, %v3258_v49  ;;  %v3267_v12 = vmax.f32 %v6982_v36, 0.0  ;;  %v3266_v20 = vmax.f32 %v6514_v14, 0.0 }
 0x60c   : > { %v3297_v0 = vpack.c.bf16 %v3263_v59, %v3261_v41  ;;  %3327 = vst [vmem:[#allocation2 + $0xd0] sm:$0xff] %v3295_v60  ;;  %v3298_v22 = vpack.c.bf16 %v3264_v58, %v3262_v23  ;;  %v3268_v56 = vmax.f32 %v6517_v15, 0.0 }
 0x60d   : > { %3328 = vst [vmem:[#allocation2 + $0xd8] sm:$0xff] %v3296_v18  ;;  %v3299_v34 = vpack.c.bf16 %v3267_v12, %v3265_v4 }
 0x60e   : > { %3329 = vst [vmem:[#allocation2 + $0xe0] sm:$0xff] %v3297_v0  ;;  %3330 = vst [vmem:[#allocation2 + $0xe8] sm:$0xff] %v3298_v22  ;;  %v3300_v46 = vpack.c.bf16 %v3268_v56, %v3266_v20 }
 0x60f   : > { %3331 = vst [vmem:[#allocation2 + $0xf0] sm:$0xff] %v3299_v34 }
 0x610   : > { %3332 = vst [vmem:[#allocation2 + $0xf8] sm:$0xff] %v3300_v46 }
 0x611 PF: > { %p3995_p6 = scmp.ne.s32.totalorder %s4991_s17, 1 }
 0x612   : > { %v6983_v29 = vld [vmem:[#allocation22_spill] sm:$0xff] (!%p3995_p6)  ;;  %v6984_v49 = vld [vmem:[#allocation33_spill] sm:$0xff] (!%p3995_p6)  ;;  %v6986_v41 = vld [vmem:[#allocation23_spill] sm:$0xff] (!%p3995_p6)  ;;  %v3342_v4 = vpack.c.bf16 (!%p3995_p6), %v6439_v2, %v6436_v9  ;;  %v3341_v0 = vpack.c.bf16 (!%p3995_p6), %v6183_v51, %v6180_v50  ;;  %s6989_s11 = sld [smem:[#allocation64_spill]] (!%p3995_p6)  ;;  %v3344_v36 = vpack.c.bf16 (!%p3995_p6), %v6445_v40, %v6442_v53  ;;  %v4893_v20 = vmov (!%p3995_p6), 0   ;;  %s7006_s19 = sld [smem:[#allocation65_spill]] (!%p3995_p6) }
 0x613   : > { %3336 = sbr.rel (%p3995_p6) target bundleno = 2061 (0x80d), region = 116  ;;  %v3338_v24 = vpack.c.bf16 (!%p3995_p6), %v6983_v29, %v6424_v44  ;;  %v6985_v1 = vld [vmem:[#allocation37_spill] sm:$0xff] (!%p3995_p6)  ;;  %v3340_v26 = vpack.c.bf16 (!%p3995_p6), %v6433_v32, %v6986_v41  ;;  %v4582_v59 = vld [vmem:[#allocation8 + $0x4] ss:$8 sps:$4 sm:$0xff] (!%p3995_p6)   ;;  %v4583_v60 = vld [vmem:[#allocation9 + $0x40] sm:$0xff] (!%p3995_p6)   ;;  %4579 = vset.pattern.permute.xlu0 (!%p3995_p6), %v4893_v20  ;;  %v3343_v2 = vpack.c.bf16 (!%p3995_p6), %v6189_v21, %v6186_v45  ;;  %v3346_v51 = vpack.c.bf16 (!%p3995_p6), %v6451_v42, %v6448_v13 }
 0x614   : > { %v3337_v17 = vpack.c.bf16 (!%p3995_p6), %v6985_v1, %v6984_v49  ;;  %v6987_v23 = vld [vmem:[#allocation38_spill] sm:$0xff] (!%p3995_p6)  ;;  %v6988_v58 = vld [vmem:[#allocation39_spill] sm:$0xff] (!%p3995_p6)  ;;  %v4584_v18 = vld [vmem:[#allocation9] sm:$0xff] (!%p3995_p6)   ;;  %3413 = vmatprep.mubr.bf16.mxu0 (!%p3995_p6), %v4582_v59  ;;  %4022 = vmatprep.subr.bf16.mxu1 (!%p3995_p6), %v4583_v60  ;;  %v3345_v22 = vpack.c.bf16 (!%p3995_p6), %v6195_v11, %v6192_v10  ;;  %v3348_v45 = vpack.c.bf16 (!%p3995_p6), %v6457_v16, %v6454_v28 }
 0x615   : > { %3381 = vmatprep.subr.bf16.mxu0 (!%p3995_p6), %v3338_v24  ;;  %v3339_v19 = vpack.c.bf16 (!%p3995_p6), %v6988_v58, %v6987_v23  ;;  %v4585_v44 = vld [vmem:[#allocation9 + $0x48] sm:$0xff] (!%p3995_p6)   ;;  %4023 = vmatpush3.bf16.msra.mxu1 (!%p3995_p6), %v4584_v18  ;;  %v4587_v9 = vld [vmem:[#allocation9 + $0x50] sm:$0xff] (!%p3995_p6)   ;;  %v4589_v40 = vld [vmem:[#allocation9 + $0x58] sm:$0xff] (!%p3995_p6)   ;;  %v3347_v13 = vpack.c.bf16 (!%p3995_p6), %v6201_v55, %v6198_v54  ;;  %v3350_v42 = vpack.c.bf16 (!%p3995_p6), %v6463_v5, %v6460_v48 }
 0x616   : > { %3382 = vmatpush1.bf16.msra.mxu0 (!%p3995_p6), %v3337_v17  ;;  %v4586_v12 = vld [vmem:[#allocation9 + $0x8] sm:$0xff] (!%p3995_p6)   ;;  %4024 = vmatprep.subr.bf16.mxu1 (!%p3995_p6), %v4585_v44  ;;  %v4588_v53 = vld [vmem:[#allocation9 + $0x10] sm:$0xff] (!%p3995_p6)   ;;  %v4590_v21 = vld [vmem:[#allocation9 + $0x18] sm:$0xff] (!%p3995_p6)   ;;  %v3349_v11 = vpack.c.bf16 (!%p3995_p6), %v6207_v61, %v6204_v30  ;;  %v3352_v28 = vpack.c.bf16 (!%p3995_p6), %v6469_v57, %v6466_v38  ;;  %v3351_v54 = vpack.c.bf16 (!%p3995_p6), %v6213_v25, %v6210_v31 }
 0x617   : > { %3383 = vmatprep.subr.bf16.mxu0 (!%p3995_p6), %v3340_v26  ;;  %v4591_v56 = vld [vmem:[#allocation9 + $0x60] sm:$0xff] (!%p3995_p6)   ;;  %v4593_v10 = vld [vmem:[#allocation9 + $0x68] sm:$0xff] (!%p3995_p6)   ;;  %v3354_v55 = vpack.c.bf16 (!%p3995_p6), %v6475_v43, %v6472_v39  ;;  %v6990_v48 = vld [vmem:[#allocation43_spill] sm:$0xff] (!%p3995_p6)  ;;  %v3356_v61 = vpack.c.bf16 (!%p3995_p6), %v6481_v37, %v6478_v8  ;;  %v3358_v31 = vpack.c.bf16 (!%p3995_p6), %v6487_v7, %v6484_v3  ;;  %v3360_v29 = vpack.c.bf16 (!%p3995_p6), %v6493_v52, %v6490_v33 }
 0x618   : > { %v3424_v32 = vld [vmem:[%s6989_s11] sm:$0xff] (!%p3995_p6)  ;;  %v3425_v50 = vld [vmem:[%s6989_s11 + $0x8] sm:$0xff] (!%p3995_p6)  ;;  %v4592_v34 = vld [vmem:[#allocation9 + $0x20] sm:$0xff] (!%p3995_p6)   ;;  %v3362_v37 = vpack.c.bf16 (!%p3995_p6), %v6499_v27, %v6496_v35  ;;  %v3364_v7 = vpack.c.bf16 (!%p3995_p6), %v6505_v47, %v6502_v6  ;;  %v3366_v52 = vpack.c.bf16 (!%p3995_p6), %v6511_v63, %v6508_v62  ;;  %v3368_v27 = vpack.c.bf16 (!%p3995_p6), %v6517_v15, %v6514_v14 }
 0x619   : > { %3428 = vperm.xlu0 (!%p3995_p6), %4579, %v3424_v32   ;;  %4025 = vmatpush3.bf16.msra.mxu1 (!%p3995_p6), %v4586_v12  ;;  %v4594_v16 = vld [vmem:[#allocation9 + $0x28] sm:$0xff] (!%p3995_p6)   ;;  %v6991_v5 = vld [vmem:[#allocation46_spill] sm:$0xff] (!%p3995_p6)  ;;  %v6992_v38 = vld [vmem:[#allocation47_spill] sm:$0xff] (!%p3995_p6) }
 0x61a   : > { %3384 = vmatpush1.bf16.msra.mxu0 %v3339_v19  ;;  %4026 = vmatprep.subr.bf16.mxu1 %v4587_v9  ;;  %v3353_v30 = vpack.c.bf16 %v6991_v5, %v6990_v48  ;;  %v6993_v57 = vld [vmem:[#allocation48_spill] sm:$0xff]  ;;  %v6994_v25 = vld [vmem:[#allocation49_spill] sm:$0xff]  ;;  %v6995_v39 = vld [vmem:[#allocation50_spill] sm:$0xff] }
 0x61b   : > { %3385 = vmatprep.subr.bf16.mxu0 %v3342_v4  ;;  %v3355_v46 = vpack.c.bf16 %v6993_v57, %v6992_v38  ;;  %v3357_v43 = vpack.c.bf16 %v6995_v39, %v6994_v25  ;;  %v6996_v24 = vld [vmem:[#allocation51_spill] sm:$0xff]  ;;  %v6997_v49 = vld [vmem:[#allocation52_spill] sm:$0xff]  ;;  %v6998_v1 = vld [vmem:[#allocation53_spill] sm:$0xff] }
 0x61c   : > { %v3359_v8 = vpack.c.bf16 %v6997_v49, %v6996_v24  ;;  %v6999_v17 = vld [vmem:[#allocation54_spill] sm:$0xff]  ;;  %v7000_v41 = vld [vmem:[#allocation55_spill] sm:$0xff]  ;;  %v7001_v26 = vld [vmem:[#allocation56_spill] sm:$0xff] }
 0x61d   : > { %3433 = vperm.xlu0 %4579, %v3425_v50   ;;  %4027 = vmatpush3.bf16.msra.mxu1 %v4588_v53  ;;  %v3361_v3 = vpack.c.bf16 %v6999_v17, %v6998_v1  ;;  %v3363_v33 = vpack.c.bf16 %v7001_v26, %v7000_v41  ;;  %v7002_v59 = vld [vmem:[#allocation57_spill] sm:$0xff]  ;;  %v7003_v60 = vld [vmem:[#allocation58_spill] sm:$0xff]  ;;  %v7004_v23 = vld [vmem:[#allocation59_spill] sm:$0xff] }
 0x61e   : > { %3386 = vmatpush1.bf16.msra.mxu0 %v3341_v0  ;;  %4028 = vmatprep.subr.bf16.mxu1 %v4589_v40  ;;  %v3365_v35 = vpack.c.bf16 %v7003_v60, %v7002_v59  ;;  %v7005_v58 = vld [vmem:[#allocation60_spill] sm:$0xff]  ;;  %v4580_v47 = vld [vmem:[#allocation8] ss:$8 sps:$4 sm:$0xff]  }
 0x61f   : > { %3387 = vmatprep.subr.bf16.mxu0 %v3344_v36  ;;  %v3367_v6 = vpack.c.bf16 %v7005_v58, %v7004_v23  ;;  %v4595_v19 = vld [vmem:[#allocation9 + $0x70] sm:$0xff]   ;;  %v4597_v62 = vld [vmem:[#allocation9 + $0x78] sm:$0xff]  }
 0x620   : > { %v4596_v4 = vld [vmem:[#allocation9 + $0x30] sm:$0xff]   ;;  %v4598_v63 = vld [vmem:[#allocation9 + $0x38] sm:$0xff]  }
 0x621   : > { %4029 = vmatpush3.bf16.msra.mxu1 %v4590_v21  ;;  %v3998_v53 = vld [vmem:[%s7006_s19] ss:$0 sm:$0xff] }
 0x622   : > { %3388 = vmatpush1.bf16.msra.mxu0 %v3343_v2  ;;  %4030 = vmatprep.subr.bf16.mxu1 %v4591_v56 }
 0x623   : > { %3389 = vmatprep.subr.bf16.mxu0 %v3346_v51 }
 0x625   : > { %4031 = vmatpush3.bf16.msra.mxu1 %v4592_v34 }
 0x626   : > { %3390 = vmatpush1.bf16.msra.mxu0 %v3345_v22  ;;  %4032 = vmatprep.subr.bf16.mxu1 %v4593_v10 }
 0x627   : > { %3391 = vmatprep.subr.bf16.mxu0 %v3348_v45 }
 0x629   : > { %4033 = vmatpush3.bf16.msra.mxu1 %v4594_v16 }
 0x62a   : > { %3392 = vmatpush1.bf16.msra.mxu0 %v3347_v13  ;;  %4034 = vmatprep.subr.bf16.mxu1 %v4595_v19 }
 0x62b   : > { %3393 = vmatprep.subr.bf16.mxu0 %v3350_v42 }
 0x62d   : > { %4035 = vmatpush3.bf16.msra.mxu1 %v4596_v4 }
 0x62e   : > { %3394 = vmatpush1.bf16.msra.mxu0 %v3349_v11  ;;  %4036 = vmatprep.subr.bf16.mxu1 %v4597_v62 }
 0x62f   : > { %3395 = vmatprep.subr.bf16.mxu0 %v3352_v28 }
 0x631   : > { %4037 = vmatpush3.bf16.msra.mxu1 %v4598_v63 }
 0x632   : > { %3396 = vmatpush1.bf16.msra.mxu0 %v3351_v54 }
 0x633   : > { %3397 = vmatprep.subr.bf16.mxu0 %v3354_v55 }
 0x636   : > { %3398 = vmatpush1.bf16.msra.mxu0 %v3353_v30 }
 0x637   : > { %3399 = vmatprep.subr.bf16.mxu0 %v3356_v61 }
 0x63a   : > { %3400 = vmatpush1.bf16.msra.mxu0 %v3355_v46 }
 0x63b   : > { %3401 = vmatprep.subr.bf16.mxu0 %v3358_v31 }
 0x63e   : > { %3402 = vmatpush1.bf16.msra.mxu0 %v3357_v43 }
 0x63f   : > { %3403 = vmatprep.subr.bf16.mxu0 %v3360_v29 }
 0x642   : > { %3404 = vmatpush1.bf16.msra.mxu0 %v3359_v8 }
 0x643   : > { %3405 = vmatprep.subr.bf16.mxu0 %v3362_v37 }
 0x646   : > { %3406 = vmatpush1.bf16.msra.mxu0 %v3361_v3 }
 0x647   : > { %3407 = vmatprep.subr.bf16.mxu0 %v3364_v7 }
 0x64a   : > { %3408 = vmatpush1.bf16.msra.mxu0 %v3363_v33 }
 0x64b   : > { %3409 = vmatprep.subr.bf16.mxu0 %v3366_v52 }
 0x64e   : > { %3410 = vmatpush1.bf16.msra.mxu0 %v3365_v35 }
 0x64f   : > { %3411 = vmatprep.subr.bf16.mxu0 %v3368_v27 }
 0x652   : > { %3412 = vmatpush1.bf16.msra.mxu0 %v3367_v6 }
 0x655   : > { %3414 = vmatmul.mubr.bf16.vlgmr.msra.gmra.mrb[0].mxu0 %v4580_v47 }
 0x698   : > { %v3429_v18 = vpop.permute.xlu0 %3428 }
 0x69c   : > { %v3434_v14 = vpop.permute.xlu0 %3433 }
 0x728   : > { %v3415_v44 = vpop.f32.mrb[0].mxu0 }
 0x729   : > { %v3417_v0 = vpop.f32.mrb[1].mxu0  ;;  %v3436_v32 = vmul.f32 %v3429_v18, %v3415_v44 }
 0x72a   : > { %v3419_v15 = vpop.f32.mrb[2].mxu0  ;;  %v3437_v20 = vmul.f32 %v3429_v18, %v3417_v0 }
 0x72b   : > { %v3438_v36 = vmul.f32 %v3434_v14, %v3419_v15  ;;  %v3421_v12 = vpop.f32.mrb[3].mxu0 }
 0x72c   : > { %v3439_v9 = vmul.f32 %v3434_v14, %v3421_v12 }
 0x72d   : > { %v3440_v2 = vpack.c.bf16 %v3438_v36, %v3436_v32 }
 0x72e   : > { %v3441_v50 = vpack.c.bf16 %v3439_v9, %v3437_v20 }
 0x730   : > { %3609 = vmatprep.mubr.bf16.mxu1 %v3441_v50 }
 0x731   : > { %3610 = vmatmul.mubr.bf16.vlgmr.msra.gmra.mrb[0].mxu1 %v3440_v2 }
 0x804   : > { %v4038_v51 = vpop.f32.mrb[0].mxu1 }
 0x805   : > { %v4039_v40 = vpop.f32.mrb[1].mxu1 }
 0x806   : > { %v4040_v22 = vadd.f32 %v4039_v40, %v4038_v51  ;;  %v4041_v45 = vpop.f32.mrb[2].mxu1 }
 0x807   : > { %v4042_v21 = vpop.f32.mrb[3].mxu1 }
 0x808   : > { %v3612_v56 = vadd.f32 %v4040_v22, %v3998_v53  ;;  %v4043_v13 = vadd.f32 %v4042_v21, %v4041_v45 }
 0x80a   : > { %3618 = vst [vmem:[#allocation14] sm:$0xff] %v3612_v56  ;;  %v3615_v42 = vadd.f32 %v4043_v13, %v3998_v53 }
 0x80c   : > { %3619 = vst [vmem:[#allocation14 + $0x8] sm:$0xff] %v3615_v42 }
 0x80d PF: > { %s4894_s24 = smov [#allocation14]  }
 0x80e   : > { %s3626_s6 = sshll.u32 %s4894_s24, 4  ;;  %s3627_s6 = int_to_ptr.vmem [resolvable:$true] %s3626_s6 }
 0x80f   : > { %s4801_s12 = scalar_lea.vmem %s3627_s6, 256  ;;  %p4808_p9 = scmp.lt.s32.totalorder %s3627_s6, %s3627_s6 }
 0x810   : > { %p4802_p8 = scmp.ne.s32.totalorder %s3627_s6, %s4801_s12  ;;  %p4809_p12 = scmp.lt.s32.totalorder %s4801_s12, %s4801_s12 }
 0x812   : > { %p4803_p1 = pnand %p4802_p8, %p3994_p13  ;;  %p4810_p0 = por %p4809_p12, %p4808_p9 }
 0x814   : > { %p4804_p10 = pneg %p4803_p1 }
 0x816   : > { %p4811_p3 = pnand %p4810_p0, %p4804_p10 }
 0x818   : > { %4814 = shalt.err (!%p4811_p3)
}
 0x819   : > { %s7007_s8 = sld [smem:[#allocation71_spill]] }
 0x81f   : > { %s4815_s14 = scalar_lea.hbm %s7007_s8, 256 }
 0x820   : > { %p4816_p7 = scmp.ne.s32.totalorder %s7007_s8, %s4815_s14  ;;  %p4821_p4 = scmp.lt.u32.totalorder %s4815_s14, %s7007_s8 }
 0x822   : > { %p4817_p11 = pnand %p4816_p7, %p3994_p13 }
 0x824   : > { %p4818_p2 = pneg %p4817_p11 }
 0x826   : > { %p4823_p5 = pnand %p4821_p4, %p4818_p2 }
 0x828   : > { %4826 = shalt.err (!%p4823_p5)
}
 0x829   : > { %s4895_s18 = smov 128   ;;  %s4896_s22 = smov 8  }
 0x82a   : > { %4259 = dma.vmem_to_hbm [thread:$0]  (%p3994_p13), %s3627_s6, 256, %s7007_s8, [#allocation5], %s4895_s18, %s4895_s18, %s4896_s22  }
 0x82b   : > { %4860 = dma.done.wait (%p3994_p13), [#allocation5], 256  }
 0x82c   : > { %4862 = vsyncadd (%p3994_p13), [#allocation5], 4294967040 }
 0x82d PF: > { %s7008_s16 = sld [smem:[#allocation20_spill]]  ;;  %s7009_s4 = sld [smem:[#allocation21_spill]] }
 0x82e   : > { %s7010_s29 = smov %s4869_s30  ;;  %s7011_s30 = smov %s4873_s15 }
 0x833   : > { %p25_p6 = scmp.ge.s32.totalorder %s7008_s16, 4   ;;  %s7012_s15 = smov %s7009_s4 }
 0x835   :  { %27 = sbr.rel (!%p25_p6) target bundleno = 17 (0x11), region = 174 }
 0x83c   :  { %3642 = vsyncpa [#allocation4], 1 }
 0x83d   :  { %3644 = vsyncpa [#allocation4 + $0x1], 1 }
 0x83e   :  { %3645 = vsyncpa [#allocation7], 1 }
 0x83f   :  { %3646 = vsyncpa [#allocation10], 1 }
 0x840   :  { %3647 = vsyncpa [#allocation5], 1 }
 0x841   :  { %3649 = vsyncpa [#allocation5 + $0x1], 1 }

</bundles_post_ra>
